<compile_context>
chip_gen: v5e
topology: v5e:2x2
jax: 0.10.0
libtpu: 0.0.40
codegen_flags: <defaults>
</compile_context>

<pallas_src>
import math

import jax
import jax.numpy as jnp
from jax import lax
from jax.experimental import pallas as pl
from jax.experimental.pallas import tpu as pltpu

BN_EPS = 1e-5


# -----------------------------------------------------------------------------
# Pallas fused matmul kernel:  out = act(X @ W + bias)
#   * operands are bf16 (MXU native), accumulation in f32 via preferred_element_type
#   * bias/epilogue in f32 (safe on v5e which has no bf16 VPU), output cast on store
#   * single K step (all contractions in this model fit one block), so no accumulator
# -----------------------------------------------------------------------------
def _round_up(x, m):
    return ((x + m - 1) // m) * m


def _make_kernel(relu):
    def kernel(x_ref, w_ref, b_ref, o_ref):
        acc = jnp.dot(x_ref[...], w_ref[...], preferred_element_type=jnp.float32)
        y = acc + b_ref[...]
        if relu:
            y = jnp.maximum(y, 0.0)
        o_ref[...] = y.astype(o_ref.dtype)

    return kernel


# TODO(synk): if this kernel is reused with very large contraction dims (K >> 2048),
# add a K grid axis + f32 VMEM accumulator (P1+P3); every K in this model fits one block.
def fused_matmul(x, lin, relu=False, out_dtype=jnp.bfloat16):
    """x: [M, K]; lin = {'w': bf16 [K, N] (BN-scale folded), 'b': f32 [1, N]} -> [M, N]."""
    w = lin["w"]
    b = lin["b"]
    M, K = x.shape
    N = w.shape[1]

    xb = x if x.dtype == jnp.bfloat16 else x.astype(jnp.bfloat16)

    TM, TN = 256, 256  # caps: fills v6e/v7x 256x256 MXU; fine on v5e; tiny VMEM footprint
    if M <= TM:
        tm, Mp = M, M  # full-extent block (always legal), no padding
    else:
        tm = TM
        Mp = _round_up(M, TM)
        if Mp != M:
            xb = jnp.pad(xb, ((0, Mp - M), (0, 0)))
    if N <= TN:
        tn, Np = N, N
        wp, bp = w, b
    else:
        tn = TN
        Np = _round_up(N, TN)
        wp = jnp.pad(w, ((0, 0), (0, Np - N))) if Np != N else w
        bp = jnp.pad(b, ((0, 0), (0, Np - N))) if Np != N else b

    grid = (Mp // tm, Np // tn)
    out = pl.pallas_call(
        _make_kernel(relu),
        out_shape=jax.ShapeDtypeStruct((Mp, Np), out_dtype),
        grid_spec=pltpu.PrefetchScalarGridSpec(
            num_scalar_prefetch=0,
            grid=grid,
            in_specs=[
                pl.BlockSpec((tm, K), lambda i, j: (i, 0)),
                pl.BlockSpec((K, tn), lambda i, j: (0, j)),
                pl.BlockSpec((1, tn), lambda i, j: (0, j)),
            ],
            out_specs=pl.BlockSpec((tm, tn), lambda i, j: (i, j)),
        ),
        compiler_params=pltpu.CompilerParams(
            dimension_semantics=("parallel", "parallel")
        ),
    )(xb, wp, bp)
    if Mp != M or Np != N:
        out = out[:M, :N]
    return out


def dense_nd(x, lin, relu=False, out_dtype=jnp.bfloat16):
    """Apply the fused matmul over the last axis of an arbitrary-rank tensor."""
    shp = x.shape
    y = fused_matmul(x.reshape(-1, shp[-1]), lin, relu, out_dtype)
    return y.reshape(*shp[:-1], y.shape[-1])


# -----------------------------------------------------------------------------
# Parameter folding: BN scale into weight, conv-bias + BN shift into bias (done once).
# -----------------------------------------------------------------------------
def fold_lin(w, b=None, bn=None):
    cout = w.shape[1]
    bias = b if b is not None else jnp.zeros((cout,), jnp.float32)
    scale = jnp.ones((cout,), jnp.float32)
    if bn is not None:
        gamma, beta, mean, var = bn
        s = gamma / jnp.sqrt(var + BN_EPS)
        bias = (bias - mean) * s + beta
        scale = s
    return dict(
        w=(w * scale[None, :]).astype(jnp.bfloat16),
        b=bias.astype(jnp.float32).reshape(1, cout),
    )


def conv_res_block(x, p):
    """ConvBNReLURes1D (groups=1), channels-last x: relu(BN(conv(relu(BN(conv(x))))) + x)."""
    y = dense_nd(x, p["lin1"], relu=True)
    y = dense_nd(y, p["lin2"], relu=False)
    return jnp.maximum(y + x, 0.0)


# -----------------------------------------------------------------------------
# Point-cloud utilities (plain JAX glue: gathers, sort, top-k, FPS)
# -----------------------------------------------------------------------------
def index_points(points, idx):
    """points [B,N,C], idx [B,S] -> [B,S,C]."""
    return jnp.take_along_axis(points, idx[..., None], axis=1)


def index_points_nd(points, idx):
    """points [B,N,C], idx [B,S,K] -> [B,S,K,C]."""
    B, S, K = idx.shape
    flat = index_points(points, idx.reshape(B, S * K))
    return flat.reshape(B, S, K, points.shape[-1])


def square_distance(src, dst):
    dist = -2.0 * jnp.einsum("bnc,bmc->bnm", src, dst)
    dist += jnp.sum(src**2, axis=-1)[:, :, None]
    dist += jnp.sum(dst**2, axis=-1)[:, None, :]
    return dist


def furthest_point_sample(xyz, S):
    """xyz [B,N,3] -> indices [B,S] (iterative FPS starting at index 0)."""
    B, N, _ = xyz.shape

    def body(i, state):
        dists, idxs, last = state
        last_pt = jnp.take_along_axis(xyz, last[:, None, None], axis=1)  # [B,1,3]
        d = jnp.sum((xyz - last_pt) ** 2, axis=-1)
        dists = jnp.minimum(dists, d)
        nxt = jnp.argmax(dists, axis=-1).astype(jnp.int32)
        idxs = idxs.at[:, i].set(nxt)
        return dists, idxs, nxt

    dists = jnp.full((B, N), 1e10, jnp.float32)
    idxs = jnp.zeros((B, S), jnp.int32)
    last = jnp.zeros((B,), jnp.int32)
    _, idxs, _ = lax.fori_loop(1, S, body, (dists, idxs, last))
    return idxs


def query_ball_point(radius, nsample, xyz, new_xyz):
    B, N, _ = xyz.shape
    S = new_xyz.shape[1]
    sqrdists = square_distance(new_xyz, xyz)  # [B,S,N]
    group_idx = jnp.broadcast_to(
        jnp.arange(N, dtype=jnp.int32)[None, None, :], (B, S, N)
    )
    group_idx = jnp.where(sqrdists > radius**2, N, group_idx)
    group_idx = jnp.sort(group_idx, axis=-1)[:, :, :nsample]
    group_first = jnp.broadcast_to(group_idx[:, :, 0:1], (B, S, nsample))
    return jnp.where(group_idx == N, group_first, group_idx)


def bknn(xyz, k):
    """xyz channels-last [B, N, 3] -> kNN indices [B, N, k]."""
    inner = 2.0 * jnp.einsum("bnc,bmc->bnm", xyz, xyz)
    xx = jnp.sum(xyz * xyz, axis=-1)  # [B, N]
    pairwise = xx[:, :, None] - inner + xx[:, None, :]
    _, idx = lax.top_k(-pairwise, k)
    return idx.astype(jnp.int32)


# -----------------------------------------------------------------------------
# Model blocks (all channels-last)
# -----------------------------------------------------------------------------
def local_grouper(xyz, points, S, K, radius):
    """xyz [B,N,3] f32, points [B,N,D] -> new_xyz [B,S,3], new_points [B,S,K,2D+3]."""
    B = xyz.shape[0]
    fps_idx = furthest_point_sample(xyz, S)
    new_xyz = index_points(xyz, fps_idx)
    new_points = index_points(points, fps_idx)
    idx = query_ball_point(radius, K, xyz, new_xyz)
    grouped_xyz = index_points_nd(xyz, idx)
    grouped_points = index_points_nd(points, idx)
    grouped_points = jnp.concatenate([grouped_points, grouped_xyz], axis=-1)
    rep = jnp.broadcast_to(
        new_points[:, :, None, :], (B, S, K, new_points.shape[-1])
    )
    return new_xyz, jnp.concatenate([grouped_points, rep], axis=-1)


def pre_extraction(grouped, p):
    """grouped: [B, S, K, D] -> [B, S, Cout] (channels-last)."""
    B, S, K, D = grouped.shape
    x2 = grouped.reshape(B * S, K, D)
    y = dense_nd(x2, p["transfer"], relu=True)  # [B*S, K, Cout]
    for blk in p["blocks"]:
        y = conv_res_block(y, blk)
    y = jnp.max(y, axis=1)  # adaptive_max_pool1d(., 1) over neighbors
    return y.reshape(B, S, -1)


def surface_conv(xyz, feat, p, k):
    """xyz: [B, S, 3], feat: [B, S, F] -> [B, S, F] (channels-last)."""
    feat = feat * p["bn0_scale"] + p["bn0_bias"]  # inference BN0, elementwise

    cat = jnp.concatenate([feat, xyz], axis=-1)   # [B, S, F+3]
    feat0 = dense_nd(cat, p["g_lin"])             # Linear(F+3 -> F/2), no bias

    idx = bknn(xyz, k)                            # [B, S, k]

    def group_max(f):                             # f: [B, S, F']
        g = index_points_nd(f, idx)               # [B, S, k, F']
        return jnp.max(g, axis=2)

    feat1 = group_max(feat0)
    feat2 = group_max(feat1)
    feat3 = group_max(feat2)
    feat4 = group_max(feat2)  # mirrors the original code: feat4 groups feat2 again

    rel = jnp.concatenate(
        [feat1 - feat0, feat2 - feat0, feat3 - feat0, feat4 - feat0], axis=-1
    )
    out = dense_nd(rel, p["h_lin"])  # h_func + BN2 folded
    return out + feat


def classifier_fwd(x, p):
    # Dropout layers are identity (eval mode).
    y = dense_nd(x, p["l1"], relu=True)
    y = dense_nd(y, p["l2"], relu=True)
    return dense_nd(y, p["l3"], relu=False, out_dtype=jnp.float32)


def model_forward(x, params, cfg):
    """x: [B, 3, N] -> logits [B, class_num]."""
    xyz = x.transpose(0, 2, 1)                       # [B, N, 3], f32 geometry
    feat = dense_nd(xyz, params["embed"], relu=True)  # embedding: [B, N, embed]
    for i in range(cfg["stages"]):
        S = cfg["anchor"][i]
        K = cfg["k_neighbors"][i]
        r = cfg["radius"][i]
        xyz, grouped = local_grouper(xyz, feat, S, K, r)
        feat = pre_extraction(grouped, params["pre"][i])            # [B, S, C]
        feat = surface_conv(xyz, feat, params["lap"][i], cfg["surf_k"])
        for blk in params["pos"][i]:
            feat = conv_res_block(feat, blk)
    g = jnp.max(feat, axis=1)  # adaptive_max_pool1d(., 1).squeeze(-1)
    return classifier_fwd(g, params["cls"])


# -----------------------------------------------------------------------------
# Deterministic parameter initialization (synthetic weights, inference-mode BN),
# with BN folding + bf16 weight pre-cast done ONCE here.
# -----------------------------------------------------------------------------
class KeyGen:
    def __init__(self, key):
        self.key = key
        self.i = 0

    def __call__(self):
        self.i += 1
        return jax.random.fold_in(self.key, self.i)


def init_linear(kg, cin, cout, bias=True):
    w = jax.random.normal(kg(), (cin, cout), jnp.float32) * (1.0 / math.sqrt(cin))
    b = jax.random.normal(kg(), (cout,), jnp.float32) * 0.02 if bias else None
    return w, b


def init_bn(kg, c):
    gamma = 1.0 + 0.1 * jax.random.normal(kg(), (c,), jnp.float32)
    beta = 0.05 * jax.random.normal(kg(), (c,), jnp.float32)
    mean = 0.02 * jax.random.normal(kg(), (c,), jnp.float32)
    var = 1.0 + 0.1 * jax.random.uniform(kg(), (c,), jnp.float32)
    return (gamma, beta, mean, var)


def init_res_block(kg, c, mid):
    w1, b1 = init_linear(kg, c, mid)
    bn1 = init_bn(kg, mid)
    w2, b2 = init_linear(kg, mid, c)
    bn2 = init_bn(kg, c)
    return dict(lin1=fold_lin(w1, b1, bn1), lin2=fold_lin(w2, b2, bn2))


def init_params(key, cfg):
    kg = KeyGen(key)
    p = {}
    ed = cfg["embed_dim"]
    w, b = init_linear(kg, 3, ed)
    p["embed"] = fold_lin(w, b, init_bn(kg, ed))

    last = ed
    p["pre"], p["lap"], p["pos"] = [], [], []
    for i in range(cfg["stages"]):
        out = last * cfg["dim_expansion"][i]
        mid = int(out * cfg["res_expansion"])
        tw, tb = init_linear(kg, 2 * last + 3, out)
        p["pre"].append(
            dict(
                transfer=fold_lin(tw, tb, init_bn(kg, out)),
                blocks=[init_res_block(kg, out, mid) for _ in range(cfg["pre_blocks"][i])],
            )
        )
        half = int(0.5 * out)
        gw, _ = init_linear(kg, out + 3, half, bias=False)
        hw, _ = init_linear(kg, 4 * half, out, bias=False)
        bn0 = init_bn(kg, out)
        bn2 = init_bn(kg, out)
        g0, b0, m0, v0 = bn0
        s0 = g0 / jnp.sqrt(v0 + BN_EPS)
        p["lap"].append(
            dict(
                bn0_scale=s0,
                bn0_bias=b0 - m0 * s0,
                g_lin=fold_lin(gw, None, None),
                h_lin=fold_lin(hw, None, bn2),
            )
        )
        p["pos"].append(
            [init_res_block(kg, out, mid) for _ in range(cfg["pos_blocks"][i])]
        )
        last = out

    w1, b1 = init_linear(kg, last, 512)
    bn1 = init_bn(kg, 512)
    w2, b2 = init_linear(kg, 512, 256)
    bn2 = init_bn(kg, 256)
    w3, b3 = init_linear(kg, 256, cfg["class_num"])
    p["cls"] = dict(
        l1=fold_lin(w1, b1, bn1),
        l2=fold_lin(w2, b2, bn2),
        l3=fold_lin(w3, b3, None),
    )
    return p


# -----------------------------------------------------------------------------
if __name__ == "__main__":
    # Small config consistent with the module structure (2 stages).
    cfg = dict(
        points=64,
        class_num=10,
        embed_dim=16,
        stages=2,
        dim_expansion=[2, 2],
        pre_blocks=[1, 1],
        pos_blocks=[1, 1],
        k_neighbors=[8, 8],
        reducers=[2, 2],
        radius=[0.2, 0.4],
        res_expansion=0.25,
        surf_k=10,  # Model hard-codes SurfaceConv(anchor_points, 10, out_channel)
    )
    anchors, a = [], cfg["points"]
    for r in cfg["reducers"]:
        a //= r
        anchors.append(a)
    cfg["anchor"] = anchors

    key = jax.random.PRNGKey(0)
    params = init_params(jax.random.fold_in(key, 1), cfg)
    B = 2
    x = jax.random.normal(jax.random.fold_in(key, 2), (B, 3, cfg["points"]), jnp.float32)

    fwd = jax.jit(lambda xx: model_forward(xx, params, cfg))
    out = fwd(x)
    out = jax.block_until_ready(out)
    assert out.shape == (B, cfg["class_num"]), out.shape
    assert bool(jnp.all(jnp.isfinite(out)))
    print("KERNEL_OK")
</pallas_src>

<mosaic_0001>
module attributes {stable_mosaic.version = 11 : i64} {
  func.func @kernel(%arg0: i32, %arg1: i32, %arg2: memref<128x3xbf16, #tpu.memory_space<vmem>>, %arg3: memref<3x16xbf16, #tpu.memory_space<vmem>>, %arg4: memref<1x16xf32, #tpu.memory_space<vmem>>, %arg5: memref<128x16xbf16, #tpu.memory_space<vmem>>) attributes {dimension_semantics = [#tpu.dimension_semantics<parallel>, #tpu.dimension_semantics<parallel>], iteration_bounds = array<i64: 1, 1>, scalar_prefetch = 0 : i64, scratch_operands = 0 : i64, tpu.core_type = #tpu.core_type<tc>, window_params = [{transform_indices = @transform_0, window_bounds = array<i64: 128, 3>}, {transform_indices = @transform_1, window_bounds = array<i64: 3, 16>}, {transform_indices = @transform_2, window_bounds = array<i64: 1, 16>}, {transform_indices = @transform_3, window_bounds = array<i64: 128, 16>}]} {
    %c0 = arith.constant 0 : index
    %c0_0 = arith.constant 0 : index
    %0 = vector.load %arg2[%c0, %c0_0] : memref<128x3xbf16, #tpu.memory_space<vmem>>, vector<128x3xbf16>
    %c0_1 = arith.constant 0 : index
    %c0_2 = arith.constant 0 : index
    %1 = vector.load %arg3[%c0_1, %c0_2] : memref<3x16xbf16, #tpu.memory_space<vmem>>, vector<3x16xbf16>
    %cst = arith.constant dense<0.000000e+00> : vector<128x16xf32>
    %2 = tpu.matmul %0, %1, %cst {dimension_numbers = #tpu.dot_dimension_numbers<[1], [0], [0], [1], [0, 0, 1, 1], [], []>} : vector<128x3xbf16>, vector<3x16xbf16>, vector<128x16xf32> -> vector<128x16xf32>
    %c0_3 = arith.constant 0 : index
    %c0_4 = arith.constant 0 : index
    %3 = vector.load %arg4[%c0_3, %c0_4] : memref<1x16xf32, #tpu.memory_space<vmem>>, vector<1x16xf32>
    %4 = vector.broadcast %3 : vector<1x16xf32> to vector<128x16xf32>
    %5 = arith.addf %2, %4 : vector<128x16xf32>
    %cst_5 = arith.constant 0.000000e+00 : f32
    %6 = vector.broadcast %cst_5 : f32 to vector<128x16xf32>
    %7 = arith.maximumf %5, %6 : vector<128x16xf32>
    %8 = arith.truncf %7 : vector<128x16xf32> to vector<128x16xbf16>
    %c0_6 = arith.constant 0 : index
    %c0_7 = arith.constant 0 : index
    %9 = vector.load %arg5[%c0_6, %c0_7] : memref<128x16xbf16, #tpu.memory_space<vmem>>, vector<128x16xbf16>
    tpu.vector_store %arg5[%c0_6, %c0_7], %8 {strides = array<i32>} : memref<128x16xbf16, #tpu.memory_space<vmem>>, vector<128x16xbf16>,
    return
  }
  func.func @transform_0(%arg0: i32, %arg1: i32) -> (i32, i32) {
    %c0_i32 = arith.constant 0 : i32
    %c0_i32_0 = arith.constant 0 : i32
    return %arg0, %c0_i32 : i32, i32
  }
  func.func @transform_1(%arg0: i32, %arg1: i32) -> (i32, i32) {
    %c0_i32 = arith.constant 0 : i32
    %c0_i32_0 = arith.constant 0 : i32
    return %c0_i32, %arg1 : i32, i32
  }
  func.func @transform_2(%arg0: i32, %arg1: i32) -> (i32, i32) {
    %c0_i32 = arith.constant 0 : i32
    %c0_i32_0 = arith.constant 0 : i32
    return %c0_i32, %arg1 : i32, i32
  }
  func.func @transform_3(%arg0: i32, %arg1: i32) -> (i32, i32) {
    %c0_i32 = arith.constant 0 : i32
    return %arg0, %arg1 : i32, i32
  }
}

module attributes {stable_mosaic.version = 11 : i64} {
  func.func @kernel(%arg0: i32, %arg1: i32, %arg2: memref<256x35xbf16, #tpu.memory_space<vmem>>, %arg3: memref<35x32xbf16, #tpu.memory_space<vmem>>, %arg4: memref<1x32xf32, #tpu.memory_space<vmem>>, %arg5: memref<256x32xbf16, #tpu.memory_space<vmem>>) attributes {dimension_semantics = [#tpu.dimension_semantics<parallel>, #tpu.dimension_semantics<parallel>], iteration_bounds = array<i64: 2, 1>, scalar_prefetch = 0 : i64, scratch_operands = 0 : i64, tpu.core_type = #tpu.core_type<tc>, window_params = [{transform_indices = @transform_0, window_bounds = array<i64: 256, 35>}, {transform_indices = @transform_1, window_bounds = array<i64: 35, 32>}, {transform_indices = @transform_2, window_bounds = array<i64: 1, 32>}, {transform_indices = @transform_3, window_bounds = array<i64: 256, 32>}]} {
    %c0 = arith.constant 0 : index
    %c0_0 = arith.constant 0 : index
    %0 = vector.load %arg2[%c0, %c0_0] : memref<256x35xbf16, #tpu.memory_space<vmem>>, vector<256x35xbf16>
    %c0_1 = arith.constant 0 : index
    %c0_2 = arith.constant 0 : index
    %1 = vector.load %arg3[%c0_1, %c0_2] : memref<35x32xbf16, #tpu.memory_space<vmem>>, vector<35x32xbf16>
    %cst = arith.constant dense<0.000000e+00> : vector<256x32xf32>
    %2 = tpu.matmul %0, %1, %cst {dimension_numbers = #tpu.dot_dimension_numbers<[1], [0], [0], [1], [0, 0, 1, 1], [], []>} : vector<256x35xbf16>, vector<35x32xbf16>, vector<256x32xf32> -> vector<256x32xf32>
    %c0_3 = arith.constant 0 : index
    %c0_4 = arith.constant 0 : index
    %3 = vector.load %arg4[%c0_3, %c0_4] : memref<1x32xf32, #tpu.memory_space<vmem>>, vector<1x32xf32>
    %4 = vector.broadcast %3 : vector<1x32xf32> to vector<256x32xf32>
    %5 = arith.addf %2, %4 : vector<256x32xf32>
    %cst_5 = arith.constant 0.000000e+00 : f32
    %6 = vector.broadcast %cst_5 : f32 to vector<256x32xf32>
    %7 = arith.maximumf %5, %6 : vector<256x32xf32>
    %8 = arith.truncf %7 : vector<256x32xf32> to vector<256x32xbf16>
    %c0_6 = arith.constant 0 : index
    %c0_7 = arith.constant 0 : index
    %9 = vector.load %arg5[%c0_6, %c0_7] : memref<256x32xbf16, #tpu.memory_space<vmem>>, vector<256x32xbf16>
    tpu.vector_store %arg5[%c0_6, %c0_7], %8 {strides = array<i32>} : memref<256x32xbf16, #tpu.memory_space<vmem>>, vector<256x32xbf16>,
    return
  }
  func.func @transform_0(%arg0: i32, %arg1: i32) -> (i32, i32) {
    %c0_i32 = arith.constant 0 : i32
    %c0_i32_0 = arith.constant 0 : i32
    return %arg0, %c0_i32 : i32, i32
  }
  func.func @transform_1(%arg0: i32, %arg1: i32) -> (i32, i32) {
    %c0_i32 = arith.constant 0 : i32
    %c0_i32_0 = arith.constant 0 : i32
    return %c0_i32, %arg1 : i32, i32
  }
  func.func @transform_2(%arg0: i32, %arg1: i32) -> (i32, i32) {
    %c0_i32 = arith.constant 0 : i32
    %c0_i32_0 = arith.constant 0 : i32
    return %c0_i32, %arg1 : i32, i32
  }
  func.func @transform_3(%arg0: i32, %arg1: i32) -> (i32, i32) {
    %c0_i32 = arith.constant 0 : i32
    return %arg0, %arg1 : i32, i32
  }
}

module attributes {stable_mosaic.version = 11 : i64} {
  func.func @kernel(%arg0: i32, %arg1: i32, %arg2: memref<256x32xbf16, #tpu.memory_space<vmem>>, %arg3: memref<32x8xbf16, #tpu.memory_space<vmem>>, %arg4: memref<1x8xf32, #tpu.memory_space<vmem>>, %arg5: memref<256x8xbf16, #tpu.memory_space<vmem>>) attributes {dimension_semantics = [#tpu.dimension_semantics<parallel>, #tpu.dimension_semantics<parallel>], iteration_bounds = array<i64: 2, 1>, scalar_prefetch = 0 : i64, scratch_operands = 0 : i64, tpu.core_type = #tpu.core_type<tc>, window_params = [{transform_indices = @transform_0, window_bounds = array<i64: 256, 32>}, {transform_indices = @transform_1, window_bounds = array<i64: 32, 8>}, {transform_indices = @transform_2, window_bounds = array<i64: 1, 8>}, {transform_indices = @transform_3, window_bounds = array<i64: 256, 8>}]} {
    %c0 = arith.constant 0 : index
    %c0_0 = arith.constant 0 : index
    %0 = vector.load %arg2[%c0, %c0_0] : memref<256x32xbf16, #tpu.memory_space<vmem>>, vector<256x32xbf16>
    %c0_1 = arith.constant 0 : index
    %c0_2 = arith.constant 0 : index
    %1 = vector.load %arg3[%c0_1, %c0_2] : memref<32x8xbf16, #tpu.memory_space<vmem>>, vector<32x8xbf16>
    %cst = arith.constant dense<0.000000e+00> : vector<256x8xf32>
    %2 = tpu.matmul %0, %1, %cst {dimension_numbers = #tpu.dot_dimension_numbers<[1], [0], [0], [1], [0, 0, 1, 1], [], []>} : vector<256x32xbf16>, vector<32x8xbf16>, vector<256x8xf32> -> vector<256x8xf32>
    %c0_3 = arith.constant 0 : index
    %c0_4 = arith.constant 0 : index
    %3 = vector.load %arg4[%c0_3, %c0_4] : memref<1x8xf32, #tpu.memory_space<vmem>>, vector<1x8xf32>
    %4 = vector.broadcast %3 : vector<1x8xf32> to vector<256x8xf32>
    %5 = arith.addf %2, %4 : vector<256x8xf32>
    %cst_5 = arith.constant 0.000000e+00 : f32
    %6 = vector.broadcast %cst_5 : f32 to vector<256x8xf32>
    %7 = arith.maximumf %5, %6 : vector<256x8xf32>
    %8 = arith.truncf %7 : vector<256x8xf32> to vector<256x8xbf16>
    %c0_6 = arith.constant 0 : index
    %c0_7 = arith.constant 0 : index
    %9 = vector.load %arg5[%c0_6, %c0_7] : memref<256x8xbf16, #tpu.memory_space<vmem>>, vector<256x8xbf16>
    tpu.vector_store %arg5[%c0_6, %c0_7], %8 {strides = array<i32>} : memref<256x8xbf16, #tpu.memory_space<vmem>>, vector<256x8xbf16>,
    return
  }
  func.func @transform_0(%arg0: i32, %arg1: i32) -> (i32, i32) {
    %c0_i32 = arith.constant 0 : i32
    %c0_i32_0 = arith.constant 0 : i32
    return %arg0, %c0_i32 : i32, i32
  }
  func.func @transform_1(%arg0: i32, %arg1: i32) -> (i32, i32) {
    %c0_i32 = arith.constant 0 : i32
    %c0_i32_0 = arith.constant 0 : i32
    return %c0_i32, %arg1 : i32, i32
  }
  func.func @transform_2(%arg0: i32, %arg1: i32) -> (i32, i32) {
    %c0_i32 = arith.constant 0 : i32
    %c0_i32_0 = arith.constant 0 : i32
    return %c0_i32, %arg1 : i32, i32
  }
  func.func @transform_3(%arg0: i32, %arg1: i32) -> (i32, i32) {
    %c0_i32 = arith.constant 0 : i32
    return %arg0, %arg1 : i32, i32
  }
}

module attributes {stable_mosaic.version = 11 : i64} {
  func.func @kernel(%arg0: i32, %arg1: i32, %arg2: memref<256x8xbf16, #tpu.memory_space<vmem>>, %arg3: memref<8x32xbf16, #tpu.memory_space<vmem>>, %arg4: memref<1x32xf32, #tpu.memory_space<vmem>>, %arg5: memref<256x32xbf16, #tpu.memory_space<vmem>>) attributes {dimension_semantics = [#tpu.dimension_semantics<parallel>, #tpu.dimension_semantics<parallel>], iteration_bounds = array<i64: 2, 1>, scalar_prefetch = 0 : i64, scratch_operands = 0 : i64, tpu.core_type = #tpu.core_type<tc>, window_params = [{transform_indices = @transform_0, window_bounds = array<i64: 256, 8>}, {transform_indices = @transform_1, window_bounds = array<i64: 8, 32>}, {transform_indices = @transform_2, window_bounds = array<i64: 1, 32>}, {transform_indices = @transform_3, window_bounds = array<i64: 256, 32>}]} {
    %c0 = arith.constant 0 : index
    %c0_0 = arith.constant 0 : index
    %0 = vector.load %arg2[%c0, %c0_0] : memref<256x8xbf16, #tpu.memory_space<vmem>>, vector<256x8xbf16>
    %c0_1 = arith.constant 0 : index
    %c0_2 = arith.constant 0 : index
    %1 = vector.load %arg3[%c0_1, %c0_2] : memref<8x32xbf16, #tpu.memory_space<vmem>>, vector<8x32xbf16>
    %cst = arith.constant dense<0.000000e+00> : vector<256x32xf32>
    %2 = tpu.matmul %0, %1, %cst {dimension_numbers = #tpu.dot_dimension_numbers<[1], [0], [0], [1], [0, 0, 1, 1], [], []>} : vector<256x8xbf16>, vector<8x32xbf16>, vector<256x32xf32> -> vector<256x32xf32>
    %c0_3 = arith.constant 0 : index
    %c0_4 = arith.constant 0 : index
    %3 = vector.load %arg4[%c0_3, %c0_4] : memref<1x32xf32, #tpu.memory_space<vmem>>, vector<1x32xf32>
    %4 = vector.broadcast %3 : vector<1x32xf32> to vector<256x32xf32>
    %5 = arith.addf %2, %4 : vector<256x32xf32>
    %6 = arith.truncf %5 : vector<256x32xf32> to vector<256x32xbf16>
    %c0_5 = arith.constant 0 : index
    %c0_6 = arith.constant 0 : index
    %7 = vector.load %arg5[%c0_5, %c0_6] : memref<256x32xbf16, #tpu.memory_space<vmem>>, vector<256x32xbf16>
    tpu.vector_store %arg5[%c0_5, %c0_6], %6 {strides = array<i32>} : memref<256x32xbf16, #tpu.memory_space<vmem>>, vector<256x32xbf16>,
    return
  }
  func.func @transform_0(%arg0: i32, %arg1: i32) -> (i32, i32) {
    %c0_i32 = arith.constant 0 : i32
    %c0_i32_0 = arith.constant 0 : i32
    return %arg0, %c0_i32 : i32, i32
  }
  func.func @transform_1(%arg0: i32, %arg1: i32) -> (i32, i32) {
    %c0_i32 = arith.constant 0 : i32
    %c0_i32_0 = arith.constant 0 : i32
    return %c0_i32, %arg1 : i32, i32
  }
  func.func @transform_2(%arg0: i32, %arg1: i32) -> (i32, i32) {
    %c0_i32 = arith.constant 0 : i32
    %c0_i32_0 = arith.constant 0 : i32
    return %c0_i32, %arg1 : i32, i32
  }
  func.func @transform_3(%arg0: i32, %arg1: i32) -> (i32, i32) {
    %c0_i32 = arith.constant 0 : i32
    return %arg0, %arg1 : i32, i32
  }
}

module attributes {stable_mosaic.version = 11 : i64} {
  func.func @kernel(%arg0: i32, %arg1: i32, %arg2: memref<64x35xbf16, #tpu.memory_space<vmem>>, %arg3: memref<35x16xbf16, #tpu.memory_space<vmem>>, %arg4: memref<1x16xf32, #tpu.memory_space<vmem>>, %arg5: memref<64x16xbf16, #tpu.memory_space<vmem>>) attributes {dimension_semantics = [#tpu.dimension_semantics<parallel>, #tpu.dimension_semantics<parallel>], iteration_bounds = array<i64: 1, 1>, scalar_prefetch = 0 : i64, scratch_operands = 0 : i64, tpu.core_type = #tpu.core_type<tc>, window_params = [{transform_indices = @transform_0, window_bounds = array<i64: 64, 35>}, {transform_indices = @transform_1, window_bounds = array<i64: 35, 16>}, {transform_indices = @transform_2, window_bounds = array<i64: 1, 16>}, {transform_indices = @transform_3, window_bounds = array<i64: 64, 16>}]} {
    %c0 = arith.constant 0 : index
    %c0_0 = arith.constant 0 : index
    %0 = vector.load %arg2[%c0, %c0_0] : memref<64x35xbf16, #tpu.memory_space<vmem>>, vector<64x35xbf16>
    %c0_1 = arith.constant 0 : index
    %c0_2 = arith.constant 0 : index
    %1 = vector.load %arg3[%c0_1, %c0_2] : memref<35x16xbf16, #tpu.memory_space<vmem>>, vector<35x16xbf16>
    %cst = arith.constant dense<0.000000e+00> : vector<64x16xf32>
    %2 = tpu.matmul %0, %1, %cst {dimension_numbers = #tpu.dot_dimension_numbers<[1], [0], [0], [1], [0, 0, 1, 1], [], []>} : vector<64x35xbf16>, vector<35x16xbf16>, vector<64x16xf32> -> vector<64x16xf32>
    %c0_3 = arith.constant 0 : index
    %c0_4 = arith.constant 0 : index
    %3 = vector.load %arg4[%c0_3, %c0_4] : memref<1x16xf32, #tpu.memory_space<vmem>>, vector<1x16xf32>
    %4 = vector.broadcast %3 : vector<1x16xf32> to vector<64x16xf32>
    %5 = arith.addf %2, %4 : vector<64x16xf32>
    %6 = arith.truncf %5 : vector<64x16xf32> to vector<64x16xbf16>
    %c0_5 = arith.constant 0 : index
    %c0_6 = arith.constant 0 : index
    %7 = vector.load %arg5[%c0_5, %c0_6] : memref<64x16xbf16, #tpu.memory_space<vmem>>, vector<64x16xbf16>
    tpu.vector_store %arg5[%c0_5, %c0_6], %6 {strides = array<i32>} : memref<64x16xbf16, #tpu.memory_space<vmem>>, vector<64x16xbf16>,
    return
  }
  func.func @transform_0(%arg0: i32, %arg1: i32) -> (i32, i32) {
    %c0_i32 = arith.constant 0 : i32
    %c0_i32_0 = arith.constant 0 : i32
    return %arg0, %c0_i32 : i32, i32
  }
  func.func @transform_1(%arg0: i32, %arg1: i32) -> (i32, i32) {
    %c0_i32 = arith.constant 0 : i32
    %c0_i32_0 = arith.constant 0 : i32
    return %c0_i32, %arg1 : i32, i32
  }
  func.func @transform_2(%arg0: i32, %arg1: i32) -> (i32, i32) {
    %c0_i32 = arith.constant 0 : i32
    %c0_i32_0 = arith.constant 0 : i32
    return %c0_i32, %arg1 : i32, i32
  }
  func.func @transform_3(%arg0: i32, %arg1: i32) -> (i32, i32) {
    %c0_i32 = arith.constant 0 : i32
    return %arg0, %arg1 : i32, i32
  }
}

module attributes {stable_mosaic.version = 11 : i64} {
  func.func @kernel(%arg0: i32, %arg1: i32, %arg2: memref<64x64xbf16, #tpu.memory_space<vmem>>, %arg3: memref<64x32xbf16, #tpu.memory_space<vmem>>, %arg4: memref<1x32xf32, #tpu.memory_space<vmem>>, %arg5: memref<64x32xbf16, #tpu.memory_space<vmem>>) attributes {dimension_semantics = [#tpu.dimension_semantics<parallel>, #tpu.dimension_semantics<parallel>], iteration_bounds = array<i64: 1, 1>, scalar_prefetch = 0 : i64, scratch_operands = 0 : i64, tpu.core_type = #tpu.core_type<tc>, window_params = [{transform_indices = @transform_0, window_bounds = array<i64: 64, 64>}, {transform_indices = @transform_1, window_bounds = array<i64: 64, 32>}, {transform_indices = @transform_2, window_bounds = array<i64: 1, 32>}, {transform_indices = @transform_3, window_bounds = array<i64: 64, 32>}]} {
    %c0 = arith.constant 0 : index
    %c0_0 = arith.constant 0 : index
    %0 = vector.load %arg2[%c0, %c0_0] : memref<64x64xbf16, #tpu.memory_space<vmem>>, vector<64x64xbf16>
    %c0_1 = arith.constant 0 : index
    %c0_2 = arith.constant 0 : index
    %1 = vector.load %arg3[%c0_1, %c0_2] : memref<64x32xbf16, #tpu.memory_space<vmem>>, vector<64x32xbf16>
    %cst = arith.constant dense<0.000000e+00> : vector<64x32xf32>
    %2 = tpu.matmul %0, %1, %cst {dimension_numbers = #tpu.dot_dimension_numbers<[1], [0], [0], [1], [0, 0, 1, 1], [], []>} : vector<64x64xbf16>, vector<64x32xbf16>, vector<64x32xf32> -> vector<64x32xf32>
    %c0_3 = arith.constant 0 : index
    %c0_4 = arith.constant 0 : index
    %3 = vector.load %arg4[%c0_3, %c0_4] : memref<1x32xf32, #tpu.memory_space<vmem>>, vector<1x32xf32>
    %4 = vector.broadcast %3 : vector<1x32xf32> to vector<64x32xf32>
    %5 = arith.addf %2, %4 : vector<64x32xf32>
    %6 = arith.truncf %5 : vector<64x32xf32> to vector<64x32xbf16>
    %c0_5 = arith.constant 0 : index
    %c0_6 = arith.constant 0 : index
    %7 = vector.load %arg5[%c0_5, %c0_6] : memref<64x32xbf16, #tpu.memory_space<vmem>>, vector<64x32xbf16>
    tpu.vector_store %arg5[%c0_5, %c0_6], %6 {strides = array<i32>} : memref<64x32xbf16, #tpu.memory_space<vmem>>, vector<64x32xbf16>,
    return
  }
  func.func @transform_0(%arg0: i32, %arg1: i32) -> (i32, i32) {
    %c0_i32 = arith.constant 0 : i32
    %c0_i32_0 = arith.constant 0 : i32
    return %arg0, %c0_i32 : i32, i32
  }
  func.func @transform_1(%arg0: i32, %arg1: i32) -> (i32, i32) {
    %c0_i32 = arith.constant 0 : i32
    %c0_i32_0 = arith.constant 0 : i32
    return %c0_i32, %arg1 : i32, i32
  }
  func.func @transform_2(%arg0: i32, %arg1: i32) -> (i32, i32) {
    %c0_i32 = arith.constant 0 : i32
    %c0_i32_0 = arith.constant 0 : i32
    return %c0_i32, %arg1 : i32, i32
  }
  func.func @transform_3(%arg0: i32, %arg1: i32) -> (i32, i32) {
    %c0_i32 = arith.constant 0 : i32
    return %arg0, %arg1 : i32, i32
  }
}

module attributes {stable_mosaic.version = 11 : i64} {
  func.func @kernel(%arg0: i32, %arg1: i32, %arg2: memref<64x32xbf16, #tpu.memory_space<vmem>>, %arg3: memref<32x8xbf16, #tpu.memory_space<vmem>>, %arg4: memref<1x8xf32, #tpu.memory_space<vmem>>, %arg5: memref<64x8xbf16, #tpu.memory_space<vmem>>) attributes {dimension_semantics = [#tpu.dimension_semantics<parallel>, #tpu.dimension_semantics<parallel>], iteration_bounds = array<i64: 1, 1>, scalar_prefetch = 0 : i64, scratch_operands = 0 : i64, tpu.core_type = #tpu.core_type<tc>, window_params = [{transform_indices = @transform_0, window_bounds = array<i64: 64, 32>}, {transform_indices = @transform_1, window_bounds = array<i64: 32, 8>}, {transform_indices = @transform_2, window_bounds = array<i64: 1, 8>}, {transform_indices = @transform_3, window_bounds = array<i64: 64, 8>}]} {
    %c0 = arith.constant 0 : index
    %c0_0 = arith.constant 0 : index
    %0 = vector.load %arg2[%c0, %c0_0] : memref<64x32xbf16, #tpu.memory_space<vmem>>, vector<64x32xbf16>
    %c0_1 = arith.constant 0 : index
    %c0_2 = arith.constant 0 : index
    %1 = vector.load %arg3[%c0_1, %c0_2] : memref<32x8xbf16, #tpu.memory_space<vmem>>, vector<32x8xbf16>
    %cst = arith.constant dense<0.000000e+00> : vector<64x8xf32>
    %2 = tpu.matmul %0, %1, %cst {dimension_numbers = #tpu.dot_dimension_numbers<[1], [0], [0], [1], [0, 0, 1, 1], [], []>} : vector<64x32xbf16>, vector<32x8xbf16>, vector<64x8xf32> -> vector<64x8xf32>
    %c0_3 = arith.constant 0 : index
    %c0_4 = arith.constant 0 : index
    %3 = vector.load %arg4[%c0_3, %c0_4] : memref<1x8xf32, #tpu.memory_space<vmem>>, vector<1x8xf32>
    %4 = vector.broadcast %3 : vector<1x8xf32> to vector<64x8xf32>
    %5 = arith.addf %2, %4 : vector<64x8xf32>
    %cst_5 = arith.constant 0.000000e+00 : f32
    %6 = vector.broadcast %cst_5 : f32 to vector<64x8xf32>
    %7 = arith.maximumf %5, %6 : vector<64x8xf32>
    %8 = arith.truncf %7 : vector<64x8xf32> to vector<64x8xbf16>
    %c0_6 = arith.constant 0 : index
    %c0_7 = arith.constant 0 : index
    %9 = vector.load %arg5[%c0_6, %c0_7] : memref<64x8xbf16, #tpu.memory_space<vmem>>, vector<64x8xbf16>
    tpu.vector_store %arg5[%c0_6, %c0_7], %8 {strides = array<i32>} : memref<64x8xbf16, #tpu.memory_space<vmem>>, vector<64x8xbf16>,
    return
  }
  func.func @transform_0(%arg0: i32, %arg1: i32) -> (i32, i32) {
    %c0_i32 = arith.constant 0 : i32
    %c0_i32_0 = arith.constant 0 : i32
    return %arg0, %c0_i32 : i32, i32
  }
  func.func @transform_1(%arg0: i32, %arg1: i32) -> (i32, i32) {
    %c0_i32 = arith.constant 0 : i32
    %c0_i32_0 = arith.constant 0 : i32
    return %c0_i32, %arg1 : i32, i32
  }
  func.func @transform_2(%arg0: i32, %arg1: i32) -> (i32, i32) {
    %c0_i32 = arith.constant 0 : i32
    %c0_i32_0 = arith.constant 0 : i32
    return %c0_i32, %arg1 : i32, i32
  }
  func.func @transform_3(%arg0: i32, %arg1: i32) -> (i32, i32) {
    %c0_i32 = arith.constant 0 : i32
    return %arg0, %arg1 : i32, i32
  }
}

module attributes {stable_mosaic.version = 11 : i64} {
  func.func @kernel(%arg0: i32, %arg1: i32, %arg2: memref<64x8xbf16, #tpu.memory_space<vmem>>, %arg3: memref<8x32xbf16, #tpu.memory_space<vmem>>, %arg4: memref<1x32xf32, #tpu.memory_space<vmem>>, %arg5: memref<64x32xbf16, #tpu.memory_space<vmem>>) attributes {dimension_semantics = [#tpu.dimension_semantics<parallel>, #tpu.dimension_semantics<parallel>], iteration_bounds = array<i64: 1, 1>, scalar_prefetch = 0 : i64, scratch_operands = 0 : i64, tpu.core_type = #tpu.core_type<tc>, window_params = [{transform_indices = @transform_0, window_bounds = array<i64: 64, 8>}, {transform_indices = @transform_1, window_bounds = array<i64: 8, 32>}, {transform_indices = @transform_2, window_bounds = array<i64: 1, 32>}, {transform_indices = @transform_3, window_bounds = array<i64: 64, 32>}]} {
    %c0 = arith.constant 0 : index
    %c0_0 = arith.constant 0 : index
    %0 = vector.load %arg2[%c0, %c0_0] : memref<64x8xbf16, #tpu.memory_space<vmem>>, vector<64x8xbf16>
    %c0_1 = arith.constant 0 : index
    %c0_2 = arith.constant 0 : index
    %1 = vector.load %arg3[%c0_1, %c0_2] : memref<8x32xbf16, #tpu.memory_space<vmem>>, vector<8x32xbf16>
    %cst = arith.constant dense<0.000000e+00> : vector<64x32xf32>
    %2 = tpu.matmul %0, %1, %cst {dimension_numbers = #tpu.dot_dimension_numbers<[1], [0], [0], [1], [0, 0, 1, 1], [], []>} : vector<64x8xbf16>, vector<8x32xbf16>, vector<64x32xf32> -> vector<64x32xf32>
    %c0_3 = arith.constant 0 : index
    %c0_4 = arith.constant 0 : index
    %3 = vector.load %arg4[%c0_3, %c0_4] : memref<1x32xf32, #tpu.memory_space<vmem>>, vector<1x32xf32>
    %4 = vector.broadcast %3 : vector<1x32xf32> to vector<64x32xf32>
    %5 = arith.addf %2, %4 : vector<64x32xf32>
    %6 = arith.truncf %5 : vector<64x32xf32> to vector<64x32xbf16>
    %c0_5 = arith.constant 0 : index
    %c0_6 = arith.constant 0 : index
    %7 = vector.load %arg5[%c0_5, %c0_6] : memref<64x32xbf16, #tpu.memory_space<vmem>>, vector<64x32xbf16>
    tpu.vector_store %arg5[%c0_5, %c0_6], %6 {strides = array<i32>} : memref<64x32xbf16, #tpu.memory_space<vmem>>, vector<64x32xbf16>,
    return
  }
  func.func @transform_0(%arg0: i32, %arg1: i32) -> (i32, i32) {
    %c0_i32 = arith.constant 0 : i32
    %c0_i32_0 = arith.constant 0 : i32
    return %arg0, %c0_i32 : i32, i32
  }
  func.func @transform_1(%arg0: i32, %arg1: i32) -> (i32, i32) {
    %c0_i32 = arith.constant 0 : i32
    %c0_i32_0 = arith.constant 0 : i32
    return %c0_i32, %arg1 : i32, i32
  }
  func.func @transform_2(%arg0: i32, %arg1: i32) -> (i32, i32) {
    %c0_i32 = arith.constant 0 : i32
    %c0_i32_0 = arith.constant 0 : i32
    return %c0_i32, %arg1 : i32, i32
  }
  func.func @transform_3(%arg0: i32, %arg1: i32) -> (i32, i32) {
    %c0_i32 = arith.constant 0 : i32
    return %arg0, %arg1 : i32, i32
  }
}

module attributes {stable_mosaic.version = 11 : i64} {
  func.func @kernel(%arg0: i32, %arg1: i32, %arg2: memref<256x64xbf16, #tpu.memory_space<vmem>>, %arg3: memref<64x16xbf16, #tpu.memory_space<vmem>>, %arg4: memref<1x16xf32, #tpu.memory_space<vmem>>, %arg5: memref<256x16xbf16, #tpu.memory_space<vmem>>) attributes {dimension_semantics = [#tpu.dimension_semantics<parallel>, #tpu.dimension_semantics<parallel>], iteration_bounds = array<i64: 1, 1>, scalar_prefetch = 0 : i64, scratch_operands = 0 : i64, tpu.core_type = #tpu.core_type<tc>, window_params = [{transform_indices = @transform_0, window_bounds = array<i64: 256, 64>}, {transform_indices = @transform_1, window_bounds = array<i64: 64, 16>}, {transform_indices = @transform_2, window_bounds = array<i64: 1, 16>}, {transform_indices = @transform_3, window_bounds = array<i64: 256, 16>}]} {
    %c0 = arith.constant 0 : index
    %c0_0 = arith.constant 0 : index
    %0 = vector.load %arg2[%c0, %c0_0] : memref<256x64xbf16, #tpu.memory_space<vmem>>, vector<256x64xbf16>
    %c0_1 = arith.constant 0 : index
    %c0_2 = arith.constant 0 : index
    %1 = vector.load %arg3[%c0_1, %c0_2] : memref<64x16xbf16, #tpu.memory_space<vmem>>, vector<64x16xbf16>
    %cst = arith.constant dense<0.000000e+00> : vector<256x16xf32>
    %2 = tpu.matmul %0, %1, %cst {dimension_numbers = #tpu.dot_dimension_numbers<[1], [0], [0], [1], [0, 0, 1, 1], [], []>} : vector<256x64xbf16>, vector<64x16xbf16>, vector<256x16xf32> -> vector<256x16xf32>
    %c0_3 = arith.constant 0 : index
    %c0_4 = arith.constant 0 : index
    %3 = vector.load %arg4[%c0_3, %c0_4] : memref<1x16xf32, #tpu.memory_space<vmem>>, vector<1x16xf32>
    %4 = vector.broadcast %3 : vector<1x16xf32> to vector<256x16xf32>
    %5 = arith.addf %2, %4 : vector<256x16xf32>
    %cst_5 = arith.constant 0.000000e+00 : f32
    %6 = vector.broadcast %cst_5 : f32 to vector<256x16xf32>
    %7 = arith.maximumf %5, %6 : vector<256x16xf32>
    %8 = arith.truncf %7 : vector<256x16xf32> to vector<256x16xbf16>
    %c0_6 = arith.constant 0 : index
    %c0_7 = arith.constant 0 : index
    %9 = vector.load %arg5[%c0_6, %c0_7] : memref<256x16xbf16, #tpu.memory_space<vmem>>, vector<256x16xbf16>
    tpu.vector_store %arg5[%c0_6, %c0_7], %8 {strides = array<i32>} : memref<256x16xbf16, #tpu.memory_space<vmem>>, vector<256x16xbf16>,
    return
  }
  func.func @transform_0(%arg0: i32, %arg1: i32) -> (i32, i32) {
    %c0_i32 = arith.constant 0 : i32
    %c0_i32_0 = arith.constant 0 : i32
    return %arg0, %c0_i32 : i32, i32
  }
  func.func @transform_1(%arg0: i32, %arg1: i32) -> (i32, i32) {
    %c0_i32 = arith.constant 0 : i32
    %c0_i32_0 = arith.constant 0 : i32
    return %c0_i32, %arg1 : i32, i32
  }
  func.func @transform_2(%arg0: i32, %arg1: i32) -> (i32, i32) {
    %c0_i32 = arith.constant 0 : i32
    %c0_i32_0 = arith.constant 0 : i32
    return %c0_i32, %arg1 : i32, i32
  }
  func.func @transform_3(%arg0: i32, %arg1: i32) -> (i32, i32) {
    %c0_i32 = arith.constant 0 : i32
    return %arg0, %arg1 : i32, i32
  }
}

module attributes {stable_mosaic.version = 11 : i64} {
  func.func @kernel(%arg0: i32, %arg1: i32, %arg2: memref<256x67xbf16, #tpu.memory_space<vmem>>, %arg3: memref<67x64xbf16, #tpu.memory_space<vmem>>, %arg4: memref<1x64xf32, #tpu.memory_space<vmem>>, %arg5: memref<256x64xbf16, #tpu.memory_space<vmem>>) attributes {dimension_semantics = [#tpu.dimension_semantics<parallel>, #tpu.dimension_semantics<parallel>], iteration_bounds = array<i64: 1, 1>, scalar_prefetch = 0 : i64, scratch_operands = 0 : i64, tpu.core_type = #tpu.core_type<tc>, window_params = [{transform_indices = @transform_0, window_bounds = array<i64: 256, 67>}, {transform_indices = @transform_1, window_bounds = array<i64: 67, 64>}, {transform_indices = @transform_2, window_bounds = array<i64: 1, 64>}, {transform_indices = @transform_3, window_bounds = array<i64: 256, 64>}]} {
    %c0 = arith.constant 0 : index
    %c0_0 = arith.constant 0 : index
    %0 = vector.load %arg2[%c0, %c0_0] : memref<256x67xbf16, #tpu.memory_space<vmem>>, vector<256x67xbf16>
    %c0_1 = arith.constant 0 : index
    %c0_2 = arith.constant 0 : index
    %1 = vector.load %arg3[%c0_1, %c0_2] : memref<67x64xbf16, #tpu.memory_space<vmem>>, vector<67x64xbf16>
    %cst = arith.constant dense<0.000000e+00> : vector<256x64xf32>
    %2 = tpu.matmul %0, %1, %cst {dimension_numbers = #tpu.dot_dimension_numbers<[1], [0], [0], [1], [0, 0, 1, 1], [], []>} : vector<256x67xbf16>, vector<67x64xbf16>, vector<256x64xf32> -> vector<256x64xf32>
    %c0_3 = arith.constant 0 : index
    %c0_4 = arith.constant 0 : index
    %3 = vector.load %arg4[%c0_3, %c0_4] : memref<1x64xf32, #tpu.memory_space<vmem>>, vector<1x64xf32>
    %4 = vector.broadcast %3 : vector<1x64xf32> to vector<256x64xf32>
    %5 = arith.addf %2, %4 : vector<256x64xf32>
    %cst_5 = arith.constant 0.000000e+00 : f32
    %6 = vector.broadcast %cst_5 : f32 to vector<256x64xf32>
    %7 = arith.maximumf %5, %6 : vector<256x64xf32>
    %8 = arith.truncf %7 : vector<256x64xf32> to vector<256x64xbf16>
    %c0_6 = arith.constant 0 : index
    %c0_7 = arith.constant 0 : index
    %9 = vector.load %arg5[%c0_6, %c0_7] : memref<256x64xbf16, #tpu.memory_space<vmem>>, vector<256x64xbf16>
    tpu.vector_store %arg5[%c0_6, %c0_7], %8 {strides = array<i32>} : memref<256x64xbf16, #tpu.memory_space<vmem>>, vector<256x64xbf16>,
    return
  }
  func.func @transform_0(%arg0: i32, %arg1: i32) -> (i32, i32) {
    %c0_i32 = arith.constant 0 : i32
    %c0_i32_0 = arith.constant 0 : i32
    return %arg0, %c0_i32 : i32, i32
  }
  func.func @transform_1(%arg0: i32, %arg1: i32) -> (i32, i32) {
    %c0_i32 = arith.constant 0 : i32
    %c0_i32_0 = arith.constant 0 : i32
    return %c0_i32, %arg1 : i32, i32
  }
  func.func @transform_2(%arg0: i32, %arg1: i32) -> (i32, i32) {
    %c0_i32 = arith.constant 0 : i32
    %c0_i32_0 = arith.constant 0 : i32
    return %c0_i32, %arg1 : i32, i32
  }
  func.func @transform_3(%arg0: i32, %arg1: i32) -> (i32, i32) {
    %c0_i32 = arith.constant 0 : i32
    return %arg0, %arg1 : i32, i32
  }
}

module attributes {stable_mosaic.version = 11 : i64} {
  func.func @kernel(%arg0: i32, %arg1: i32, %arg2: memref<256x16xbf16, #tpu.memory_space<vmem>>, %arg3: memref<16x64xbf16, #tpu.memory_space<vmem>>, %arg4: memref<1x64xf32, #tpu.memory_space<vmem>>, %arg5: memref<256x64xbf16, #tpu.memory_space<vmem>>) attributes {dimension_semantics = [#tpu.dimension_semantics<parallel>, #tpu.dimension_semantics<parallel>], iteration_bounds = array<i64: 1, 1>, scalar_prefetch = 0 : i64, scratch_operands = 0 : i64, tpu.core_type = #tpu.core_type<tc>, window_params = [{transform_indices = @transform_0, window_bounds = array<i64: 256, 16>}, {transform_indices = @transform_1, window_bounds = array<i64: 16, 64>}, {transform_indices = @transform_2, window_bounds = array<i64: 1, 64>}, {transform_indices = @transform_3, window_bounds = array<i64: 256, 64>}]} {
    %c0 = arith.constant 0 : index
    %c0_0 = arith.constant 0 : index
    %0 = vector.load %arg2[%c0, %c0_0] : memref<256x16xbf16, #tpu.memory_space<vmem>>, vector<256x16xbf16>
    %c0_1 = arith.constant 0 : index
    %c0_2 = arith.constant 0 : index
    %1 = vector.load %arg3[%c0_1, %c0_2] : memref<16x64xbf16, #tpu.memory_space<vmem>>, vector<16x64xbf16>
    %cst = arith.constant dense<0.000000e+00> : vector<256x64xf32>
    %2 = tpu.matmul %0, %1, %cst {dimension_numbers = #tpu.dot_dimension_numbers<[1], [0], [0], [1], [0, 0, 1, 1], [], []>} : vector<256x16xbf16>, vector<16x64xbf16>, vector<256x64xf32> -> vector<256x64xf32>
    %c0_3 = arith.constant 0 : index
    %c0_4 = arith.constant 0 : index
    %3 = vector.load %arg4[%c0_3, %c0_4] : memref<1x64xf32, #tpu.memory_space<vmem>>, vector<1x64xf32>
    %4 = vector.broadcast %3 : vector<1x64xf32> to vector<256x64xf32>
    %5 = arith.addf %2, %4 : vector<256x64xf32>
    %6 = arith.truncf %5 : vector<256x64xf32> to vector<256x64xbf16>
    %c0_5 = arith.constant 0 : index
    %c0_6 = arith.constant 0 : index
    %7 = vector.load %arg5[%c0_5, %c0_6] : memref<256x64xbf16, #tpu.memory_space<vmem>>, vector<256x64xbf16>
    tpu.vector_store %arg5[%c0_5, %c0_6], %6 {strides = array<i32>} : memref<256x64xbf16, #tpu.memory_space<vmem>>, vector<256x64xbf16>,
    return
  }
  func.func @transform_0(%arg0: i32, %arg1: i32) -> (i32, i32) {
    %c0_i32 = arith.constant 0 : i32
    %c0_i32_0 = arith.constant 0 : i32
    return %arg0, %c0_i32 : i32, i32
  }
  func.func @transform_1(%arg0: i32, %arg1: i32) -> (i32, i32) {
    %c0_i32 = arith.constant 0 : i32
    %c0_i32_0 = arith.constant 0 : i32
    return %c0_i32, %arg1 : i32, i32
  }
  func.func @transform_2(%arg0: i32, %arg1: i32) -> (i32, i32) {
    %c0_i32 = arith.constant 0 : i32
    %c0_i32_0 = arith.constant 0 : i32
    return %c0_i32, %arg1 : i32, i32
  }
  func.func @transform_3(%arg0: i32, %arg1: i32) -> (i32, i32) {
    %c0_i32 = arith.constant 0 : i32
    return %arg0, %arg1 : i32, i32
  }
}

module attributes {stable_mosaic.version = 11 : i64} {
  func.func @kernel(%arg0: i32, %arg1: i32, %arg2: memref<32x67xbf16, #tpu.memory_space<vmem>>, %arg3: memref<67x32xbf16, #tpu.memory_space<vmem>>, %arg4: memref<1x32xf32, #tpu.memory_space<vmem>>, %arg5: memref<32x32xbf16, #tpu.memory_space<vmem>>) attributes {dimension_semantics = [#tpu.dimension_semantics<parallel>, #tpu.dimension_semantics<parallel>], iteration_bounds = array<i64: 1, 1>, scalar_prefetch = 0 : i64, scratch_operands = 0 : i64, tpu.core_type = #tpu.core_type<tc>, window_params = [{transform_indices = @transform_0, window_bounds = array<i64: 32, 67>}, {transform_indices = @transform_1, window_bounds = array<i64: 67, 32>}, {transform_indices = @transform_2, window_bounds = array<i64: 1, 32>}, {transform_indices = @transform_3, window_bounds = array<i64: 32, 32>}]} {
    %c0 = arith.constant 0 : index
    %c0_0 = arith.constant 0 : index
    %0 = vector.load %arg2[%c0, %c0_0] : memref<32x67xbf16, #tpu.memory_space<vmem>>, vector<32x67xbf16>
    %c0_1 = arith.constant 0 : index
    %c0_2 = arith.constant 0 : index
    %1 = vector.load %arg3[%c0_1, %c0_2] : memref<67x32xbf16, #tpu.memory_space<vmem>>, vector<67x32xbf16>
    %cst = arith.constant dense<0.000000e+00> : vector<32x32xf32>
    %2 = tpu.matmul %0, %1, %cst {dimension_numbers = #tpu.dot_dimension_numbers<[1], [0], [0], [1], [0, 0, 1, 1], [], []>} : vector<32x67xbf16>, vector<67x32xbf16>, vector<32x32xf32> -> vector<32x32xf32>
    %c0_3 = arith.constant 0 : index
    %c0_4 = arith.constant 0 : index
    %3 = vector.load %arg4[%c0_3, %c0_4] : memref<1x32xf32, #tpu.memory_space<vmem>>, vector<1x32xf32>
    %4 = vector.broadcast %3 : vector<1x32xf32> to vector<32x32xf32>
    %5 = arith.addf %2, %4 : vector<32x32xf32>
    %6 = arith.truncf %5 : vector<32x32xf32> to vector<32x32xbf16>
    %c0_5 = arith.constant 0 : index
    %c0_6 = arith.constant 0 : index
    %7 = vector.load %arg5[%c0_5, %c0_6] : memref<32x32xbf16, #tpu.memory_space<vmem>>, vector<32x32xbf16>
    tpu.vector_store %arg5[%c0_5, %c0_6], %6 {strides = array<i32>} : memref<32x32xbf16, #tpu.memory_space<vmem>>, vector<32x32xbf16>,
    return
  }
  func.func @transform_0(%arg0: i32, %arg1: i32) -> (i32, i32) {
    %c0_i32 = arith.constant 0 : i32
    %c0_i32_0 = arith.constant 0 : i32
    return %arg0, %c0_i32 : i32, i32
  }
  func.func @transform_1(%arg0: i32, %arg1: i32) -> (i32, i32) {
    %c0_i32 = arith.constant 0 : i32
    %c0_i32_0 = arith.constant 0 : i32
    return %c0_i32, %arg1 : i32, i32
  }
  func.func @transform_2(%arg0: i32, %arg1: i32) -> (i32, i32) {
    %c0_i32 = arith.constant 0 : i32
    %c0_i32_0 = arith.constant 0 : i32
    return %c0_i32, %arg1 : i32, i32
  }
  func.func @transform_3(%arg0: i32, %arg1: i32) -> (i32, i32) {
    %c0_i32 = arith.constant 0 : i32
    return %arg0, %arg1 : i32, i32
  }
}

module attributes {stable_mosaic.version = 11 : i64} {
  func.func @kernel(%arg0: i32, %arg1: i32, %arg2: memref<32x128xbf16, #tpu.memory_space<vmem>>, %arg3: memref<128x64xbf16, #tpu.memory_space<vmem>>, %arg4: memref<1x64xf32, #tpu.memory_space<vmem>>, %arg5: memref<32x64xbf16, #tpu.memory_space<vmem>>) attributes {dimension_semantics = [#tpu.dimension_semantics<parallel>, #tpu.dimension_semantics<parallel>], iteration_bounds = array<i64: 1, 1>, scalar_prefetch = 0 : i64, scratch_operands = 0 : i64, tpu.core_type = #tpu.core_type<tc>, window_params = [{transform_indices = @transform_0, window_bounds = array<i64: 32, 128>}, {transform_indices = @transform_1, window_bounds = array<i64: 128, 64>}, {transform_indices = @transform_2, window_bounds = array<i64: 1, 64>}, {transform_indices = @transform_3, window_bounds = array<i64: 32, 64>}]} {
    %c0 = arith.constant 0 : index
    %c0_0 = arith.constant 0 : index
    %0 = vector.load %arg2[%c0, %c0_0] : memref<32x128xbf16, #tpu.memory_space<vmem>>, vector<32x128xbf16>
    %c0_1 = arith.constant 0 : index
    %c0_2 = arith.constant 0 : index
    %1 = vector.load %arg3[%c0_1, %c0_2] : memref<128x64xbf16, #tpu.memory_space<vmem>>, vector<128x64xbf16>
    %cst = arith.constant dense<0.000000e+00> : vector<32x64xf32>
    %2 = tpu.matmul %0, %1, %cst {dimension_numbers = #tpu.dot_dimension_numbers<[1], [0], [0], [1], [0, 0, 1, 1], [], []>} : vector<32x128xbf16>, vector<128x64xbf16>, vector<32x64xf32> -> vector<32x64xf32>
    %c0_3 = arith.constant 0 : index
    %c0_4 = arith.constant 0 : index
    %3 = vector.load %arg4[%c0_3, %c0_4] : memref<1x64xf32, #tpu.memory_space<vmem>>, vector<1x64xf32>
    %4 = vector.broadcast %3 : vector<1x64xf32> to vector<32x64xf32>
    %5 = arith.addf %2, %4 : vector<32x64xf32>
    %6 = arith.truncf %5 : vector<32x64xf32> to vector<32x64xbf16>
    %c0_5 = arith.constant 0 : index
    %c0_6 = arith.constant 0 : index
    %7 = vector.load %arg5[%c0_5, %c0_6] : memref<32x64xbf16, #tpu.memory_space<vmem>>, vector<32x64xbf16>
    tpu.vector_store %arg5[%c0_5, %c0_6], %6 {strides = array<i32>} : memref<32x64xbf16, #tpu.memory_space<vmem>>, vector<32x64xbf16>,
    return
  }
  func.func @transform_0(%arg0: i32, %arg1: i32) -> (i32, i32) {
    %c0_i32 = arith.constant 0 : i32
    %c0_i32_0 = arith.constant 0 : i32
    return %arg0, %c0_i32 : i32, i32
  }
  func.func @transform_1(%arg0: i32, %arg1: i32) -> (i32, i32) {
    %c0_i32 = arith.constant 0 : i32
    %c0_i32_0 = arith.constant 0 : i32
    return %c0_i32, %arg1 : i32, i32
  }
  func.func @transform_2(%arg0: i32, %arg1: i32) -> (i32, i32) {
    %c0_i32 = arith.constant 0 : i32
    %c0_i32_0 = arith.constant 0 : i32
    return %c0_i32, %arg1 : i32, i32
  }
  func.func @transform_3(%arg0: i32, %arg1: i32) -> (i32, i32) {
    %c0_i32 = arith.constant 0 : i32
    return %arg0, %arg1 : i32, i32
  }
}

module attributes {stable_mosaic.version = 11 : i64} {
  func.func @kernel(%arg0: i32, %arg1: i32, %arg2: memref<32x64xbf16, #tpu.memory_space<vmem>>, %arg3: memref<64x16xbf16, #tpu.memory_space<vmem>>, %arg4: memref<1x16xf32, #tpu.memory_space<vmem>>, %arg5: memref<32x16xbf16, #tpu.memory_space<vmem>>) attributes {dimension_semantics = [#tpu.dimension_semantics<parallel>, #tpu.dimension_semantics<parallel>], iteration_bounds = array<i64: 1, 1>, scalar_prefetch = 0 : i64, scratch_operands = 0 : i64, tpu.core_type = #tpu.core_type<tc>, window_params = [{transform_indices = @transform_0, window_bounds = array<i64: 32, 64>}, {transform_indices = @transform_1, window_bounds = array<i64: 64, 16>}, {transform_indices = @transform_2, window_bounds = array<i64: 1, 16>}, {transform_indices = @transform_3, window_bounds = array<i64: 32, 16>}]} {
    %c0 = arith.constant 0 : index
    %c0_0 = arith.constant 0 : index
    %0 = vector.load %arg2[%c0, %c0_0] : memref<32x64xbf16, #tpu.memory_space<vmem>>, vector<32x64xbf16>
    %c0_1 = arith.constant 0 : index
    %c0_2 = arith.constant 0 : index
    %1 = vector.load %arg3[%c0_1, %c0_2] : memref<64x16xbf16, #tpu.memory_space<vmem>>, vector<64x16xbf16>
    %cst = arith.constant dense<0.000000e+00> : vector<32x16xf32>
    %2 = tpu.matmul %0, %1, %cst {dimension_numbers = #tpu.dot_dimension_numbers<[1], [0], [0], [1], [0, 0, 1, 1], [], []>} : vector<32x64xbf16>, vector<64x16xbf16>, vector<32x16xf32> -> vector<32x16xf32>
    %c0_3 = arith.constant 0 : index
    %c0_4 = arith.constant 0 : index
    %3 = vector.load %arg4[%c0_3, %c0_4] : memref<1x16xf32, #tpu.memory_space<vmem>>, vector<1x16xf32>
    %4 = vector.broadcast %3 : vector<1x16xf32> to vector<32x16xf32>
    %5 = arith.addf %2, %4 : vector<32x16xf32>
    %cst_5 = arith.constant 0.000000e+00 : f32
    %6 = vector.broadcast %cst_5 : f32 to vector<32x16xf32>
    %7 = arith.maximumf %5, %6 : vector<32x16xf32>
    %8 = arith.truncf %7 : vector<32x16xf32> to vector<32x16xbf16>
    %c0_6 = arith.constant 0 : index
    %c0_7 = arith.constant 0 : index
    %9 = vector.load %arg5[%c0_6, %c0_7] : memref<32x16xbf16, #tpu.memory_space<vmem>>, vector<32x16xbf16>
    tpu.vector_store %arg5[%c0_6, %c0_7], %8 {strides = array<i32>} : memref<32x16xbf16, #tpu.memory_space<vmem>>, vector<32x16xbf16>,
    return
  }
  func.func @transform_0(%arg0: i32, %arg1: i32) -> (i32, i32) {
    %c0_i32 = arith.constant 0 : i32
    %c0_i32_0 = arith.constant 0 : i32
    return %arg0, %c0_i32 : i32, i32
  }
  func.func @transform_1(%arg0: i32, %arg1: i32) -> (i32, i32) {
    %c0_i32 = arith.constant 0 : i32
    %c0_i32_0 = arith.constant 0 : i32
    return %c0_i32, %arg1 : i32, i32
  }
  func.func @transform_2(%arg0: i32, %arg1: i32) -> (i32, i32) {
    %c0_i32 = arith.constant 0 : i32
    %c0_i32_0 = arith.constant 0 : i32
    return %c0_i32, %arg1 : i32, i32
  }
  func.func @transform_3(%arg0: i32, %arg1: i32) -> (i32, i32) {
    %c0_i32 = arith.constant 0 : i32
    return %arg0, %arg1 : i32, i32
  }
}

module attributes {stable_mosaic.version = 11 : i64} {
  func.func @kernel(%arg0: i32, %arg1: i32, %arg2: memref<32x16xbf16, #tpu.memory_space<vmem>>, %arg3: memref<16x64xbf16, #tpu.memory_space<vmem>>, %arg4: memref<1x64xf32, #tpu.memory_space<vmem>>, %arg5: memref<32x64xbf16, #tpu.memory_space<vmem>>) attributes {dimension_semantics = [#tpu.dimension_semantics<parallel>, #tpu.dimension_semantics<parallel>], iteration_bounds = array<i64: 1, 1>, scalar_prefetch = 0 : i64, scratch_operands = 0 : i64, tpu.core_type = #tpu.core_type<tc>, window_params = [{transform_indices = @transform_0, window_bounds = array<i64: 32, 16>}, {transform_indices = @transform_1, window_bounds = array<i64: 16, 64>}, {transform_indices = @transform_2, window_bounds = array<i64: 1, 64>}, {transform_indices = @transform_3, window_bounds = array<i64: 32, 64>}]} {
    %c0 = arith.constant 0 : index
    %c0_0 = arith.constant 0 : index
    %0 = vector.load %arg2[%c0, %c0_0] : memref<32x16xbf16, #tpu.memory_space<vmem>>, vector<32x16xbf16>
    %c0_1 = arith.constant 0 : index
    %c0_2 = arith.constant 0 : index
    %1 = vector.load %arg3[%c0_1, %c0_2] : memref<16x64xbf16, #tpu.memory_space<vmem>>, vector<16x64xbf16>
    %cst = arith.constant dense<0.000000e+00> : vector<32x64xf32>
    %2 = tpu.matmul %0, %1, %cst {dimension_numbers = #tpu.dot_dimension_numbers<[1], [0], [0], [1], [0, 0, 1, 1], [], []>} : vector<32x16xbf16>, vector<16x64xbf16>, vector<32x64xf32> -> vector<32x64xf32>
    %c0_3 = arith.constant 0 : index
    %c0_4 = arith.constant 0 : index
    %3 = vector.load %arg4[%c0_3, %c0_4] : memref<1x64xf32, #tpu.memory_space<vmem>>, vector<1x64xf32>
    %4 = vector.broadcast %3 : vector<1x64xf32> to vector<32x64xf32>
    %5 = arith.addf %2, %4 : vector<32x64xf32>
    %6 = arith.truncf %5 : vector<32x64xf32> to vector<32x64xbf16>
    %c0_5 = arith.constant 0 : index
    %c0_6 = arith.constant 0 : index
    %7 = vector.load %arg5[%c0_5, %c0_6] : memref<32x64xbf16, #tpu.memory_space<vmem>>, vector<32x64xbf16>
    tpu.vector_store %arg5[%c0_5, %c0_6], %6 {strides = array<i32>} : memref<32x64xbf16, #tpu.memory_space<vmem>>, vector<32x64xbf16>,
    return
  }
  func.func @transform_0(%arg0: i32, %arg1: i32) -> (i32, i32) {
    %c0_i32 = arith.constant 0 : i32
    %c0_i32_0 = arith.constant 0 : i32
    return %arg0, %c0_i32 : i32, i32
  }
  func.func @transform_1(%arg0: i32, %arg1: i32) -> (i32, i32) {
    %c0_i32 = arith.constant 0 : i32
    %c0_i32_0 = arith.constant 0 : i32
    return %c0_i32, %arg1 : i32, i32
  }
  func.func @transform_2(%arg0: i32, %arg1: i32) -> (i32, i32) {
    %c0_i32 = arith.constant 0 : i32
    %c0_i32_0 = arith.constant 0 : i32
    return %c0_i32, %arg1 : i32, i32
  }
  func.func @transform_3(%arg0: i32, %arg1: i32) -> (i32, i32) {
    %c0_i32 = arith.constant 0 : i32
    return %arg0, %arg1 : i32, i32
  }
}

module attributes {stable_mosaic.version = 11 : i64} {
  func.func @kernel(%arg0: i32, %arg1: i32, %arg2: memref<2x512xbf16, #tpu.memory_space<vmem>>, %arg3: memref<512x256xbf16, #tpu.memory_space<vmem>>, %arg4: memref<1x256xf32, #tpu.memory_space<vmem>>, %arg5: memref<2x256xbf16, #tpu.memory_space<vmem>>) attributes {dimension_semantics = [#tpu.dimension_semantics<parallel>, #tpu.dimension_semantics<parallel>], iteration_bounds = array<i64: 1, 1>, scalar_prefetch = 0 : i64, scratch_operands = 0 : i64, tpu.core_type = #tpu.core_type<tc>, window_params = [{transform_indices = @transform_0, window_bounds = array<i64: 2, 512>}, {transform_indices = @transform_1, window_bounds = array<i64: 512, 256>}, {transform_indices = @transform_2, window_bounds = array<i64: 1, 256>}, {transform_indices = @transform_3, window_bounds = array<i64: 2, 256>}]} {
    %c0 = arith.constant 0 : index
    %c0_0 = arith.constant 0 : index
    %0 = vector.load %arg2[%c0, %c0_0] : memref<2x512xbf16, #tpu.memory_space<vmem>>, vector<2x512xbf16>
    %c0_1 = arith.constant 0 : index
    %c0_2 = arith.constant 0 : index
    %1 = vector.load %arg3[%c0_1, %c0_2] : memref<512x256xbf16, #tpu.memory_space<vmem>>, vector<512x256xbf16>
    %cst = arith.constant dense<0.000000e+00> : vector<2x256xf32>
    %2 = tpu.matmul %0, %1, %cst {dimension_numbers = #tpu.dot_dimension_numbers<[1], [0], [0], [1], [0, 0, 1, 1], [], []>} : vector<2x512xbf16>, vector<512x256xbf16>, vector<2x256xf32> -> vector<2x256xf32>
    %c0_3 = arith.constant 0 : index
    %c0_4 = arith.constant 0 : index
    %3 = vector.load %arg4[%c0_3, %c0_4] : memref<1x256xf32, #tpu.memory_space<vmem>>, vector<1x256xf32>
    %4 = vector.broadcast %3 : vector<1x256xf32> to vector<2x256xf32>
    %5 = arith.addf %2, %4 : vector<2x256xf32>
    %cst_5 = arith.constant 0.000000e+00 : f32
    %6 = vector.broadcast %cst_5 : f32 to vector<2x256xf32>
    %7 = arith.maximumf %5, %6 : vector<2x256xf32>
    %8 = arith.truncf %7 : vector<2x256xf32> to vector<2x256xbf16>
    %c0_6 = arith.constant 0 : index
    %c0_7 = arith.constant 0 : index
    %9 = vector.load %arg5[%c0_6, %c0_7] : memref<2x256xbf16, #tpu.memory_space<vmem>>, vector<2x256xbf16>
    tpu.vector_store %arg5[%c0_6, %c0_7], %8 {strides = array<i32>} : memref<2x256xbf16, #tpu.memory_space<vmem>>, vector<2x256xbf16>,
    return
  }
  func.func @transform_0(%arg0: i32, %arg1: i32) -> (i32, i32) {
    %c0_i32 = arith.constant 0 : i32
    %c0_i32_0 = arith.constant 0 : i32
    return %arg0, %c0_i32 : i32, i32
  }
  func.func @transform_1(%arg0: i32, %arg1: i32) -> (i32, i32) {
    %c0_i32 = arith.constant 0 : i32
    %c0_i32_0 = arith.constant 0 : i32
    return %c0_i32, %arg1 : i32, i32
  }
  func.func @transform_2(%arg0: i32, %arg1: i32) -> (i32, i32) {
    %c0_i32 = arith.constant 0 : i32
    %c0_i32_0 = arith.constant 0 : i32
    return %c0_i32, %arg1 : i32, i32
  }
  func.func @transform_3(%arg0: i32, %arg1: i32) -> (i32, i32) {
    %c0_i32 = arith.constant 0 : i32
    return %arg0, %arg1 : i32, i32
  }
}

module attributes {stable_mosaic.version = 11 : i64} {
  func.func @kernel(%arg0: i32, %arg1: i32, %arg2: memref<2x64xbf16, #tpu.memory_space<vmem>>, %arg3: memref<64x256xbf16, #tpu.memory_space<vmem>>, %arg4: memref<1x256xf32, #tpu.memory_space<vmem>>, %arg5: memref<2x256xbf16, #tpu.memory_space<vmem>>) attributes {dimension_semantics = [#tpu.dimension_semantics<parallel>, #tpu.dimension_semantics<parallel>], iteration_bounds = array<i64: 1, 2>, scalar_prefetch = 0 : i64, scratch_operands = 0 : i64, tpu.core_type = #tpu.core_type<tc>, window_params = [{transform_indices = @transform_0, window_bounds = array<i64: 2, 64>}, {transform_indices = @transform_1, window_bounds = array<i64: 64, 256>}, {transform_indices = @transform_2, window_bounds = array<i64: 1, 256>}, {transform_indices = @transform_3, window_bounds = array<i64: 2, 256>}]} {
    %c0 = arith.constant 0 : index
    %c0_0 = arith.constant 0 : index
    %0 = vector.load %arg2[%c0, %c0_0] : memref<2x64xbf16, #tpu.memory_space<vmem>>, vector<2x64xbf16>
    %c0_1 = arith.constant 0 : index
    %c0_2 = arith.constant 0 : index
    %1 = vector.load %arg3[%c0_1, %c0_2] : memref<64x256xbf16, #tpu.memory_space<vmem>>, vector<64x256xbf16>
    %cst = arith.constant dense<0.000000e+00> : vector<2x256xf32>
    %2 = tpu.matmul %0, %1, %cst {dimension_numbers = #tpu.dot_dimension_numbers<[1], [0], [0], [1], [0, 0, 1, 1], [], []>} : vector<2x64xbf16>, vector<64x256xbf16>, vector<2x256xf32> -> vector<2x256xf32>
    %c0_3 = arith.constant 0 : index
    %c0_4 = arith.constant 0 : index
    %3 = vector.load %arg4[%c0_3, %c0_4] : memref<1x256xf32, #tpu.memory_space<vmem>>, vector<1x256xf32>
    %4 = vector.broadcast %3 : vector<1x256xf32> to vector<2x256xf32>
    %5 = arith.addf %2, %4 : vector<2x256xf32>
    %cst_5 = arith.constant 0.000000e+00 : f32
    %6 = vector.broadcast %cst_5 : f32 to vector<2x256xf32>
    %7 = arith.maximumf %5, %6 : vector<2x256xf32>
    %8 = arith.truncf %7 : vector<2x256xf32> to vector<2x256xbf16>
    %c0_6 = arith.constant 0 : index
    %c0_7 = arith.constant 0 : index
    %9 = vector.load %arg5[%c0_6, %c0_7] : memref<2x256xbf16, #tpu.memory_space<vmem>>, vector<2x256xbf16>
    tpu.vector_store %arg5[%c0_6, %c0_7], %8 {strides = array<i32>} : memref<2x256xbf16, #tpu.memory_space<vmem>>, vector<2x256xbf16>,
    return
  }
  func.func @transform_0(%arg0: i32, %arg1: i32) -> (i32, i32) {
    %c0_i32 = arith.constant 0 : i32
    %c0_i32_0 = arith.constant 0 : i32
    return %arg0, %c0_i32 : i32, i32
  }
  func.func @transform_1(%arg0: i32, %arg1: i32) -> (i32, i32) {
    %c0_i32 = arith.constant 0 : i32
    %c0_i32_0 = arith.constant 0 : i32
    return %c0_i32, %arg1 : i32, i32
  }
  func.func @transform_2(%arg0: i32, %arg1: i32) -> (i32, i32) {
    %c0_i32 = arith.constant 0 : i32
    %c0_i32_0 = arith.constant 0 : i32
    return %c0_i32, %arg1 : i32, i32
  }
  func.func @transform_3(%arg0: i32, %arg1: i32) -> (i32, i32) {
    %c0_i32 = arith.constant 0 : i32
    return %arg0, %arg1 : i32, i32
  }
}

module attributes {stable_mosaic.version = 11 : i64} {
  func.func @kernel(%arg0: i32, %arg1: i32, %arg2: memref<2x256xbf16, #tpu.memory_space<vmem>>, %arg3: memref<256x10xbf16, #tpu.memory_space<vmem>>, %arg4: memref<1x10xf32, #tpu.memory_space<vmem>>, %arg5: memref<2x10xf32, #tpu.memory_space<vmem>>) attributes {dimension_semantics = [#tpu.dimension_semantics<parallel>, #tpu.dimension_semantics<parallel>], iteration_bounds = array<i64: 1, 1>, scalar_prefetch = 0 : i64, scratch_operands = 0 : i64, tpu.core_type = #tpu.core_type<tc>, window_params = [{transform_indices = @transform_0, window_bounds = array<i64: 2, 256>}, {transform_indices = @transform_1, window_bounds = array<i64: 256, 10>}, {transform_indices = @transform_2, window_bounds = array<i64: 1, 10>}, {transform_indices = @transform_3, window_bounds = array<i64: 2, 10>}]} {
    %c0 = arith.constant 0 : index
    %c0_0 = arith.constant 0 : index
    %0 = vector.load %arg2[%c0, %c0_0] : memref<2x256xbf16, #tpu.memory_space<vmem>>, vector<2x256xbf16>
    %c0_1 = arith.constant 0 : index
    %c0_2 = arith.constant 0 : index
    %1 = vector.load %arg3[%c0_1, %c0_2] : memref<256x10xbf16, #tpu.memory_space<vmem>>, vector<256x10xbf16>
    %cst = arith.constant dense<0.000000e+00> : vector<2x10xf32>
    %2 = tpu.matmul %0, %1, %cst {dimension_numbers = #tpu.dot_dimension_numbers<[1], [0], [0], [1], [0, 0, 1, 1], [], []>} : vector<2x256xbf16>, vector<256x10xbf16>, vector<2x10xf32> -> vector<2x10xf32>
    %c0_3 = arith.constant 0 : index
    %c0_4 = arith.constant 0 : index
    %3 = vector.load %arg4[%c0_3, %c0_4] : memref<1x10xf32, #tpu.memory_space<vmem>>, vector<1x10xf32>
    %4 = vector.broadcast %3 : vector<1x10xf32> to vector<2x10xf32>
    %5 = arith.addf %2, %4 : vector<2x10xf32>
    %c0_5 = arith.constant 0 : index
    %c0_6 = arith.constant 0 : index
    %6 = vector.load %arg5[%c0_5, %c0_6] : memref<2x10xf32, #tpu.memory_space<vmem>>, vector<2x10xf32>
    tpu.vector_store %arg5[%c0_5, %c0_6], %5 {strides = array<i32>} : memref<2x10xf32, #tpu.memory_space<vmem>>, vector<2x10xf32>,
    return
  }
  func.func @transform_0(%arg0: i32, %arg1: i32) -> (i32, i32) {
    %c0_i32 = arith.constant 0 : i32
    %c0_i32_0 = arith.constant 0 : i32
    return %arg0, %c0_i32 : i32, i32
  }
  func.func @transform_1(%arg0: i32, %arg1: i32) -> (i32, i32) {
    %c0_i32 = arith.constant 0 : i32
    %c0_i32_0 = arith.constant 0 : i32
    return %c0_i32, %arg1 : i32, i32
  }
  func.func @transform_2(%arg0: i32, %arg1: i32) -> (i32, i32) {
    %c0_i32 = arith.constant 0 : i32
    %c0_i32_0 = arith.constant 0 : i32
    return %c0_i32, %arg1 : i32, i32
  }
  func.func @transform_3(%arg0: i32, %arg1: i32) -> (i32, i32) {
    %c0_i32 = arith.constant 0 : i32
    return %arg0, %arg1 : i32, i32
  }
}

</mosaic_0001>

<bundles_post_ra>
// kernel: custom-call.32
= control target key start
LH: loop header
LB: loop body
LE: loop exit
PB: predicated region body
PF: predicated region fallthrough
CT: control target
= control target key end

     0   :  { %s6_s0 = inlined_call_operand.vmem [shape: f32[2,64], index: 0, kind: output, shape index: {}]  }

// kernel: _lambda_.18
= control target key start
LH: loop header
LB: loop body
LE: loop exit
PB: predicated region body
PF: predicated region fallthrough
CT: control target
= control target key end

     0   :  { %vm101_vm0 = vcmask 1040384   ;;  %vm102_vm1 = vcmask 1041408   ;;  %v263_v1 = vmov 65535   ;;  %vm76_vm2 = vcmask 23552   ;;  %s404_s1 = inlined_call_operand.vmem [shape: bf16[3,16], index: 1, kind: input, shape index: {}]   ;;  %s405_s0 = inlined_call_operand.vmem [shape: bf16[128,3], index: 0, kind: input, shape index: {}]   ;;  %s406_s2 = inlined_call_operand.vmem [shape: f32[1,16], index: 2, kind: input, shape index: {}]   ;;  %s407_s3 = inlined_call_operand.vmem [shape: bf16[128,16], index: 3, kind: output, shape index: {}]  }
   0x1   :  { %v31_v0 = vld [vmem:[%s404_s1] sm:$0x3]  ;;  %v103_v2 = vsel %vm101_vm0, 4294967295, %v263_v1  ;;  %v252_v6 = vld [vmem:[%s405_s0 + $0x10] sm:$0xff]  ;;  %v251_v9 = vld [vmem:[%s405_s0 + $0x8] sm:$0xff]  ;;  %vm189_vm3 = vcmask 125952  }
   0x2   :  { %v104_v3 = vsel %vm102_vm1, %v103_v2, 0  ;;  %v250_v5 = vld [vmem:[%s405_s0] sm:$0xff]  ;;  %v256_v8 = vld [vmem:[%s405_s0 + $0x30] sm:$0xff]  ;;  %v253_v10 = vld [vmem:[%s405_s0 + $0x18] sm:$0xff] }
   0x3   :  { %v106_v4 = vand.u32 %v104_v3, %v31_v0  ;;  %v254_v7 = vld [vmem:[%s405_s0 + $0x20] sm:$0xff]  ;;  %v255_v11 = vld [vmem:[%s405_s0 + $0x28] sm:$0xff]  ;;  %v257_v12 = vld [vmem:[%s405_s0 + $0x38] sm:$0xff] }
   0x4   :  { %v322_v13 = vld [vmem:[%s406_s2] ss:$0 sm:$0xff] }
   0x5   :  { %115 = vmatpush.bf16.msra.mxu0 %v106_v4  ;;  %258 = vmatpush.bf16.msra.mxu1 %v106_v4 }
   0x6   :  { %259 = vmatpush.bf16.msra.mxu2 %v106_v4  ;;  %260 = vmatpush.bf16.msra.mxu3 %v106_v4 }
   0x8   :  { %242 = vmatmul.msk.bf16.vlgmr.msra.gmra.mxu0 %vm76_vm2, %v250_v5  ;;  %244 = vmatmul.msk.bf16.vlgmr.msra.gmra.mxu1 %vm76_vm2, %v252_v6 }
   0x9   :  { %246 = vmatmul.msk.bf16.vlgmr.msra.gmra.mxu2 %vm76_vm2, %v254_v7  ;;  %248 = vmatmul.msk.bf16.vlgmr.msra.gmra.mxu3 %vm76_vm2, %v256_v8 }
  0x18   :  { %243 = vmatmul.msk.bf16.gmra.mxu0 %vm76_vm2, %v251_v9  ;;  %245 = vmatmul.msk.bf16.gmra.mxu1 %vm76_vm2, %v253_v10 }
  0x19   :  { %247 = vmatmul.msk.bf16.gmra.mxu2 %vm76_vm2, %v255_v11  ;;  %249 = vmatmul.msk.bf16.gmra.mxu3 %vm76_vm2, %v257_v12 }
  0x85   :  { %v117_v14 = vpop.f32.mrf.mxu0  ;;  %v127_v15 = vpop.f32.mrf.mxu1 }
  0x86   :  { %v118_v16 = vadd.f32 %v322_v13, %v117_v14  ;;  %v128_v17 = vadd.f32 %v322_v13, %v127_v15 }
  0x88   :  { %v157_v18 = vmax.f32 %v118_v16, 0.0  ;;  %v161_v19 = vmax.f32 %v128_v17, 0.0 }
  0x8a   :  { %v173_v20 = vpack.c.bf16 %v157_v18, %v157_v18  ;;  %v177_v21 = vpack.c.bf16 %v161_v19, %v161_v19 }
  0x8c   :  { %190 = vst.msk [vmem:[%s407_s3] sm:$0xf] %vm189_vm3, %v173_v20  ;;  %v137_v22 = vpop.f32.mrf.mxu2  ;;  %v147_v23 = vpop.f32.mrf.mxu3 }
  0x8d   :  { %194 = vst.msk [vmem:[%s407_s3 + $0x10] sm:$0xf] %vm189_vm3, %v177_v21  ;;  %v138_v24 = vadd.f32 %v322_v13, %v137_v22  ;;  %v148_v25 = vadd.f32 %v322_v13, %v147_v23  ;;  %v119_v26 = vpop.f32.mrf.mxu0  ;;  %v129_v27 = vpop.f32.mrf.mxu1 }
  0x8e   :  { %v120_v28 = vadd.f32 %v322_v13, %v119_v26  ;;  %v130_v29 = vadd.f32 %v322_v13, %v129_v27 }
  0x8f   :  { %v165_v30 = vmax.f32 %v138_v24, 0.0  ;;  %v169_v31 = vmax.f32 %v148_v25, 0.0 }
  0x90   :  { %v158_v32 = vmax.f32 %v120_v28, 0.0  ;;  %v162_v33 = vmax.f32 %v130_v29, 0.0 }
  0x91   :  { %v181_v34 = vpack.c.bf16 %v165_v30, %v165_v30  ;;  %v185_v35 = vpack.c.bf16 %v169_v31, %v169_v31 }
  0x92   :  { %v174_v36 = vpack.c.bf16 %v158_v32, %v158_v32  ;;  %v178_v37 = vpack.c.bf16 %v162_v33, %v162_v33 }
  0x93   :  { %198 = vst.msk [vmem:[%s407_s3 + $0x20] sm:$0xf] %vm189_vm3, %v181_v34 }
  0x94   :  { %202 = vst.msk [vmem:[%s407_s3 + $0x30] sm:$0xf] %vm189_vm3, %v185_v35  ;;  %v139_v38 = vpop.f32.mrf.mxu2  ;;  %v149_v39 = vpop.f32.mrf.mxu3 }
  0x95   :  { %191 = vst.msk [vmem:[%s407_s3 + $0x4] sm:$0xf] %vm189_vm3, %v174_v36  ;;  %v140_v40 = vadd.f32 %v322_v13, %v139_v38  ;;  %v150_v41 = vadd.f32 %v322_v13, %v149_v39  ;;  %v122_v42 = vpop.f32.mrf.mxu0  ;;  %v132_v43 = vpop.f32.mrf.mxu1 }
  0x96   :  { %195 = vst.msk [vmem:[%s407_s3 + $0x14] sm:$0xf] %vm189_vm3, %v178_v37  ;;  %v123_v44 = vadd.f32 %v322_v13, %v122_v42  ;;  %v133_v45 = vadd.f32 %v322_v13, %v132_v43 }
  0x97   :  { %v166_v46 = vmax.f32 %v140_v40, 0.0  ;;  %v170_v47 = vmax.f32 %v150_v41, 0.0 }
  0x98   :  { %v159_v48 = vmax.f32 %v123_v44, 0.0  ;;  %v163_v49 = vmax.f32 %v133_v45, 0.0 }
  0x99   :  { %v182_v50 = vpack.c.bf16 %v166_v46, %v166_v46  ;;  %v186_v51 = vpack.c.bf16 %v170_v47, %v170_v47 }
  0x9a   :  { %v175_v52 = vpack.c.bf16 %v159_v48, %v159_v48  ;;  %v179_v53 = vpack.c.bf16 %v163_v49, %v163_v49 }
  0x9b   :  { %199 = vst.msk [vmem:[%s407_s3 + $0x24] sm:$0xf] %vm189_vm3, %v182_v50 }
  0x9c   :  { %203 = vst.msk [vmem:[%s407_s3 + $0x34] sm:$0xf] %vm189_vm3, %v186_v51  ;;  %v142_v54 = vpop.f32.mrf.mxu2  ;;  %v152_v55 = vpop.f32.mrf.mxu3 }
  0x9d   :  { %192 = vst.msk [vmem:[%s407_s3 + $0x8] sm:$0xf] %vm189_vm3, %v175_v52  ;;  %v143_v56 = vadd.f32 %v322_v13, %v142_v54  ;;  %v153_v57 = vadd.f32 %v322_v13, %v152_v55  ;;  %v124_v58 = vpop.f32.mrf.mxu0  ;;  %v134_v59 = vpop.f32.mrf.mxu1 }
  0x9e   :  { %196 = vst.msk [vmem:[%s407_s3 + $0x18] sm:$0xf] %vm189_vm3, %v179_v53  ;;  %v125_v60 = vadd.f32 %v322_v13, %v124_v58  ;;  %v135_v61 = vadd.f32 %v322_v13, %v134_v59 }
  0x9f   :  { %v167_v62 = vmax.f32 %v143_v56, 0.0  ;;  %v171_v63 = vmax.f32 %v153_v57, 0.0 }
  0xa0   :  { %v160_v0 = vmax.f32 %v125_v60, 0.0  ;;  %v164_v1 = vmax.f32 %v135_v61, 0.0 }
  0xa1   :  { %v183_v2 = vpack.c.bf16 %v167_v62, %v167_v62  ;;  %v187_v3 = vpack.c.bf16 %v171_v63, %v171_v63 }
  0xa2   :  { %v176_v4 = vpack.c.bf16 %v160_v0, %v160_v0  ;;  %v180_v5 = vpack.c.bf16 %v164_v1, %v164_v1 }
  0xa3   :  { %200 = vst.msk [vmem:[%s407_s3 + $0x28] sm:$0xf] %vm189_vm3, %v183_v2 }
  0xa4   :  { %204 = vst.msk [vmem:[%s407_s3 + $0x38] sm:$0xf] %vm189_vm3, %v187_v3  ;;  %v144_v6 = vpop.f32.mrf.mxu2  ;;  %v154_v7 = vpop.f32.mrf.mxu3 }
  0xa5   :  { %193 = vst.msk [vmem:[%s407_s3 + $0xc] sm:$0xf] %vm189_vm3, %v176_v4  ;;  %v145_v8 = vadd.f32 %v322_v13, %v144_v6  ;;  %v155_v9 = vadd.f32 %v322_v13, %v154_v7 }
  0xa6   :  { %197 = vst.msk [vmem:[%s407_s3 + $0x1c] sm:$0xf] %vm189_vm3, %v180_v5 }
  0xa7   :  { %v168_v10 = vmax.f32 %v145_v8, 0.0  ;;  %v172_v11 = vmax.f32 %v155_v9, 0.0 }
  0xa9   :  { %v184_v12 = vpack.c.bf16 %v168_v10, %v168_v10  ;;  %v188_v14 = vpack.c.bf16 %v172_v11, %v172_v11 }
  0xab   :  { %201 = vst.msk [vmem:[%s407_s3 + $0x2c] sm:$0xf] %vm189_vm3, %v184_v12 }
  0xac   :  { %205 = vst.msk [vmem:[%s407_s3 + $0x3c] sm:$0xf] %vm189_vm3, %v188_v14 }

// kernel: _lambda_.19
= control target key start
LH: loop header
LB: loop body
LE: loop exit
PB: predicated region body
PF: predicated region fallthrough
CT: control target
= control target key end

     0   :  { %s905_s12 = smov 0   ;;  %s907_s13 = smov 0   ;;  %s1091_s0 = inlined_call_operand.vmem [shape: bf16[512,35], index: 0, kind: input, shape index: {}]   ;;  %s1092_s1 = inlined_call_operand.vmem [shape: bf16[35,32], index: 1, kind: input, shape index: {}]   ;;  %s1093_s2 = inlined_call_operand.vmem [shape: f32[1,32], index: 2, kind: input, shape index: {}]   ;;  %s1094_s3 = inlined_call_operand.vmem [shape: bf16[512,32], index: 3, kind: output, shape index: {}]  }
   0x1   :  { %s909_s14 = smov 0  }
   0x2 LB: > { %s25_s15 = sadd.s32 1, %s878_s13  ;;  %p712_p0 = scmp.ge.s32.totalorder %s882_s14, 1  ;;  %s882_s14 = sphi %s909_s14, %s13_s14   ;;  %s878_s13 = sphi %s907_s13, %s1096_s13   ;;  %s874_s12 = sphi %s905_s12, %s1095_s12  }
   0x3   : > { %p27_p1 = scmp.ge.s32.totalorder %s25_s15, 2  ;;  %p169_p2 = scmp.lt.s32.totalorder %s882_s14, 3 }
   0x5   : > { %s1098_s15 = smov (%p27_p1, %s25_s15), 0  ;;  %p170_p3 = pnand %p712_p0, %p169_p2 }
   0x6   : > { %s713_s18 = sshll.u32 (!%p170_p3), %s874_s12, 5 }
   0x7   : > { %173 = sbr.rel (%p170_p3) target bundleno = 227 (0xe3), region = 32  ;;  %p204_p4 = scmp.lt.s32.totalorder (!%p170_p3), %s713_s18, 63 }
   0xc   : > { %v262_v0 = vld [vmem:[%s1092_s1 + $0x10] sm:$0x3]  ;;  %vm411_vm0 = vcmask 1040384   ;;  %vm412_vm1 = vcmask 1041408   ;;  %v884_v2 = vmov 65535   ;;  %s1100_s18 = smov (!%p204_p4, %s713_s18), 63 }
   0xd   : > { %v356_v1 = vunpack.c.l.b16 %v262_v0  ;;  %v413_v3 = vsel %vm411_vm0, 4294967295, %v884_v2  ;;  %v824_v7 = vld [vmem:[%s1092_s1 + $0x8] sm:$0xff]  ;;  %s714_s21 = sshll.u32 %s1100_s18, 2  ;;  %v823_v8 = vld [vmem:[%s1092_s1] sm:$0xff]  ;;  %vm362_vm2 = vcmask 285696   ;;  %vm571_vm3 = vcmask 257024  }
   0xe   : > { %v414_v4 = vsel %vm412_vm1, %v413_v3, 0  ;;  %s940_s26 = scalar_lea.vmem %s1091_s0, %s714_s21  ;;  %v977_v25 = vld [vmem:[%s1093_s2] ss:$0 sm:$0xff]  ;;  %s986_s4 = scalar_lea.vmem %s1094_s3, %s714_s21 }
   0xf   : > { %v359_v5 = vpack.c.b16 %v356_v1, %v356_v1  ;;  %v807_v9 = vld [vmem:[%s940_s26] sm:$0xff]  ;;  %v808_v13 = vld [vmem:[%s940_s26 + $0x8] sm:$0xff]  ;;  %v809_v17 = vld [vmem:[%s940_s26 + $0x10] sm:$0xff] }
  0x10   : > { %v811_v10 = vld [vmem:[%s940_s26 + $0x20] sm:$0xff]  ;;  %v812_v14 = vld [vmem:[%s940_s26 + $0x28] sm:$0xff]  ;;  %v813_v18 = vld [vmem:[%s940_s26 + $0x30] sm:$0xff] }
  0x11   : > { %v416_v6 = vand.u32 %v414_v4, %v359_v5  ;;  %v815_v11 = vld [vmem:[%s940_s26 + $0x40] sm:$0xff]  ;;  %v816_v15 = vld [vmem:[%s940_s26 + $0x48] sm:$0xff]  ;;  %v817_v19 = vld [vmem:[%s940_s26 + $0x50] sm:$0xff] }
  0x12   : > { %v819_v12 = vld [vmem:[%s940_s26 + $0x60] sm:$0xff]  ;;  %v820_v16 = vld [vmem:[%s940_s26 + $0x68] sm:$0xff]  ;;  %v821_v20 = vld [vmem:[%s940_s26 + $0x70] sm:$0xff] }
  0x13   : > { %423 = vmatpush.bf16.msra.mxu0 %v416_v6  ;;  %825 = vmatpush.bf16.msra.mxu1 %v416_v6  ;;  %v810_v21 = vld [vmem:[%s940_s26 + $0x18] sm:$0xff] }
  0x14   : > { %826 = vmatpush.bf16.msra.mxu2 %v416_v6  ;;  %827 = vmatpush.bf16.msra.mxu3 %v416_v6  ;;  %v814_v22 = vld [vmem:[%s940_s26 + $0x38] sm:$0xff] }
  0x15   : > { %v818_v23 = vld [vmem:[%s940_s26 + $0x58] sm:$0xff] }
  0x16   : > { %v822_v24 = vld [vmem:[%s940_s26 + $0x78] sm:$0xff] }
  0x17   : > { %424 = vmatpush.bf16.msra.mxu0 %v824_v7  ;;  %828 = vmatpush.bf16.msra.mxu1 %v824_v7 }
  0x18   : > { %829 = vmatpush.bf16.msra.mxu2 %v824_v7  ;;  %830 = vmatpush.bf16.msra.mxu3 %v824_v7 }
  0x1b   : > { %425 = vmatpush.bf16.msra.mxu0 %v823_v8  ;;  %831 = vmatpush.bf16.msra.mxu1 %v823_v8 }
  0x1c   : > { %832 = vmatpush.bf16.msra.mxu2 %v823_v8  ;;  %833 = vmatpush.bf16.msra.mxu3 %v823_v8 }
  0x1e   : > { %789 = vmatmul.msk.bf16.vlgmr.msra.gmra.mxu0 %vm362_vm2, %v807_v9  ;;  %793 = vmatmul.msk.bf16.vlgmr.msra.gmra.mxu1 %vm362_vm2, %v811_v10 }
  0x1f   : > { %797 = vmatmul.msk.bf16.vlgmr.msra.gmra.mxu2 %vm362_vm2, %v815_v11  ;;  %801 = vmatmul.msk.bf16.vlgmr.msra.gmra.mxu3 %vm362_vm2, %v819_v12 }
  0x2e   : > { %790 = vmatmul.msk.bf16.gmra.mxu0 %vm362_vm2, %v808_v13  ;;  %794 = vmatmul.msk.bf16.gmra.mxu1 %vm362_vm2, %v812_v14 }
  0x2f   : > { %798 = vmatmul.msk.bf16.gmra.mxu2 %vm362_vm2, %v816_v15  ;;  %802 = vmatmul.msk.bf16.gmra.mxu3 %vm362_vm2, %v820_v16 }
  0x3e   : > { %791 = vmatmul.msk.bf16.gmra.mxu0 %vm362_vm2, %v809_v17  ;;  %795 = vmatmul.msk.bf16.gmra.mxu1 %vm362_vm2, %v813_v18 }
  0x3f   : > { %799 = vmatmul.msk.bf16.gmra.mxu2 %vm362_vm2, %v817_v19  ;;  %803 = vmatmul.msk.bf16.gmra.mxu3 %vm362_vm2, %v821_v20 }
  0x4e   : > { %792 = vmatmul.msk.bf16.gmra.mxu0 %vm362_vm2, %v810_v21  ;;  %796 = vmatmul.msk.bf16.gmra.mxu1 %vm362_vm2, %v814_v22 }
  0x4f   : > { %800 = vmatmul.msk.bf16.gmra.mxu2 %vm362_vm2, %v818_v23  ;;  %804 = vmatmul.msk.bf16.gmra.mxu3 %vm362_vm2, %v822_v24 }
  0x9b   : > { %v427_v26 = vpop.f32.mrf.mxu0  ;;  %v447_v27 = vpop.f32.mrf.mxu1 }
  0x9c   : > { %v428_v28 = vadd.f32 %v977_v25, %v427_v26  ;;  %v448_v29 = vadd.f32 %v977_v25, %v447_v27 }
  0x9e   : > { %v507_v30 = vmax.f32 %v428_v28, 0.0  ;;  %v515_v31 = vmax.f32 %v448_v29, 0.0 }
  0xa0   : > { %v539_v32 = vpack.c.bf16 %v507_v30, %v507_v30  ;;  %v547_v33 = vpack.c.bf16 %v515_v31, %v515_v31 }
  0xa2   : > { %572 = vst.msk [vmem:[%s986_s4] sm:$0xf] %vm571_vm3, %v539_v32  ;;  %v467_v34 = vpop.f32.mrf.mxu2  ;;  %v487_v35 = vpop.f32.mrf.mxu3 }
  0xa3   : > { %580 = vst.msk [vmem:[%s986_s4 + $0x20] sm:$0xf] %vm571_vm3, %v547_v33  ;;  %v468_v36 = vadd.f32 %v977_v25, %v467_v34  ;;  %v488_v37 = vadd.f32 %v977_v25, %v487_v35  ;;  %v429_v38 = vpop.f32.mrf.mxu0  ;;  %v449_v39 = vpop.f32.mrf.mxu1 }
  0xa4   : > { %v430_v40 = vadd.f32 %v977_v25, %v429_v38  ;;  %v450_v41 = vadd.f32 %v977_v25, %v449_v39 }
  0xa5   : > { %v523_v42 = vmax.f32 %v468_v36, 0.0  ;;  %v531_v43 = vmax.f32 %v488_v37, 0.0 }
  0xa6   : > { %v508_v44 = vmax.f32 %v430_v40, 0.0  ;;  %v516_v45 = vmax.f32 %v450_v41, 0.0 }
  0xa7   : > { %v555_v46 = vpack.c.bf16 %v523_v42, %v523_v42  ;;  %v563_v47 = vpack.c.bf16 %v531_v43, %v531_v43 }
  0xa8   : > { %v540_v48 = vpack.c.bf16 %v508_v44, %v508_v44  ;;  %v548_v49 = vpack.c.bf16 %v516_v45, %v516_v45 }
  0xa9   : > { %588 = vst.msk [vmem:[%s986_s4 + $0x40] sm:$0xf] %vm571_vm3, %v555_v46 }
  0xaa   : > { %596 = vst.msk [vmem:[%s986_s4 + $0x60] sm:$0xf] %vm571_vm3, %v563_v47  ;;  %v469_v50 = vpop.f32.mrf.mxu2  ;;  %v489_v51 = vpop.f32.mrf.mxu3 }
  0xab   : > { %573 = vst.msk [vmem:[%s986_s4 + $0x4] sm:$0xf] %vm571_vm3, %v540_v48  ;;  %v470_v52 = vadd.f32 %v977_v25, %v469_v50  ;;  %v490_v53 = vadd.f32 %v977_v25, %v489_v51  ;;  %v432_v54 = vpop.f32.mrf.mxu0  ;;  %v452_v55 = vpop.f32.mrf.mxu1 }
  0xac   : > { %581 = vst.msk [vmem:[%s986_s4 + $0x24] sm:$0xf] %vm571_vm3, %v548_v49  ;;  %v433_v56 = vadd.f32 %v977_v25, %v432_v54  ;;  %v453_v57 = vadd.f32 %v977_v25, %v452_v55 }
  0xad   : > { %v524_v58 = vmax.f32 %v470_v52, 0.0  ;;  %v532_v59 = vmax.f32 %v490_v53, 0.0 }
  0xae   : > { %v509_v60 = vmax.f32 %v433_v56, 0.0  ;;  %v517_v61 = vmax.f32 %v453_v57, 0.0 }
  0xaf   : > { %v556_v62 = vpack.c.bf16 %v524_v58, %v524_v58  ;;  %v564_v63 = vpack.c.bf16 %v532_v59, %v532_v59 }
  0xb0   : > { %v541_v0 = vpack.c.bf16 %v509_v60, %v509_v60  ;;  %v549_v1 = vpack.c.bf16 %v517_v61, %v517_v61 }
  0xb1   : > { %589 = vst.msk [vmem:[%s986_s4 + $0x44] sm:$0xf] %vm571_vm3, %v556_v62 }
  0xb2   : > { %597 = vst.msk [vmem:[%s986_s4 + $0x64] sm:$0xf] %vm571_vm3, %v564_v63  ;;  %v472_v2 = vpop.f32.mrf.mxu2  ;;  %v492_v3 = vpop.f32.mrf.mxu3 }
  0xb3   : > { %574 = vst.msk [vmem:[%s986_s4 + $0x8] sm:$0xf] %vm571_vm3, %v541_v0  ;;  %v473_v4 = vadd.f32 %v977_v25, %v472_v2  ;;  %v493_v5 = vadd.f32 %v977_v25, %v492_v3  ;;  %v434_v6 = vpop.f32.mrf.mxu0  ;;  %v454_v7 = vpop.f32.mrf.mxu1 }
  0xb4   : > { %582 = vst.msk [vmem:[%s986_s4 + $0x28] sm:$0xf] %vm571_vm3, %v549_v1  ;;  %v435_v8 = vadd.f32 %v977_v25, %v434_v6  ;;  %v455_v9 = vadd.f32 %v977_v25, %v454_v7 }
  0xb5   : > { %v525_v10 = vmax.f32 %v473_v4, 0.0  ;;  %v533_v11 = vmax.f32 %v493_v5, 0.0 }
  0xb6   : > { %v510_v12 = vmax.f32 %v435_v8, 0.0  ;;  %v518_v13 = vmax.f32 %v455_v9, 0.0 }
  0xb7   : > { %v557_v14 = vpack.c.bf16 %v525_v10, %v525_v10  ;;  %v565_v15 = vpack.c.bf16 %v533_v11, %v533_v11 }
  0xb8   : > { %v542_v16 = vpack.c.bf16 %v510_v12, %v510_v12  ;;  %v550_v17 = vpack.c.bf16 %v518_v13, %v518_v13 }
  0xb9   : > { %590 = vst.msk [vmem:[%s986_s4 + $0x48] sm:$0xf] %vm571_vm3, %v557_v14 }
  0xba   : > { %598 = vst.msk [vmem:[%s986_s4 + $0x68] sm:$0xf] %vm571_vm3, %v565_v15  ;;  %v474_v18 = vpop.f32.mrf.mxu2  ;;  %v494_v19 = vpop.f32.mrf.mxu3 }
  0xbb   : > { %575 = vst.msk [vmem:[%s986_s4 + $0xc] sm:$0xf] %vm571_vm3, %v542_v16  ;;  %v475_v20 = vadd.f32 %v977_v25, %v474_v18  ;;  %v495_v21 = vadd.f32 %v977_v25, %v494_v19  ;;  %v437_v22 = vpop.f32.mrf.mxu0  ;;  %v457_v23 = vpop.f32.mrf.mxu1 }
  0xbc   : > { %583 = vst.msk [vmem:[%s986_s4 + $0x2c] sm:$0xf] %vm571_vm3, %v550_v17  ;;  %v438_v24 = vadd.f32 %v977_v25, %v437_v22  ;;  %v458_v26 = vadd.f32 %v977_v25, %v457_v23 }
  0xbd   : > { %v526_v27 = vmax.f32 %v475_v20, 0.0  ;;  %v534_v28 = vmax.f32 %v495_v21, 0.0 }
  0xbe   : > { %v511_v29 = vmax.f32 %v438_v24, 0.0  ;;  %v519_v30 = vmax.f32 %v458_v26, 0.0 }
  0xbf   : > { %v558_v31 = vpack.c.bf16 %v526_v27, %v526_v27  ;;  %v566_v32 = vpack.c.bf16 %v534_v28, %v534_v28 }
  0xc0   : > { %v543_v33 = vpack.c.bf16 %v511_v29, %v511_v29  ;;  %v551_v34 = vpack.c.bf16 %v519_v30, %v519_v30 }
  0xc1   : > { %591 = vst.msk [vmem:[%s986_s4 + $0x4c] sm:$0xf] %vm571_vm3, %v558_v31 }
  0xc2   : > { %599 = vst.msk [vmem:[%s986_s4 + $0x6c] sm:$0xf] %vm571_vm3, %v566_v32  ;;  %v477_v35 = vpop.f32.mrf.mxu2  ;;  %v497_v36 = vpop.f32.mrf.mxu3 }
  0xc3   : > { %576 = vst.msk [vmem:[%s986_s4 + $0x10] sm:$0xf] %vm571_vm3, %v543_v33  ;;  %v478_v37 = vadd.f32 %v977_v25, %v477_v35  ;;  %v498_v38 = vadd.f32 %v977_v25, %v497_v36  ;;  %v439_v39 = vpop.f32.mrf.mxu0  ;;  %v459_v40 = vpop.f32.mrf.mxu1 }
  0xc4   : > { %584 = vst.msk [vmem:[%s986_s4 + $0x30] sm:$0xf] %vm571_vm3, %v551_v34  ;;  %v440_v41 = vadd.f32 %v977_v25, %v439_v39  ;;  %v460_v42 = vadd.f32 %v977_v25, %v459_v40 }
  0xc5   : > { %v527_v43 = vmax.f32 %v478_v37, 0.0  ;;  %v535_v44 = vmax.f32 %v498_v38, 0.0 }
  0xc6   : > { %v512_v45 = vmax.f32 %v440_v41, 0.0  ;;  %v520_v46 = vmax.f32 %v460_v42, 0.0 }
  0xc7   : > { %v559_v47 = vpack.c.bf16 %v527_v43, %v527_v43  ;;  %v567_v48 = vpack.c.bf16 %v535_v44, %v535_v44 }
  0xc8   : > { %v544_v49 = vpack.c.bf16 %v512_v45, %v512_v45  ;;  %v552_v50 = vpack.c.bf16 %v520_v46, %v520_v46 }
  0xc9   : > { %592 = vst.msk [vmem:[%s986_s4 + $0x50] sm:$0xf] %vm571_vm3, %v559_v47 }
  0xca   : > { %600 = vst.msk [vmem:[%s986_s4 + $0x70] sm:$0xf] %vm571_vm3, %v567_v48  ;;  %v479_v51 = vpop.f32.mrf.mxu2  ;;  %v499_v52 = vpop.f32.mrf.mxu3 }
  0xcb   : > { %577 = vst.msk [vmem:[%s986_s4 + $0x14] sm:$0xf] %vm571_vm3, %v544_v49  ;;  %v480_v53 = vadd.f32 %v977_v25, %v479_v51  ;;  %v500_v54 = vadd.f32 %v977_v25, %v499_v52  ;;  %v442_v55 = vpop.f32.mrf.mxu0  ;;  %v462_v56 = vpop.f32.mrf.mxu1 }
  0xcc   : > { %585 = vst.msk [vmem:[%s986_s4 + $0x34] sm:$0xf] %vm571_vm3, %v552_v50  ;;  %v443_v57 = vadd.f32 %v977_v25, %v442_v55  ;;  %v463_v58 = vadd.f32 %v977_v25, %v462_v56 }
  0xcd   : > { %v528_v59 = vmax.f32 %v480_v53, 0.0  ;;  %v536_v60 = vmax.f32 %v500_v54, 0.0 }
  0xce   : > { %v513_v61 = vmax.f32 %v443_v57, 0.0  ;;  %v521_v62 = vmax.f32 %v463_v58, 0.0 }
  0xcf   : > { %v560_v63 = vpack.c.bf16 %v528_v59, %v528_v59  ;;  %v568_v0 = vpack.c.bf16 %v536_v60, %v536_v60 }
  0xd0   : > { %v545_v1 = vpack.c.bf16 %v513_v61, %v513_v61  ;;  %v553_v2 = vpack.c.bf16 %v521_v62, %v521_v62 }
  0xd1   : > { %593 = vst.msk [vmem:[%s986_s4 + $0x54] sm:$0xf] %vm571_vm3, %v560_v63 }
  0xd2   : > { %601 = vst.msk [vmem:[%s986_s4 + $0x74] sm:$0xf] %vm571_vm3, %v568_v0  ;;  %v482_v3 = vpop.f32.mrf.mxu2  ;;  %v502_v4 = vpop.f32.mrf.mxu3 }
  0xd3   : > { %578 = vst.msk [vmem:[%s986_s4 + $0x18] sm:$0xf] %vm571_vm3, %v545_v1  ;;  %v483_v5 = vadd.f32 %v977_v25, %v482_v3  ;;  %v503_v6 = vadd.f32 %v977_v25, %v502_v4  ;;  %v444_v7 = vpop.f32.mrf.mxu0  ;;  %v464_v8 = vpop.f32.mrf.mxu1 }
  0xd4   : > { %586 = vst.msk [vmem:[%s986_s4 + $0x38] sm:$0xf] %vm571_vm3, %v553_v2  ;;  %v445_v9 = vadd.f32 %v977_v25, %v444_v7  ;;  %v465_v10 = vadd.f32 %v977_v25, %v464_v8 }
  0xd5   : > { %v529_v11 = vmax.f32 %v483_v5, 0.0  ;;  %v537_v12 = vmax.f32 %v503_v6, 0.0 }
  0xd6   : > { %v514_v13 = vmax.f32 %v445_v9, 0.0  ;;  %v522_v14 = vmax.f32 %v465_v10, 0.0 }
  0xd7   : > { %v561_v15 = vpack.c.bf16 %v529_v11, %v529_v11  ;;  %v569_v16 = vpack.c.bf16 %v537_v12, %v537_v12 }
  0xd8   : > { %v546_v17 = vpack.c.bf16 %v514_v13, %v514_v13  ;;  %v554_v18 = vpack.c.bf16 %v522_v14, %v522_v14 }
  0xd9   : > { %594 = vst.msk [vmem:[%s986_s4 + $0x58] sm:$0xf] %vm571_vm3, %v561_v15 }
  0xda   : > { %602 = vst.msk [vmem:[%s986_s4 + $0x78] sm:$0xf] %vm571_vm3, %v569_v16  ;;  %v484_v19 = vpop.f32.mrf.mxu2  ;;  %v504_v20 = vpop.f32.mrf.mxu3 }
  0xdb   : > { %579 = vst.msk [vmem:[%s986_s4 + $0x1c] sm:$0xf] %vm571_vm3, %v546_v17  ;;  %v485_v21 = vadd.f32 %v977_v25, %v484_v19  ;;  %v505_v22 = vadd.f32 %v977_v25, %v504_v20 }
  0xdc   : > { %587 = vst.msk [vmem:[%s986_s4 + $0x3c] sm:$0xf] %vm571_vm3, %v554_v18 }
  0xdd   : > { %v530_v23 = vmax.f32 %v485_v21, 0.0  ;;  %v538_v24 = vmax.f32 %v505_v22, 0.0 }
  0xdf   : > { %v562_v26 = vpack.c.bf16 %v530_v23, %v530_v23  ;;  %v570_v27 = vpack.c.bf16 %v538_v24, %v538_v24 }
  0xe1   : > { %595 = vst.msk [vmem:[%s986_s4 + $0x5c] sm:$0xf] %vm571_vm3, %v562_v26 }
  0xe2   : > { %603 = vst.msk [vmem:[%s986_s4 + $0x7c] sm:$0xf] %vm571_vm3, %v570_v27 }
  0xe3 PF: > { %s13_s14 = sadd.s32 1, %s882_s14   ;;  %s1095_s12 = smov %s878_s13 }
  0xe4   : > { %p10_p5 = scmp.ge.s32.totalorder %s13_s14, 4   ;;  %s1096_s13 = smov %s1098_s15 }
  0xe6   :  { %12 = sbr.rel (!%p10_p5) target bundleno = 2 (0x2), region = 68 }

// kernel: _lambda_.20
= control target key start
LH: loop header
LB: loop body
LE: loop exit
PB: predicated region body
PF: predicated region fallthrough
CT: control target
= control target key end

     0   :  { %s889_s12 = smov 0   ;;  %s891_s13 = smov 0   ;;  %s1072_s0 = inlined_call_operand.vmem [shape: bf16[512,32], index: 0, kind: input, shape index: {}]   ;;  %s1073_s1 = inlined_call_operand.vmem [shape: bf16[32,8], index: 1, kind: input, shape index: {}]   ;;  %s1074_s2 = inlined_call_operand.vmem [shape: f32[1,8], index: 2, kind: input, shape index: {}]   ;;  %s1075_s3 = inlined_call_operand.vmem [shape: bf16[512,8], index: 3, kind: output, shape index: {}]  }
   0x1   :  { %s893_s14 = smov 0  }
   0x2 LB: > { %s25_s15 = sadd.s32 1, %s863_s13  ;;  %p701_p0 = scmp.ge.s32.totalorder %s867_s14, 1  ;;  %s867_s14 = sphi %s893_s14, %s13_s14   ;;  %s863_s13 = sphi %s891_s13, %s1077_s13   ;;  %s859_s12 = sphi %s889_s12, %s1076_s12  }
   0x3   : > { %p27_p1 = scmp.ge.s32.totalorder %s25_s15, 2  ;;  %p169_p2 = scmp.lt.s32.totalorder %s867_s14, 3 }
   0x5   : > { %s1079_s15 = smov (%p27_p1, %s25_s15), 0  ;;  %p170_p3 = pnand %p701_p0, %p169_p2 }
   0x6   : > { %s702_s18 = sshll.u32 (!%p170_p3), %s859_s12, 5 }
   0x7   : > { %173 = sbr.rel (%p170_p3) target bundleno = 217 (0xd9), region = 32  ;;  %p204_p4 = scmp.lt.s32.totalorder (!%p170_p3), %s702_s18, 63 }
   0xc   : > { %v813_v0 = vld [vmem:[%s1073_s1 + $0x8] sm:$0xff]  ;;  %v812_v1 = vld [vmem:[%s1073_s1] sm:$0xff]  ;;  %s1081_s18 = smov (!%p204_p4, %s702_s18), 63  ;;  %vm358_vm0 = vcmask 261120   ;;  %vm560_vm1 = vcmask 60416  }
   0xd   : > { %413 = vmatpush.bf16.msra.mxu0 %v813_v0  ;;  %814 = vmatpush.bf16.msra.mxu1 %v813_v0  ;;  %s703_s21 = sshll.u32 %s1081_s18, 2  ;;  %v958_v18 = vld [vmem:[%s1074_s2] ss:$0 sm:$0xff] }
   0xe   : > { %815 = vmatpush.bf16.msra.mxu2 %v813_v0  ;;  %816 = vmatpush.bf16.msra.mxu3 %v813_v0  ;;  %s921_s24 = scalar_lea.vmem %s1072_s0, %s703_s21  ;;  %s967_s29 = scalar_lea.vmem %s1075_s3, %s703_s21 }
   0xf   : > { %v796_v2 = vld [vmem:[%s921_s24] sm:$0xff]  ;;  %v797_v6 = vld [vmem:[%s921_s24 + $0x8] sm:$0xff]  ;;  %v798_v10 = vld [vmem:[%s921_s24 + $0x10] sm:$0xff] }
  0x10   : > { %v800_v3 = vld [vmem:[%s921_s24 + $0x20] sm:$0xff]  ;;  %v801_v7 = vld [vmem:[%s921_s24 + $0x28] sm:$0xff]  ;;  %v802_v11 = vld [vmem:[%s921_s24 + $0x30] sm:$0xff] }
  0x11   : > { %414 = vmatpush.bf16.msra.mxu0 %v812_v1  ;;  %817 = vmatpush.bf16.msra.mxu1 %v812_v1  ;;  %v804_v4 = vld [vmem:[%s921_s24 + $0x40] sm:$0xff]  ;;  %v805_v8 = vld [vmem:[%s921_s24 + $0x48] sm:$0xff]  ;;  %v806_v12 = vld [vmem:[%s921_s24 + $0x50] sm:$0xff] }
  0x12   : > { %818 = vmatpush.bf16.msra.mxu2 %v812_v1  ;;  %819 = vmatpush.bf16.msra.mxu3 %v812_v1  ;;  %v808_v5 = vld [vmem:[%s921_s24 + $0x60] sm:$0xff]  ;;  %v809_v9 = vld [vmem:[%s921_s24 + $0x68] sm:$0xff]  ;;  %v810_v13 = vld [vmem:[%s921_s24 + $0x70] sm:$0xff] }
  0x13   : > { %v799_v14 = vld [vmem:[%s921_s24 + $0x18] sm:$0xff] }
  0x14   : > { %778 = vmatmul.msk.bf16.vlgmr.msra.gmra.mxu0 %vm358_vm0, %v796_v2  ;;  %782 = vmatmul.msk.bf16.vlgmr.msra.gmra.mxu1 %vm358_vm0, %v800_v3  ;;  %v803_v15 = vld [vmem:[%s921_s24 + $0x38] sm:$0xff] }
  0x15   : > { %786 = vmatmul.msk.bf16.vlgmr.msra.gmra.mxu2 %vm358_vm0, %v804_v4  ;;  %790 = vmatmul.msk.bf16.vlgmr.msra.gmra.mxu3 %vm358_vm0, %v808_v5  ;;  %v807_v16 = vld [vmem:[%s921_s24 + $0x58] sm:$0xff] }
  0x16   : > { %v811_v17 = vld [vmem:[%s921_s24 + $0x78] sm:$0xff] }
  0x24   : > { %779 = vmatmul.msk.bf16.gmra.mxu0 %vm358_vm0, %v797_v6  ;;  %783 = vmatmul.msk.bf16.gmra.mxu1 %vm358_vm0, %v801_v7 }
  0x25   : > { %787 = vmatmul.msk.bf16.gmra.mxu2 %vm358_vm0, %v805_v8  ;;  %791 = vmatmul.msk.bf16.gmra.mxu3 %vm358_vm0, %v809_v9 }
  0x34   : > { %780 = vmatmul.msk.bf16.gmra.mxu0 %vm358_vm0, %v798_v10  ;;  %784 = vmatmul.msk.bf16.gmra.mxu1 %vm358_vm0, %v802_v11 }
  0x35   : > { %788 = vmatmul.msk.bf16.gmra.mxu2 %vm358_vm0, %v806_v12  ;;  %792 = vmatmul.msk.bf16.gmra.mxu3 %vm358_vm0, %v810_v13 }
  0x44   : > { %781 = vmatmul.msk.bf16.gmra.mxu0 %vm358_vm0, %v799_v14  ;;  %785 = vmatmul.msk.bf16.gmra.mxu1 %vm358_vm0, %v803_v15 }
  0x45   : > { %789 = vmatmul.msk.bf16.gmra.mxu2 %vm358_vm0, %v807_v16  ;;  %793 = vmatmul.msk.bf16.gmra.mxu3 %vm358_vm0, %v811_v17 }
  0x91   : > { %v416_v19 = vpop.f32.mrf.mxu0  ;;  %v436_v20 = vpop.f32.mrf.mxu1 }
  0x92   : > { %v417_v21 = vadd.f32 %v958_v18, %v416_v19  ;;  %v437_v22 = vadd.f32 %v958_v18, %v436_v20 }
  0x94   : > { %v496_v23 = vmax.f32 %v417_v21, 0.0  ;;  %v504_v24 = vmax.f32 %v437_v22, 0.0 }
  0x96   : > { %v528_v25 = vpack.c.bf16 %v496_v23, %v496_v23  ;;  %v536_v26 = vpack.c.bf16 %v504_v24, %v504_v24 }
  0x98   : > { %561 = vst.msk [vmem:[%s967_s29] sm:$0xf] %vm560_vm1, %v528_v25  ;;  %v456_v27 = vpop.f32.mrf.mxu2  ;;  %v476_v28 = vpop.f32.mrf.mxu3 }
  0x99   : > { %569 = vst.msk [vmem:[%s967_s29 + $0x20] sm:$0xf] %vm560_vm1, %v536_v26  ;;  %v457_v29 = vadd.f32 %v958_v18, %v456_v27  ;;  %v477_v30 = vadd.f32 %v958_v18, %v476_v28  ;;  %v418_v31 = vpop.f32.mrf.mxu0  ;;  %v438_v32 = vpop.f32.mrf.mxu1 }
  0x9a   : > { %v419_v33 = vadd.f32 %v958_v18, %v418_v31  ;;  %v439_v34 = vadd.f32 %v958_v18, %v438_v32 }
  0x9b   : > { %v512_v35 = vmax.f32 %v457_v29, 0.0  ;;  %v520_v36 = vmax.f32 %v477_v30, 0.0 }
  0x9c   : > { %v497_v37 = vmax.f32 %v419_v33, 0.0  ;;  %v505_v38 = vmax.f32 %v439_v34, 0.0 }
  0x9d   : > { %v544_v39 = vpack.c.bf16 %v512_v35, %v512_v35  ;;  %v552_v40 = vpack.c.bf16 %v520_v36, %v520_v36 }
  0x9e   : > { %v529_v41 = vpack.c.bf16 %v497_v37, %v497_v37  ;;  %v537_v42 = vpack.c.bf16 %v505_v38, %v505_v38 }
  0x9f   : > { %577 = vst.msk [vmem:[%s967_s29 + $0x40] sm:$0xf] %vm560_vm1, %v544_v39 }
  0xa0   : > { %585 = vst.msk [vmem:[%s967_s29 + $0x60] sm:$0xf] %vm560_vm1, %v552_v40  ;;  %v458_v43 = vpop.f32.mrf.mxu2  ;;  %v478_v44 = vpop.f32.mrf.mxu3 }
  0xa1   : > { %562 = vst.msk [vmem:[%s967_s29 + $0x4] sm:$0xf] %vm560_vm1, %v529_v41  ;;  %v459_v45 = vadd.f32 %v958_v18, %v458_v43  ;;  %v479_v46 = vadd.f32 %v958_v18, %v478_v44  ;;  %v421_v47 = vpop.f32.mrf.mxu0  ;;  %v441_v48 = vpop.f32.mrf.mxu1 }
  0xa2   : > { %570 = vst.msk [vmem:[%s967_s29 + $0x24] sm:$0xf] %vm560_vm1, %v537_v42  ;;  %v422_v49 = vadd.f32 %v958_v18, %v421_v47  ;;  %v442_v50 = vadd.f32 %v958_v18, %v441_v48 }
  0xa3   : > { %v513_v51 = vmax.f32 %v459_v45, 0.0  ;;  %v521_v52 = vmax.f32 %v479_v46, 0.0 }
  0xa4   : > { %v498_v53 = vmax.f32 %v422_v49, 0.0  ;;  %v506_v54 = vmax.f32 %v442_v50, 0.0 }
  0xa5   : > { %v545_v55 = vpack.c.bf16 %v513_v51, %v513_v51  ;;  %v553_v56 = vpack.c.bf16 %v521_v52, %v521_v52 }
  0xa6   : > { %v530_v57 = vpack.c.bf16 %v498_v53, %v498_v53  ;;  %v538_v58 = vpack.c.bf16 %v506_v54, %v506_v54 }
  0xa7   : > { %578 = vst.msk [vmem:[%s967_s29 + $0x44] sm:$0xf] %vm560_vm1, %v545_v55 }
  0xa8   : > { %586 = vst.msk [vmem:[%s967_s29 + $0x64] sm:$0xf] %vm560_vm1, %v553_v56  ;;  %v461_v59 = vpop.f32.mrf.mxu2  ;;  %v481_v60 = vpop.f32.mrf.mxu3 }
  0xa9   : > { %563 = vst.msk [vmem:[%s967_s29 + $0x8] sm:$0xf] %vm560_vm1, %v530_v57  ;;  %v462_v61 = vadd.f32 %v958_v18, %v461_v59  ;;  %v482_v62 = vadd.f32 %v958_v18, %v481_v60  ;;  %v423_v63 = vpop.f32.mrf.mxu0  ;;  %v443_v0 = vpop.f32.mrf.mxu1 }
  0xaa   : > { %571 = vst.msk [vmem:[%s967_s29 + $0x28] sm:$0xf] %vm560_vm1, %v538_v58  ;;  %v424_v1 = vadd.f32 %v958_v18, %v423_v63  ;;  %v444_v2 = vadd.f32 %v958_v18, %v443_v0 }
  0xab   : > { %v514_v3 = vmax.f32 %v462_v61, 0.0  ;;  %v522_v4 = vmax.f32 %v482_v62, 0.0 }
  0xac   : > { %v499_v5 = vmax.f32 %v424_v1, 0.0  ;;  %v507_v6 = vmax.f32 %v444_v2, 0.0 }
  0xad   : > { %v546_v7 = vpack.c.bf16 %v514_v3, %v514_v3  ;;  %v554_v8 = vpack.c.bf16 %v522_v4, %v522_v4 }
  0xae   : > { %v531_v9 = vpack.c.bf16 %v499_v5, %v499_v5  ;;  %v539_v10 = vpack.c.bf16 %v507_v6, %v507_v6 }
  0xaf   : > { %579 = vst.msk [vmem:[%s967_s29 + $0x48] sm:$0xf] %vm560_vm1, %v546_v7 }
  0xb0   : > { %587 = vst.msk [vmem:[%s967_s29 + $0x68] sm:$0xf] %vm560_vm1, %v554_v8  ;;  %v463_v11 = vpop.f32.mrf.mxu2  ;;  %v483_v12 = vpop.f32.mrf.mxu3 }
  0xb1   : > { %564 = vst.msk [vmem:[%s967_s29 + $0xc] sm:$0xf] %vm560_vm1, %v531_v9  ;;  %v464_v13 = vadd.f32 %v958_v18, %v463_v11  ;;  %v484_v14 = vadd.f32 %v958_v18, %v483_v12  ;;  %v426_v15 = vpop.f32.mrf.mxu0  ;;  %v446_v16 = vpop.f32.mrf.mxu1 }
  0xb2   : > { %572 = vst.msk [vmem:[%s967_s29 + $0x2c] sm:$0xf] %vm560_vm1, %v539_v10  ;;  %v427_v17 = vadd.f32 %v958_v18, %v426_v15  ;;  %v447_v19 = vadd.f32 %v958_v18, %v446_v16 }
  0xb3   : > { %v515_v20 = vmax.f32 %v464_v13, 0.0  ;;  %v523_v21 = vmax.f32 %v484_v14, 0.0 }
  0xb4   : > { %v500_v22 = vmax.f32 %v427_v17, 0.0  ;;  %v508_v23 = vmax.f32 %v447_v19, 0.0 }
  0xb5   : > { %v547_v24 = vpack.c.bf16 %v515_v20, %v515_v20  ;;  %v555_v25 = vpack.c.bf16 %v523_v21, %v523_v21 }
  0xb6   : > { %v532_v26 = vpack.c.bf16 %v500_v22, %v500_v22  ;;  %v540_v27 = vpack.c.bf16 %v508_v23, %v508_v23 }
  0xb7   : > { %580 = vst.msk [vmem:[%s967_s29 + $0x4c] sm:$0xf] %vm560_vm1, %v547_v24 }
  0xb8   : > { %588 = vst.msk [vmem:[%s967_s29 + $0x6c] sm:$0xf] %vm560_vm1, %v555_v25  ;;  %v466_v28 = vpop.f32.mrf.mxu2  ;;  %v486_v29 = vpop.f32.mrf.mxu3 }
  0xb9   : > { %565 = vst.msk [vmem:[%s967_s29 + $0x10] sm:$0xf] %vm560_vm1, %v532_v26  ;;  %v467_v30 = vadd.f32 %v958_v18, %v466_v28  ;;  %v487_v31 = vadd.f32 %v958_v18, %v486_v29  ;;  %v428_v32 = vpop.f32.mrf.mxu0  ;;  %v448_v33 = vpop.f32.mrf.mxu1 }
  0xba   : > { %573 = vst.msk [vmem:[%s967_s29 + $0x30] sm:$0xf] %vm560_vm1, %v540_v27  ;;  %v429_v34 = vadd.f32 %v958_v18, %v428_v32  ;;  %v449_v35 = vadd.f32 %v958_v18, %v448_v33 }
  0xbb   : > { %v516_v36 = vmax.f32 %v467_v30, 0.0  ;;  %v524_v37 = vmax.f32 %v487_v31, 0.0 }
  0xbc   : > { %v501_v38 = vmax.f32 %v429_v34, 0.0  ;;  %v509_v39 = vmax.f32 %v449_v35, 0.0 }
  0xbd   : > { %v548_v40 = vpack.c.bf16 %v516_v36, %v516_v36  ;;  %v556_v41 = vpack.c.bf16 %v524_v37, %v524_v37 }
  0xbe   : > { %v533_v42 = vpack.c.bf16 %v501_v38, %v501_v38  ;;  %v541_v43 = vpack.c.bf16 %v509_v39, %v509_v39 }
  0xbf   : > { %581 = vst.msk [vmem:[%s967_s29 + $0x50] sm:$0xf] %vm560_vm1, %v548_v40 }
  0xc0   : > { %589 = vst.msk [vmem:[%s967_s29 + $0x70] sm:$0xf] %vm560_vm1, %v556_v41  ;;  %v468_v44 = vpop.f32.mrf.mxu2  ;;  %v488_v45 = vpop.f32.mrf.mxu3 }
  0xc1   : > { %566 = vst.msk [vmem:[%s967_s29 + $0x14] sm:$0xf] %vm560_vm1, %v533_v42  ;;  %v469_v46 = vadd.f32 %v958_v18, %v468_v44  ;;  %v489_v47 = vadd.f32 %v958_v18, %v488_v45  ;;  %v431_v48 = vpop.f32.mrf.mxu0  ;;  %v451_v49 = vpop.f32.mrf.mxu1 }
  0xc2   : > { %574 = vst.msk [vmem:[%s967_s29 + $0x34] sm:$0xf] %vm560_vm1, %v541_v43  ;;  %v432_v50 = vadd.f32 %v958_v18, %v431_v48  ;;  %v452_v51 = vadd.f32 %v958_v18, %v451_v49 }
  0xc3   : > { %v517_v52 = vmax.f32 %v469_v46, 0.0  ;;  %v525_v53 = vmax.f32 %v489_v47, 0.0 }
  0xc4   : > { %v502_v54 = vmax.f32 %v432_v50, 0.0  ;;  %v510_v55 = vmax.f32 %v452_v51, 0.0 }
  0xc5   : > { %v549_v56 = vpack.c.bf16 %v517_v52, %v517_v52  ;;  %v557_v57 = vpack.c.bf16 %v525_v53, %v525_v53 }
  0xc6   : > { %v534_v58 = vpack.c.bf16 %v502_v54, %v502_v54  ;;  %v542_v59 = vpack.c.bf16 %v510_v55, %v510_v55 }
  0xc7   : > { %582 = vst.msk [vmem:[%s967_s29 + $0x54] sm:$0xf] %vm560_vm1, %v549_v56 }
  0xc8   : > { %590 = vst.msk [vmem:[%s967_s29 + $0x74] sm:$0xf] %vm560_vm1, %v557_v57  ;;  %v471_v60 = vpop.f32.mrf.mxu2  ;;  %v491_v61 = vpop.f32.mrf.mxu3 }
  0xc9   : > { %567 = vst.msk [vmem:[%s967_s29 + $0x18] sm:$0xf] %vm560_vm1, %v534_v58  ;;  %v472_v62 = vadd.f32 %v958_v18, %v471_v60  ;;  %v492_v63 = vadd.f32 %v958_v18, %v491_v61  ;;  %v433_v0 = vpop.f32.mrf.mxu0  ;;  %v453_v1 = vpop.f32.mrf.mxu1 }
  0xca   : > { %575 = vst.msk [vmem:[%s967_s29 + $0x38] sm:$0xf] %vm560_vm1, %v542_v59  ;;  %v434_v2 = vadd.f32 %v958_v18, %v433_v0  ;;  %v454_v3 = vadd.f32 %v958_v18, %v453_v1 }
  0xcb   : > { %v518_v4 = vmax.f32 %v472_v62, 0.0  ;;  %v526_v5 = vmax.f32 %v492_v63, 0.0 }
  0xcc   : > { %v503_v6 = vmax.f32 %v434_v2, 0.0  ;;  %v511_v7 = vmax.f32 %v454_v3, 0.0 }
  0xcd   : > { %v550_v8 = vpack.c.bf16 %v518_v4, %v518_v4  ;;  %v558_v9 = vpack.c.bf16 %v526_v5, %v526_v5 }
  0xce   : > { %v535_v10 = vpack.c.bf16 %v503_v6, %v503_v6  ;;  %v543_v11 = vpack.c.bf16 %v511_v7, %v511_v7 }
  0xcf   : > { %583 = vst.msk [vmem:[%s967_s29 + $0x58] sm:$0xf] %vm560_vm1, %v550_v8 }
  0xd0   : > { %591 = vst.msk [vmem:[%s967_s29 + $0x78] sm:$0xf] %vm560_vm1, %v558_v9  ;;  %v473_v12 = vpop.f32.mrf.mxu2  ;;  %v493_v13 = vpop.f32.mrf.mxu3 }
  0xd1   : > { %568 = vst.msk [vmem:[%s967_s29 + $0x1c] sm:$0xf] %vm560_vm1, %v535_v10  ;;  %v474_v14 = vadd.f32 %v958_v18, %v473_v12  ;;  %v494_v15 = vadd.f32 %v958_v18, %v493_v13 }
  0xd2   : > { %576 = vst.msk [vmem:[%s967_s29 + $0x3c] sm:$0xf] %vm560_vm1, %v543_v11 }
  0xd3   : > { %v519_v16 = vmax.f32 %v474_v14, 0.0  ;;  %v527_v17 = vmax.f32 %v494_v15, 0.0 }
  0xd5   : > { %v551_v19 = vpack.c.bf16 %v519_v16, %v519_v16  ;;  %v559_v20 = vpack.c.bf16 %v527_v17, %v527_v17 }
  0xd7   : > { %584 = vst.msk [vmem:[%s967_s29 + $0x5c] sm:$0xf] %vm560_vm1, %v551_v19 }
  0xd8   : > { %592 = vst.msk [vmem:[%s967_s29 + $0x7c] sm:$0xf] %vm560_vm1, %v559_v20 }
  0xd9 PF: > { %s13_s14 = sadd.s32 1, %s867_s14   ;;  %s1076_s12 = smov %s863_s13 }
  0xda   : > { %p10_p5 = scmp.ge.s32.totalorder %s13_s14, 4   ;;  %s1077_s13 = smov %s1079_s15 }
  0xdc   :  { %12 = sbr.rel (!%p10_p5) target bundleno = 2 (0x2), region = 68 }

// kernel: _lambda_.21
= control target key start
LH: loop header
LB: loop body
LE: loop exit
PB: predicated region body
PF: predicated region fallthrough
CT: control target
= control target key end

     0   :  { %s833_s12 = smov 0   ;;  %s835_s13 = smov 0   ;;  %s995_s0 = inlined_call_operand.vmem [shape: bf16[512,8], index: 0, kind: input, shape index: {}]   ;;  %s996_s1 = inlined_call_operand.vmem [shape: bf16[8,32], index: 1, kind: input, shape index: {}]   ;;  %s997_s2 = inlined_call_operand.vmem [shape: f32[1,32], index: 2, kind: input, shape index: {}]   ;;  %s998_s3 = inlined_call_operand.vmem [shape: bf16[512,32], index: 3, kind: output, shape index: {}]  }
   0x1   :  { %s837_s14 = smov 0  }
   0x2 LB: > { %s25_s15 = sadd.s32 1, %s807_s13  ;;  %p658_p0 = scmp.ge.s32.totalorder %s811_s14, 1  ;;  %s811_s14 = sphi %s837_s14, %s13_s14   ;;  %s807_s13 = sphi %s835_s13, %s1000_s13   ;;  %s803_s12 = sphi %s833_s12, %s999_s12  }
   0x3   : > { %p27_p1 = scmp.ge.s32.totalorder %s25_s15, 2  ;;  %p169_p2 = scmp.lt.s32.totalorder %s811_s14, 3 }
   0x5   : > { %s1002_s15 = smov (%p27_p1, %s25_s15), 0  ;;  %p170_p3 = pnand %p658_p0, %p169_p2 }
   0x6   : > { %s659_s18 = sshll.u32 (!%p170_p3), %s803_s12, 5 }
   0x7   : > { %173 = sbr.rel (%p170_p3) target bundleno = 212 (0xd4), region = 32  ;;  %p204_p4 = scmp.lt.s32.totalorder (!%p170_p3), %s659_s18, 63 }
   0xc   : > { %v258_v0 = vld [vmem:[%s996_s1] sm:$0xf]  ;;  %vm392_vm0 = vcmask 1043456   ;;  %s1004_s18 = smov (!%p204_p4, %s659_s18), 63  ;;  %vm343_vm1 = vcmask 64512   ;;  %vm517_vm2 = vcmask 257024  }
   0xd   : > { %v394_v1 = vsel %vm392_vm0, %v258_v0, 0  ;;  %s660_s19 = sshll.u32 %s1004_s18, 2  ;;  %v881_v18 = vld [vmem:[%s997_s2] ss:$0 sm:$0xff] }
   0xe   : > { %403 = vmatpush.bf16.msra.mxu0 %v394_v1  ;;  %761 = vmatpush.bf16.msra.mxu1 %v394_v1  ;;  %s207_s22 = scalar_lea.vmem %s995_s0, %s660_s19  ;;  %s890_s27 = scalar_lea.vmem %s998_s3, %s660_s19 }
   0xf   : > { %762 = vmatpush.bf16.msra.mxu2 %v394_v1  ;;  %763 = vmatpush.bf16.msra.mxu3 %v394_v1  ;;  %v745_v2 = vld [vmem:[%s207_s22] sm:$0xff]  ;;  %v746_v6 = vld [vmem:[%s207_s22 + $0x8] sm:$0xff]  ;;  %v747_v10 = vld [vmem:[%s207_s22 + $0x10] sm:$0xff] }
  0x10   : > { %v749_v3 = vld [vmem:[%s207_s22 + $0x20] sm:$0xff]  ;;  %v750_v7 = vld [vmem:[%s207_s22 + $0x28] sm:$0xff]  ;;  %v751_v11 = vld [vmem:[%s207_s22 + $0x30] sm:$0xff] }
  0x11   : > { %v753_v4 = vld [vmem:[%s207_s22 + $0x40] sm:$0xff]  ;;  %727 = vmatmul.msk.bf16.vlgmr.msra.gmra.mxu0 %vm343_vm1, %v745_v2  ;;  %731 = vmatmul.msk.bf16.vlgmr.msra.gmra.mxu1 %vm343_vm1, %v749_v3  ;;  %v754_v8 = vld [vmem:[%s207_s22 + $0x48] sm:$0xff]  ;;  %v755_v12 = vld [vmem:[%s207_s22 + $0x50] sm:$0xff] }
  0x12   : > { %v757_v5 = vld [vmem:[%s207_s22 + $0x60] sm:$0xff]  ;;  %735 = vmatmul.msk.bf16.vlgmr.msra.gmra.mxu2 %vm343_vm1, %v753_v4  ;;  %v758_v9 = vld [vmem:[%s207_s22 + $0x68] sm:$0xff]  ;;  %v759_v13 = vld [vmem:[%s207_s22 + $0x70] sm:$0xff] }
  0x13   : > { %739 = vmatmul.msk.bf16.vlgmr.msra.gmra.mxu3 %vm343_vm1, %v757_v5  ;;  %v748_v14 = vld [vmem:[%s207_s22 + $0x18] sm:$0xff] }
  0x14   : > { %v752_v15 = vld [vmem:[%s207_s22 + $0x38] sm:$0xff] }
  0x15   : > { %v756_v16 = vld [vmem:[%s207_s22 + $0x58] sm:$0xff] }
  0x16   : > { %v760_v17 = vld [vmem:[%s207_s22 + $0x78] sm:$0xff] }
  0x21   : > { %728 = vmatmul.msk.bf16.gmra.mxu0 %vm343_vm1, %v746_v6  ;;  %732 = vmatmul.msk.bf16.gmra.mxu1 %vm343_vm1, %v750_v7 }
  0x22   : > { %736 = vmatmul.msk.bf16.gmra.mxu2 %vm343_vm1, %v754_v8 }
  0x23   : > { %740 = vmatmul.msk.bf16.gmra.mxu3 %vm343_vm1, %v758_v9 }
  0x31   : > { %729 = vmatmul.msk.bf16.gmra.mxu0 %vm343_vm1, %v747_v10  ;;  %733 = vmatmul.msk.bf16.gmra.mxu1 %vm343_vm1, %v751_v11 }
  0x32   : > { %737 = vmatmul.msk.bf16.gmra.mxu2 %vm343_vm1, %v755_v12 }
  0x33   : > { %741 = vmatmul.msk.bf16.gmra.mxu3 %vm343_vm1, %v759_v13 }
  0x41   : > { %730 = vmatmul.msk.bf16.gmra.mxu0 %vm343_vm1, %v748_v14  ;;  %734 = vmatmul.msk.bf16.gmra.mxu1 %vm343_vm1, %v752_v15 }
  0x42   : > { %738 = vmatmul.msk.bf16.gmra.mxu2 %vm343_vm1, %v756_v16 }
  0x43   : > { %742 = vmatmul.msk.bf16.gmra.mxu3 %vm343_vm1, %v760_v17 }
  0x8e   : > { %v405_v19 = vpop.f32.mrf.mxu0  ;;  %v425_v20 = vpop.f32.mrf.mxu1 }
  0x8f   : > { %v406_v21 = vadd.f32 %v881_v18, %v405_v19  ;;  %v426_v22 = vadd.f32 %v881_v18, %v425_v20 }
  0x91   : > { %v485_v23 = vpack.c.bf16 %v406_v21, %v406_v21  ;;  %v493_v24 = vpack.c.bf16 %v426_v22, %v426_v22 }
  0x93   : > { %518 = vst.msk [vmem:[%s890_s27] sm:$0xf] %vm517_vm2, %v485_v23 }
  0x94   : > { %526 = vst.msk [vmem:[%s890_s27 + $0x20] sm:$0xf] %vm517_vm2, %v493_v24 }
  0x95   : > { %v445_v25 = vpop.f32.mrf.mxu2 }
  0x96   : > { %v465_v26 = vpop.f32.mrf.mxu3  ;;  %v446_v27 = vadd.f32 %v881_v18, %v445_v25  ;;  %v407_v29 = vpop.f32.mrf.mxu0 }
  0x97   : > { %v466_v28 = vadd.f32 %v881_v18, %v465_v26  ;;  %v427_v30 = vpop.f32.mrf.mxu1  ;;  %v408_v31 = vadd.f32 %v881_v18, %v407_v29 }
  0x98   : > { %v428_v32 = vadd.f32 %v881_v18, %v427_v30  ;;  %v501_v33 = vpack.c.bf16 %v446_v27, %v446_v27 }
  0x99   : > { %v509_v34 = vpack.c.bf16 %v466_v28, %v466_v28  ;;  %v486_v35 = vpack.c.bf16 %v408_v31, %v408_v31 }
  0x9a   : > { %v494_v36 = vpack.c.bf16 %v428_v32, %v428_v32  ;;  %534 = vst.msk [vmem:[%s890_s27 + $0x40] sm:$0xf] %vm517_vm2, %v501_v33 }
  0x9b   : > { %542 = vst.msk [vmem:[%s890_s27 + $0x60] sm:$0xf] %vm517_vm2, %v509_v34 }
  0x9c   : > { %519 = vst.msk [vmem:[%s890_s27 + $0x4] sm:$0xf] %vm517_vm2, %v486_v35 }
  0x9d   : > { %527 = vst.msk [vmem:[%s890_s27 + $0x24] sm:$0xf] %vm517_vm2, %v494_v36  ;;  %v447_v37 = vpop.f32.mrf.mxu2 }
  0x9e   : > { %v467_v38 = vpop.f32.mrf.mxu3  ;;  %v448_v39 = vadd.f32 %v881_v18, %v447_v37  ;;  %v410_v41 = vpop.f32.mrf.mxu0 }
  0x9f   : > { %v468_v40 = vadd.f32 %v881_v18, %v467_v38  ;;  %v430_v42 = vpop.f32.mrf.mxu1  ;;  %v411_v43 = vadd.f32 %v881_v18, %v410_v41 }
  0xa0   : > { %v431_v44 = vadd.f32 %v881_v18, %v430_v42  ;;  %v502_v45 = vpack.c.bf16 %v448_v39, %v448_v39 }
  0xa1   : > { %v510_v46 = vpack.c.bf16 %v468_v40, %v468_v40  ;;  %v487_v47 = vpack.c.bf16 %v411_v43, %v411_v43 }
  0xa2   : > { %v495_v48 = vpack.c.bf16 %v431_v44, %v431_v44  ;;  %535 = vst.msk [vmem:[%s890_s27 + $0x44] sm:$0xf] %vm517_vm2, %v502_v45 }
  0xa3   : > { %543 = vst.msk [vmem:[%s890_s27 + $0x64] sm:$0xf] %vm517_vm2, %v510_v46 }
  0xa4   : > { %520 = vst.msk [vmem:[%s890_s27 + $0x8] sm:$0xf] %vm517_vm2, %v487_v47 }
  0xa5   : > { %528 = vst.msk [vmem:[%s890_s27 + $0x28] sm:$0xf] %vm517_vm2, %v495_v48  ;;  %v450_v49 = vpop.f32.mrf.mxu2 }
  0xa6   : > { %v470_v50 = vpop.f32.mrf.mxu3  ;;  %v451_v51 = vadd.f32 %v881_v18, %v450_v49  ;;  %v412_v53 = vpop.f32.mrf.mxu0 }
  0xa7   : > { %v471_v52 = vadd.f32 %v881_v18, %v470_v50  ;;  %v432_v54 = vpop.f32.mrf.mxu1  ;;  %v413_v55 = vadd.f32 %v881_v18, %v412_v53 }
  0xa8   : > { %v433_v56 = vadd.f32 %v881_v18, %v432_v54  ;;  %v503_v57 = vpack.c.bf16 %v451_v51, %v451_v51 }
  0xa9   : > { %v511_v58 = vpack.c.bf16 %v471_v52, %v471_v52  ;;  %v488_v59 = vpack.c.bf16 %v413_v55, %v413_v55 }
  0xaa   : > { %v496_v60 = vpack.c.bf16 %v433_v56, %v433_v56  ;;  %536 = vst.msk [vmem:[%s890_s27 + $0x48] sm:$0xf] %vm517_vm2, %v503_v57 }
  0xab   : > { %544 = vst.msk [vmem:[%s890_s27 + $0x68] sm:$0xf] %vm517_vm2, %v511_v58 }
  0xac   : > { %521 = vst.msk [vmem:[%s890_s27 + $0xc] sm:$0xf] %vm517_vm2, %v488_v59 }
  0xad   : > { %529 = vst.msk [vmem:[%s890_s27 + $0x2c] sm:$0xf] %vm517_vm2, %v496_v60  ;;  %v452_v61 = vpop.f32.mrf.mxu2 }
  0xae   : > { %v472_v62 = vpop.f32.mrf.mxu3  ;;  %v453_v63 = vadd.f32 %v881_v18, %v452_v61  ;;  %v415_v1 = vpop.f32.mrf.mxu0 }
  0xaf   : > { %v473_v0 = vadd.f32 %v881_v18, %v472_v62  ;;  %v435_v2 = vpop.f32.mrf.mxu1  ;;  %v416_v3 = vadd.f32 %v881_v18, %v415_v1 }
  0xb0   : > { %v436_v4 = vadd.f32 %v881_v18, %v435_v2  ;;  %v504_v5 = vpack.c.bf16 %v453_v63, %v453_v63 }
  0xb1   : > { %v512_v6 = vpack.c.bf16 %v473_v0, %v473_v0  ;;  %v489_v7 = vpack.c.bf16 %v416_v3, %v416_v3 }
  0xb2   : > { %v497_v8 = vpack.c.bf16 %v436_v4, %v436_v4  ;;  %537 = vst.msk [vmem:[%s890_s27 + $0x4c] sm:$0xf] %vm517_vm2, %v504_v5 }
  0xb3   : > { %545 = vst.msk [vmem:[%s890_s27 + $0x6c] sm:$0xf] %vm517_vm2, %v512_v6 }
  0xb4   : > { %522 = vst.msk [vmem:[%s890_s27 + $0x10] sm:$0xf] %vm517_vm2, %v489_v7 }
  0xb5   : > { %530 = vst.msk [vmem:[%s890_s27 + $0x30] sm:$0xf] %vm517_vm2, %v497_v8  ;;  %v455_v9 = vpop.f32.mrf.mxu2 }
  0xb6   : > { %v475_v10 = vpop.f32.mrf.mxu3  ;;  %v456_v11 = vadd.f32 %v881_v18, %v455_v9  ;;  %v417_v13 = vpop.f32.mrf.mxu0 }
  0xb7   : > { %v476_v12 = vadd.f32 %v881_v18, %v475_v10  ;;  %v437_v14 = vpop.f32.mrf.mxu1  ;;  %v418_v15 = vadd.f32 %v881_v18, %v417_v13 }
  0xb8   : > { %v438_v16 = vadd.f32 %v881_v18, %v437_v14  ;;  %v505_v17 = vpack.c.bf16 %v456_v11, %v456_v11 }
  0xb9   : > { %v513_v19 = vpack.c.bf16 %v476_v12, %v476_v12  ;;  %v490_v20 = vpack.c.bf16 %v418_v15, %v418_v15 }
  0xba   : > { %v498_v21 = vpack.c.bf16 %v438_v16, %v438_v16  ;;  %538 = vst.msk [vmem:[%s890_s27 + $0x50] sm:$0xf] %vm517_vm2, %v505_v17 }
  0xbb   : > { %546 = vst.msk [vmem:[%s890_s27 + $0x70] sm:$0xf] %vm517_vm2, %v513_v19 }
  0xbc   : > { %523 = vst.msk [vmem:[%s890_s27 + $0x14] sm:$0xf] %vm517_vm2, %v490_v20 }
  0xbd   : > { %531 = vst.msk [vmem:[%s890_s27 + $0x34] sm:$0xf] %vm517_vm2, %v498_v21  ;;  %v457_v22 = vpop.f32.mrf.mxu2 }
  0xbe   : > { %v477_v23 = vpop.f32.mrf.mxu3  ;;  %v458_v24 = vadd.f32 %v881_v18, %v457_v22  ;;  %v420_v26 = vpop.f32.mrf.mxu0 }
  0xbf   : > { %v478_v25 = vadd.f32 %v881_v18, %v477_v23  ;;  %v440_v27 = vpop.f32.mrf.mxu1  ;;  %v421_v28 = vadd.f32 %v881_v18, %v420_v26 }
  0xc0   : > { %v441_v29 = vadd.f32 %v881_v18, %v440_v27  ;;  %v506_v30 = vpack.c.bf16 %v458_v24, %v458_v24 }
  0xc1   : > { %v514_v31 = vpack.c.bf16 %v478_v25, %v478_v25  ;;  %v491_v32 = vpack.c.bf16 %v421_v28, %v421_v28 }
  0xc2   : > { %v499_v33 = vpack.c.bf16 %v441_v29, %v441_v29  ;;  %539 = vst.msk [vmem:[%s890_s27 + $0x54] sm:$0xf] %vm517_vm2, %v506_v30 }
  0xc3   : > { %547 = vst.msk [vmem:[%s890_s27 + $0x74] sm:$0xf] %vm517_vm2, %v514_v31 }
  0xc4   : > { %524 = vst.msk [vmem:[%s890_s27 + $0x18] sm:$0xf] %vm517_vm2, %v491_v32 }
  0xc5   : > { %532 = vst.msk [vmem:[%s890_s27 + $0x38] sm:$0xf] %vm517_vm2, %v499_v33  ;;  %v460_v34 = vpop.f32.mrf.mxu2 }
  0xc6   : > { %v480_v35 = vpop.f32.mrf.mxu3  ;;  %v461_v36 = vadd.f32 %v881_v18, %v460_v34  ;;  %v422_v38 = vpop.f32.mrf.mxu0 }
  0xc7   : > { %v481_v37 = vadd.f32 %v881_v18, %v480_v35  ;;  %v442_v39 = vpop.f32.mrf.mxu1  ;;  %v423_v40 = vadd.f32 %v881_v18, %v422_v38 }
  0xc8   : > { %v443_v41 = vadd.f32 %v881_v18, %v442_v39  ;;  %v507_v42 = vpack.c.bf16 %v461_v36, %v461_v36 }
  0xc9   : > { %v515_v43 = vpack.c.bf16 %v481_v37, %v481_v37  ;;  %v492_v44 = vpack.c.bf16 %v423_v40, %v423_v40 }
  0xca   : > { %v500_v45 = vpack.c.bf16 %v443_v41, %v443_v41  ;;  %540 = vst.msk [vmem:[%s890_s27 + $0x58] sm:$0xf] %vm517_vm2, %v507_v42 }
  0xcb   : > { %548 = vst.msk [vmem:[%s890_s27 + $0x78] sm:$0xf] %vm517_vm2, %v515_v43 }
  0xcc   : > { %525 = vst.msk [vmem:[%s890_s27 + $0x1c] sm:$0xf] %vm517_vm2, %v492_v44 }
  0xcd   : > { %533 = vst.msk [vmem:[%s890_s27 + $0x3c] sm:$0xf] %vm517_vm2, %v500_v45  ;;  %v462_v46 = vpop.f32.mrf.mxu2 }
  0xce   : > { %v482_v47 = vpop.f32.mrf.mxu3  ;;  %v463_v48 = vadd.f32 %v881_v18, %v462_v46 }
  0xcf   : > { %v483_v49 = vadd.f32 %v881_v18, %v482_v47 }
  0xd0   : > { %v508_v50 = vpack.c.bf16 %v463_v48, %v463_v48 }
  0xd1   : > { %v516_v51 = vpack.c.bf16 %v483_v49, %v483_v49 }
  0xd2   : > { %541 = vst.msk [vmem:[%s890_s27 + $0x5c] sm:$0xf] %vm517_vm2, %v508_v50 }
  0xd3   : > { %549 = vst.msk [vmem:[%s890_s27 + $0x7c] sm:$0xf] %vm517_vm2, %v516_v51 }
  0xd4 PF: > { %s13_s14 = sadd.s32 1, %s811_s14   ;;  %s999_s12 = smov %s807_s13 }
  0xd5   : > { %p10_p5 = scmp.ge.s32.totalorder %s13_s14, 4   ;;  %s1000_s13 = smov %s1002_s15 }
  0xd7   :  { %12 = sbr.rel (!%p10_p5) target bundleno = 2 (0x2), region = 68 }

// kernel: _lambda_.22
= control target key start
LH: loop header
LB: loop body
LE: loop exit
PB: predicated region body
PF: predicated region fallthrough
CT: control target
= control target key end

     0   :  { %vm80_vm0 = vcmask 1040384   ;;  %vm81_vm1 = vcmask 1041408   ;;  %v182_v1 = vmov 65535   ;;  %vm67_vm2 = vcmask 285696   ;;  %s259_s1 = inlined_call_operand.vmem [shape: bf16[35,16], index: 1, kind: input, shape index: {}]   ;;  %s260_s2 = inlined_call_operand.vmem [shape: f32[1,16], index: 2, kind: input, shape index: {}]   ;;  %s261_s0 = inlined_call_operand.vmem [shape: bf16[64,35], index: 0, kind: input, shape index: {}]   ;;  %s262_s3 = inlined_call_operand.vmem [shape: bf16[64,16], index: 3, kind: output, shape index: {}]  }
   0x1   :  { %v27_v0 = vld [vmem:[%s259_s1 + $0x10] sm:$0x3]  ;;  %v82_v2 = vsel %vm80_vm0, 4294967295, %v182_v1  ;;  %v170_v7 = vld [vmem:[%s259_s1 + $0x8] sm:$0xff]  ;;  %v169_v8 = vld [vmem:[%s259_s1] sm:$0xff]  ;;  %vm124_vm3 = vcmask 125952  }
   0x2   :  { %v61_v3 = vunpack.c.l.b16 %v27_v0  ;;  %v83_v4 = vsel %vm81_vm1, %v82_v2, 0  ;;  %v165_v9 = vld [vmem:[%s261_s0] sm:$0xff]  ;;  %v166_v10 = vld [vmem:[%s261_s0 + $0x8] sm:$0xff]  ;;  %v167_v11 = vld [vmem:[%s261_s0 + $0x10] sm:$0xff] }
   0x3   :  { %v168_v12 = vld [vmem:[%s261_s0 + $0x18] sm:$0xff]  ;;  %v181_v13 = vld [vmem:[%s260_s2] ss:$0 sm:$0xff] }
   0x4   :  { %v64_v5 = vpack.c.b16 %v61_v3, %v61_v3 }
   0x6   :  { %v85_v6 = vand.u32 %v83_v4, %v64_v5 }
   0x8   :  { %92 = vmatpush.bf16.msra.mxu0 %v85_v6  ;;  %171 = vmatpush.bf16.msra.mxu1 %v85_v6 }
   0x9   :  { %172 = vmatpush.bf16.msra.mxu2 %v85_v6  ;;  %173 = vmatpush.bf16.msra.mxu3 %v85_v6 }
   0xc   :  { %93 = vmatpush.bf16.msra.mxu0 %v170_v7  ;;  %174 = vmatpush.bf16.msra.mxu1 %v170_v7 }
   0xd   :  { %175 = vmatpush.bf16.msra.mxu2 %v170_v7  ;;  %176 = vmatpush.bf16.msra.mxu3 %v170_v7 }
  0x10   :  { %94 = vmatpush.bf16.msra.mxu0 %v169_v8  ;;  %177 = vmatpush.bf16.msra.mxu1 %v169_v8 }
  0x11   :  { %178 = vmatpush.bf16.msra.mxu2 %v169_v8  ;;  %179 = vmatpush.bf16.msra.mxu3 %v169_v8 }
  0x13   :  { %161 = vmatmul.msk.bf16.vlgmr.msra.gmra.mxu0 %vm67_vm2, %v165_v9  ;;  %162 = vmatmul.msk.bf16.vlgmr.msra.gmra.mxu1 %vm67_vm2, %v166_v10 }
  0x14   :  { %163 = vmatmul.msk.bf16.vlgmr.msra.gmra.mxu2 %vm67_vm2, %v167_v11  ;;  %164 = vmatmul.msk.bf16.vlgmr.msra.gmra.mxu3 %vm67_vm2, %v168_v12 }
  0x90   :  { %v96_v14 = vpop.f32.mrf.mxu0  ;;  %v101_v15 = vpop.f32.mrf.mxu1 }
  0x91   :  { %v97_v16 = vadd.f32 %v181_v13, %v96_v14  ;;  %v102_v17 = vadd.f32 %v181_v13, %v101_v15 }
  0x93   :  { %v116_v18 = vpack.c.bf16 %v97_v16, %v97_v16  ;;  %v118_v19 = vpack.c.bf16 %v102_v17, %v102_v17 }
  0x95   :  { %125 = vst.msk [vmem:[%s262_s3] sm:$0xf] %vm124_vm3, %v116_v18 }
  0x96   :  { %127 = vst.msk [vmem:[%s262_s3 + $0x8] sm:$0xf] %vm124_vm3, %v118_v19 }
  0x97   :  { %v106_v20 = vpop.f32.mrf.mxu2  ;;  %v111_v21 = vpop.f32.mrf.mxu3 }
  0x98   :  { %v107_v22 = vadd.f32 %v181_v13, %v106_v20  ;;  %v112_v23 = vadd.f32 %v181_v13, %v111_v21  ;;  %v98_v24 = vpop.f32.mrf.mxu0  ;;  %v103_v25 = vpop.f32.mrf.mxu1 }
  0x99   :  { %v99_v26 = vadd.f32 %v181_v13, %v98_v24  ;;  %v104_v27 = vadd.f32 %v181_v13, %v103_v25 }
  0x9a   :  { %v120_v28 = vpack.c.bf16 %v107_v22, %v107_v22  ;;  %v122_v29 = vpack.c.bf16 %v112_v23, %v112_v23 }
  0x9b   :  { %v117_v30 = vpack.c.bf16 %v99_v26, %v99_v26  ;;  %v119_v31 = vpack.c.bf16 %v104_v27, %v104_v27 }
  0x9c   :  { %129 = vst.msk [vmem:[%s262_s3 + $0x10] sm:$0xf] %vm124_vm3, %v120_v28 }
  0x9d   :  { %131 = vst.msk [vmem:[%s262_s3 + $0x18] sm:$0xf] %vm124_vm3, %v122_v29 }
  0x9e   :  { %126 = vst.msk [vmem:[%s262_s3 + $0x4] sm:$0xf] %vm124_vm3, %v117_v30 }
  0x9f   :  { %128 = vst.msk [vmem:[%s262_s3 + $0xc] sm:$0xf] %vm124_vm3, %v119_v31  ;;  %v108_v32 = vpop.f32.mrf.mxu2  ;;  %v113_v33 = vpop.f32.mrf.mxu3 }
  0xa0   :  { %v109_v34 = vadd.f32 %v181_v13, %v108_v32  ;;  %v114_v35 = vadd.f32 %v181_v13, %v113_v33 }
  0xa2   :  { %v121_v36 = vpack.c.bf16 %v109_v34, %v109_v34  ;;  %v123_v37 = vpack.c.bf16 %v114_v35, %v114_v35 }
  0xa4   :  { %130 = vst.msk [vmem:[%s262_s3 + $0x14] sm:$0xf] %vm124_vm3, %v121_v36 }
  0xa5   :  { %132 = vst.msk [vmem:[%s262_s3 + $0x1c] sm:$0xf] %vm124_vm3, %v123_v37 }

// kernel: _lambda_.23
= control target key start
LH: loop header
LB: loop body
LE: loop exit
PB: predicated region body
PF: predicated region fallthrough
CT: control target
= control target key end

     0   :  { %vm79_vm0 = vcmask 523264   ;;  %vm129_vm1 = vcmask 257024   ;;  %s278_s1 = inlined_call_operand.vmem [shape: bf16[64,32], index: 1, kind: input, shape index: {}]   ;;  %s279_s2 = inlined_call_operand.vmem [shape: f32[1,32], index: 2, kind: input, shape index: {}]   ;;  %s280_s0 = inlined_call_operand.vmem [shape: bf16[64,64], index: 0, kind: input, shape index: {}]   ;;  %s281_s3 = inlined_call_operand.vmem [shape: bf16[64,32], index: 3, kind: output, shape index: {}]  }
   0x1   :  { %v185_v0 = vld [vmem:[%s278_s1 + $0x18] sm:$0xff]  ;;  %v184_v1 = vld [vmem:[%s278_s1 + $0x10] sm:$0xff]  ;;  %v183_v2 = vld [vmem:[%s278_s1 + $0x8] sm:$0xff] }
   0x2   :  { %96 = vmatpush.bf16.msra.mxu0 %v185_v0  ;;  %186 = vmatpush.bf16.msra.mxu1 %v185_v0  ;;  %v182_v3 = vld [vmem:[%s278_s1] sm:$0xff]  ;;  %v179_v5 = vld [vmem:[%s280_s0 + $0x8] sm:$0xff]  ;;  %v180_v6 = vld [vmem:[%s280_s0 + $0x10] sm:$0xff] }
   0x3   :  { %187 = vmatpush.bf16.msra.mxu2 %v185_v0  ;;  %188 = vmatpush.bf16.msra.mxu3 %v185_v0  ;;  %v178_v4 = vld [vmem:[%s280_s0] sm:$0xff]  ;;  %v181_v7 = vld [vmem:[%s280_s0 + $0x18] sm:$0xff] }
   0x4   :  { %v198_v8 = vld [vmem:[%s279_s2] ss:$0 sm:$0xff] }
   0x6   :  { %97 = vmatpush.bf16.msra.mxu0 %v184_v1  ;;  %189 = vmatpush.bf16.msra.mxu1 %v184_v1 }
   0x7   :  { %190 = vmatpush.bf16.msra.mxu2 %v184_v1  ;;  %191 = vmatpush.bf16.msra.mxu3 %v184_v1 }
   0xa   :  { %98 = vmatpush.bf16.msra.mxu0 %v183_v2  ;;  %192 = vmatpush.bf16.msra.mxu1 %v183_v2 }
   0xb   :  { %193 = vmatpush.bf16.msra.mxu2 %v183_v2  ;;  %194 = vmatpush.bf16.msra.mxu3 %v183_v2 }
   0xe   :  { %99 = vmatpush.bf16.msra.mxu0 %v182_v3  ;;  %195 = vmatpush.bf16.msra.mxu1 %v182_v3 }
   0xf   :  { %196 = vmatpush.bf16.msra.mxu2 %v182_v3  ;;  %197 = vmatpush.bf16.msra.mxu3 %v182_v3 }
  0x11   :  { %174 = vmatmul.msk.bf16.vlgmr.msra.gmra.mxu0 %vm79_vm0, %v178_v4  ;;  %175 = vmatmul.msk.bf16.vlgmr.msra.gmra.mxu1 %vm79_vm0, %v179_v5 }
  0x12   :  { %176 = vmatmul.msk.bf16.vlgmr.msra.gmra.mxu2 %vm79_vm0, %v180_v6  ;;  %177 = vmatmul.msk.bf16.vlgmr.msra.gmra.mxu3 %vm79_vm0, %v181_v7 }
  0x8e   :  { %v101_v9 = vpop.f32.mrf.mxu0  ;;  %v106_v10 = vpop.f32.mrf.mxu1 }
  0x8f   :  { %v102_v11 = vadd.f32 %v198_v8, %v101_v9  ;;  %v107_v12 = vadd.f32 %v198_v8, %v106_v10 }
  0x91   :  { %v121_v13 = vpack.c.bf16 %v102_v11, %v102_v11  ;;  %v123_v14 = vpack.c.bf16 %v107_v12, %v107_v12 }
  0x93   :  { %130 = vst.msk [vmem:[%s281_s3] sm:$0xf] %vm129_vm1, %v121_v13 }
  0x94   :  { %132 = vst.msk [vmem:[%s281_s3 + $0x8] sm:$0xf] %vm129_vm1, %v123_v14 }
  0x95   :  { %v111_v15 = vpop.f32.mrf.mxu2  ;;  %v116_v16 = vpop.f32.mrf.mxu3 }
  0x96   :  { %v112_v17 = vadd.f32 %v198_v8, %v111_v15  ;;  %v117_v18 = vadd.f32 %v198_v8, %v116_v16  ;;  %v103_v19 = vpop.f32.mrf.mxu0  ;;  %v108_v20 = vpop.f32.mrf.mxu1 }
  0x97   :  { %v104_v21 = vadd.f32 %v198_v8, %v103_v19  ;;  %v109_v22 = vadd.f32 %v198_v8, %v108_v20 }
  0x98   :  { %v125_v23 = vpack.c.bf16 %v112_v17, %v112_v17  ;;  %v127_v24 = vpack.c.bf16 %v117_v18, %v117_v18 }
  0x99   :  { %v122_v25 = vpack.c.bf16 %v104_v21, %v104_v21  ;;  %v124_v26 = vpack.c.bf16 %v109_v22, %v109_v22 }
  0x9a   :  { %134 = vst.msk [vmem:[%s281_s3 + $0x10] sm:$0xf] %vm129_vm1, %v125_v23 }
  0x9b   :  { %136 = vst.msk [vmem:[%s281_s3 + $0x18] sm:$0xf] %vm129_vm1, %v127_v24 }
  0x9c   :  { %131 = vst.msk [vmem:[%s281_s3 + $0x4] sm:$0xf] %vm129_vm1, %v122_v25 }
  0x9d   :  { %133 = vst.msk [vmem:[%s281_s3 + $0xc] sm:$0xf] %vm129_vm1, %v124_v26  ;;  %v113_v27 = vpop.f32.mrf.mxu2  ;;  %v118_v28 = vpop.f32.mrf.mxu3 }
  0x9e   :  { %v114_v29 = vadd.f32 %v198_v8, %v113_v27  ;;  %v119_v30 = vadd.f32 %v198_v8, %v118_v28 }
  0xa0   :  { %v126_v31 = vpack.c.bf16 %v114_v29, %v114_v29  ;;  %v128_v32 = vpack.c.bf16 %v119_v30, %v119_v30 }
  0xa2   :  { %135 = vst.msk [vmem:[%s281_s3 + $0x14] sm:$0xf] %vm129_vm1, %v126_v31 }
  0xa3   :  { %137 = vst.msk [vmem:[%s281_s3 + $0x1c] sm:$0xf] %vm129_vm1, %v128_v32 }

// kernel: _lambda_.24
= control target key start
LH: loop header
LB: loop body
LE: loop exit
PB: predicated region body
PF: predicated region fallthrough
CT: control target
= control target key end

     0   :  { %vm63_vm0 = vcmask 261120   ;;  %vm121_vm1 = vcmask 60416   ;;  %s248_s1 = inlined_call_operand.vmem [shape: bf16[32,8], index: 1, kind: input, shape index: {}]   ;;  %s249_s2 = inlined_call_operand.vmem [shape: f32[1,8], index: 2, kind: input, shape index: {}]   ;;  %s250_s0 = inlined_call_operand.vmem [shape: bf16[64,32], index: 0, kind: input, shape index: {}]   ;;  %s251_s3 = inlined_call_operand.vmem [shape: bf16[64,8], index: 3, kind: output, shape index: {}]  }
   0x1   :  { %v167_v0 = vld [vmem:[%s248_s1 + $0x8] sm:$0xff]  ;;  %v166_v1 = vld [vmem:[%s248_s1] sm:$0xff]  ;;  %v164_v4 = vld [vmem:[%s250_s0 + $0x10] sm:$0xff] }
   0x2   :  { %82 = vmatpush.bf16.msra.mxu0 %v167_v0  ;;  %168 = vmatpush.bf16.msra.mxu1 %v167_v0  ;;  %v162_v2 = vld [vmem:[%s250_s0] sm:$0xff]  ;;  %v163_v3 = vld [vmem:[%s250_s0 + $0x8] sm:$0xff]  ;;  %v165_v5 = vld [vmem:[%s250_s0 + $0x18] sm:$0xff] }
   0x3   :  { %169 = vmatpush.bf16.msra.mxu2 %v167_v0  ;;  %170 = vmatpush.bf16.msra.mxu3 %v167_v0  ;;  %v174_v6 = vld [vmem:[%s249_s2] ss:$0 sm:$0xff] }
   0x6   :  { %83 = vmatpush.bf16.msra.mxu0 %v166_v1  ;;  %171 = vmatpush.bf16.msra.mxu1 %v166_v1 }
   0x7   :  { %172 = vmatpush.bf16.msra.mxu2 %v166_v1  ;;  %173 = vmatpush.bf16.msra.mxu3 %v166_v1 }
   0x9   :  { %158 = vmatmul.msk.bf16.vlgmr.msra.gmra.mxu0 %vm63_vm0, %v162_v2  ;;  %159 = vmatmul.msk.bf16.vlgmr.msra.gmra.mxu1 %vm63_vm0, %v163_v3 }
   0xa   :  { %160 = vmatmul.msk.bf16.vlgmr.msra.gmra.mxu2 %vm63_vm0, %v164_v4  ;;  %161 = vmatmul.msk.bf16.vlgmr.msra.gmra.mxu3 %vm63_vm0, %v165_v5 }
  0x86   :  { %v85_v7 = vpop.f32.mrf.mxu0  ;;  %v90_v8 = vpop.f32.mrf.mxu1 }
  0x87   :  { %v86_v9 = vadd.f32 %v174_v6, %v85_v7  ;;  %v91_v10 = vadd.f32 %v174_v6, %v90_v8 }
  0x89   :  { %v105_v11 = vmax.f32 %v86_v9, 0.0  ;;  %v107_v12 = vmax.f32 %v91_v10, 0.0 }
  0x8b   :  { %v113_v13 = vpack.c.bf16 %v105_v11, %v105_v11  ;;  %v115_v14 = vpack.c.bf16 %v107_v12, %v107_v12 }
  0x8d   :  { %122 = vst.msk [vmem:[%s251_s3] sm:$0xf] %vm121_vm1, %v113_v13  ;;  %v95_v15 = vpop.f32.mrf.mxu2  ;;  %v100_v16 = vpop.f32.mrf.mxu3 }
  0x8e   :  { %124 = vst.msk [vmem:[%s251_s3 + $0x8] sm:$0xf] %vm121_vm1, %v115_v14  ;;  %v96_v17 = vadd.f32 %v174_v6, %v95_v15  ;;  %v101_v18 = vadd.f32 %v174_v6, %v100_v16  ;;  %v87_v19 = vpop.f32.mrf.mxu0  ;;  %v92_v20 = vpop.f32.mrf.mxu1 }
  0x8f   :  { %v88_v21 = vadd.f32 %v174_v6, %v87_v19  ;;  %v93_v22 = vadd.f32 %v174_v6, %v92_v20 }
  0x90   :  { %v109_v23 = vmax.f32 %v96_v17, 0.0  ;;  %v111_v24 = vmax.f32 %v101_v18, 0.0 }
  0x91   :  { %v106_v25 = vmax.f32 %v88_v21, 0.0  ;;  %v108_v26 = vmax.f32 %v93_v22, 0.0 }
  0x92   :  { %v117_v27 = vpack.c.bf16 %v109_v23, %v109_v23  ;;  %v119_v28 = vpack.c.bf16 %v111_v24, %v111_v24 }
  0x93   :  { %v114_v29 = vpack.c.bf16 %v106_v25, %v106_v25  ;;  %v116_v30 = vpack.c.bf16 %v108_v26, %v108_v26 }
  0x94   :  { %126 = vst.msk [vmem:[%s251_s3 + $0x10] sm:$0xf] %vm121_vm1, %v117_v27 }
  0x95   :  { %128 = vst.msk [vmem:[%s251_s3 + $0x18] sm:$0xf] %vm121_vm1, %v119_v28  ;;  %v97_v31 = vpop.f32.mrf.mxu2  ;;  %v102_v32 = vpop.f32.mrf.mxu3 }
  0x96   :  { %123 = vst.msk [vmem:[%s251_s3 + $0x4] sm:$0xf] %vm121_vm1, %v114_v29  ;;  %v98_v33 = vadd.f32 %v174_v6, %v97_v31  ;;  %v103_v34 = vadd.f32 %v174_v6, %v102_v32 }
  0x97   :  { %125 = vst.msk [vmem:[%s251_s3 + $0xc] sm:$0xf] %vm121_vm1, %v116_v30 }
  0x98   :  { %v110_v35 = vmax.f32 %v98_v33, 0.0  ;;  %v112_v36 = vmax.f32 %v103_v34, 0.0 }
  0x9a   :  { %v118_v37 = vpack.c.bf16 %v110_v35, %v110_v35  ;;  %v120_v38 = vpack.c.bf16 %v112_v36, %v112_v36 }
  0x9c   :  { %127 = vst.msk [vmem:[%s251_s3 + $0x14] sm:$0xf] %vm121_vm1, %v118_v37 }
  0x9d   :  { %129 = vst.msk [vmem:[%s251_s3 + $0x1c] sm:$0xf] %vm121_vm1, %v120_v38 }

// kernel: custom-call.33
= control target key start
LH: loop header
LB: loop body
LE: loop exit
PB: predicated region body
PF: predicated region fallthrough
CT: control target
= control target key end

     0   :  { %s6_s0 = inlined_call_operand.vmem [shape: f32[2,32], index: 0, kind: output, shape index: {}]  }

// kernel: _lambda_.25
= control target key start
LH: loop header
LB: loop body
LE: loop exit
PB: predicated region body
PF: predicated region fallthrough
CT: control target
= control target key end

     0   :  { %vm61_vm0 = vcmask 1043456   ;;  %vm48_vm1 = vcmask 64512   ;;  %vm102_vm2 = vcmask 257024   ;;  %s213_s1 = inlined_call_operand.vmem [shape: bf16[8,32], index: 1, kind: input, shape index: {}]   ;;  %s214_s0 = inlined_call_operand.vmem [shape: bf16[64,8], index: 0, kind: input, shape index: {}]   ;;  %s215_s2 = inlined_call_operand.vmem [shape: f32[1,32], index: 2, kind: input, shape index: {}]   ;;  %s216_s3 = inlined_call_operand.vmem [shape: bf16[64,32], index: 3, kind: output, shape index: {}]  }
   0x1   :  { %v23_v0 = vld [vmem:[%s213_s1] sm:$0xf]  ;;  %v136_v3 = vld [vmem:[%s214_s0 + $0x8] sm:$0xff]  ;;  %v137_v4 = vld [vmem:[%s214_s0 + $0x10] sm:$0xff] }
   0x2   :  { %v63_v1 = vsel %vm61_vm0, %v23_v0, 0  ;;  %v135_v2 = vld [vmem:[%s214_s0] sm:$0xff]  ;;  %v138_v5 = vld [vmem:[%s214_s0 + $0x18] sm:$0xff] }
   0x3   :  { %72 = vmatpush.bf16.msra.mxu0 %v63_v1  ;;  %139 = vmatpush.bf16.msra.mxu1 %v63_v1  ;;  %v142_v6 = vld [vmem:[%s215_s2] ss:$0 sm:$0xff] }
   0x4   :  { %140 = vmatpush.bf16.msra.mxu2 %v63_v1  ;;  %141 = vmatpush.bf16.msra.mxu3 %v63_v1 }
   0x6   :  { %131 = vmatmul.msk.bf16.vlgmr.msra.gmra.mxu0 %vm48_vm1, %v135_v2  ;;  %132 = vmatmul.msk.bf16.vlgmr.msra.gmra.mxu1 %vm48_vm1, %v136_v3 }
   0x7   :  { %133 = vmatmul.msk.bf16.vlgmr.msra.gmra.mxu2 %vm48_vm1, %v137_v4  ;;  %134 = vmatmul.msk.bf16.vlgmr.msra.gmra.mxu3 %vm48_vm1, %v138_v5 }
  0x83   :  { %v74_v7 = vpop.f32.mrf.mxu0  ;;  %v79_v8 = vpop.f32.mrf.mxu1 }
  0x84   :  { %v75_v9 = vadd.f32 %v142_v6, %v74_v7  ;;  %v80_v10 = vadd.f32 %v142_v6, %v79_v8 }
  0x86   :  { %v94_v11 = vpack.c.bf16 %v75_v9, %v75_v9  ;;  %v96_v12 = vpack.c.bf16 %v80_v10, %v80_v10 }
  0x88   :  { %103 = vst.msk [vmem:[%s216_s3] sm:$0xf] %vm102_vm2, %v94_v11 }
  0x89   :  { %105 = vst.msk [vmem:[%s216_s3 + $0x8] sm:$0xf] %vm102_vm2, %v96_v12 }
  0x8a   :  { %v84_v13 = vpop.f32.mrf.mxu2  ;;  %v89_v14 = vpop.f32.mrf.mxu3 }
  0x8b   :  { %v85_v15 = vadd.f32 %v142_v6, %v84_v13  ;;  %v90_v16 = vadd.f32 %v142_v6, %v89_v14  ;;  %v76_v17 = vpop.f32.mrf.mxu0  ;;  %v81_v18 = vpop.f32.mrf.mxu1 }
  0x8c   :  { %v77_v19 = vadd.f32 %v142_v6, %v76_v17  ;;  %v82_v20 = vadd.f32 %v142_v6, %v81_v18 }
  0x8d   :  { %v98_v21 = vpack.c.bf16 %v85_v15, %v85_v15  ;;  %v100_v22 = vpack.c.bf16 %v90_v16, %v90_v16 }
  0x8e   :  { %v95_v23 = vpack.c.bf16 %v77_v19, %v77_v19  ;;  %v97_v24 = vpack.c.bf16 %v82_v20, %v82_v20 }
  0x8f   :  { %107 = vst.msk [vmem:[%s216_s3 + $0x10] sm:$0xf] %vm102_vm2, %v98_v21 }
  0x90   :  { %109 = vst.msk [vmem:[%s216_s3 + $0x18] sm:$0xf] %vm102_vm2, %v100_v22 }
  0x91   :  { %104 = vst.msk [vmem:[%s216_s3 + $0x4] sm:$0xf] %vm102_vm2, %v95_v23 }
  0x92   :  { %106 = vst.msk [vmem:[%s216_s3 + $0xc] sm:$0xf] %vm102_vm2, %v97_v24  ;;  %v86_v25 = vpop.f32.mrf.mxu2  ;;  %v91_v26 = vpop.f32.mrf.mxu3 }
  0x93   :  { %v87_v27 = vadd.f32 %v142_v6, %v86_v25  ;;  %v92_v28 = vadd.f32 %v142_v6, %v91_v26 }
  0x95   :  { %v99_v29 = vpack.c.bf16 %v87_v27, %v87_v27  ;;  %v101_v30 = vpack.c.bf16 %v92_v28, %v92_v28 }
  0x97   :  { %108 = vst.msk [vmem:[%s216_s3 + $0x14] sm:$0xf] %vm102_vm2, %v99_v29 }
  0x98   :  { %110 = vst.msk [vmem:[%s216_s3 + $0x1c] sm:$0xf] %vm102_vm2, %v101_v30 }

// kernel: _lambda_.27
= control target key start
LH: loop header
LB: loop body
LE: loop exit
PB: predicated region body
PF: predicated region fallthrough
CT: control target
= control target key end

     0   :  { %vm163_vm0 = vcmask 523264   ;;  %vm365_vm1 = vcmask 125952   ;;  %s792_s1 = inlined_call_operand.vmem [shape: bf16[64,16], index: 1, kind: input, shape index: {}]   ;;  %s793_s2 = inlined_call_operand.vmem [shape: f32[1,16], index: 2, kind: input, shape index: {}]   ;;  %s794_s0 = inlined_call_operand.vmem [shape: bf16[256,64], index: 0, kind: input, shape index: {}]   ;;  %s795_s3 = inlined_call_operand.vmem [shape: bf16[256,16], index: 3, kind: output, shape index: {}]  }
   0x1   :  { %v517_v0 = vld [vmem:[%s792_s1 + $0x18] sm:$0xff]  ;;  %v516_v1 = vld [vmem:[%s792_s1 + $0x10] sm:$0xff]  ;;  %v515_v2 = vld [vmem:[%s792_s1 + $0x8] sm:$0xff] }
   0x2   :  { %216 = vmatpush.bf16.msra.mxu0 %v517_v0  ;;  %518 = vmatpush.bf16.msra.mxu1 %v517_v0  ;;  %v514_v3 = vld [vmem:[%s792_s1] sm:$0xff]  ;;  %v499_v8 = vld [vmem:[%s794_s0 + $0x8] sm:$0xff]  ;;  %v500_v12 = vld [vmem:[%s794_s0 + $0x10] sm:$0xff] }
   0x3   :  { %519 = vmatpush.bf16.msra.mxu2 %v517_v0  ;;  %520 = vmatpush.bf16.msra.mxu3 %v517_v0  ;;  %v498_v4 = vld [vmem:[%s794_s0] sm:$0xff]  ;;  %v503_v9 = vld [vmem:[%s794_s0 + $0x28] sm:$0xff]  ;;  %v504_v13 = vld [vmem:[%s794_s0 + $0x30] sm:$0xff] }
   0x4   :  { %v502_v5 = vld [vmem:[%s794_s0 + $0x20] sm:$0xff]  ;;  %v507_v10 = vld [vmem:[%s794_s0 + $0x48] sm:$0xff]  ;;  %v508_v14 = vld [vmem:[%s794_s0 + $0x50] sm:$0xff] }
   0x5   :  { %v506_v6 = vld [vmem:[%s794_s0 + $0x40] sm:$0xff]  ;;  %v511_v11 = vld [vmem:[%s794_s0 + $0x68] sm:$0xff]  ;;  %v512_v15 = vld [vmem:[%s794_s0 + $0x70] sm:$0xff] }
   0x6   :  { %217 = vmatpush.bf16.msra.mxu0 %v516_v1  ;;  %521 = vmatpush.bf16.msra.mxu1 %v516_v1  ;;  %v510_v7 = vld [vmem:[%s794_s0 + $0x60] sm:$0xff]  ;;  %v501_v16 = vld [vmem:[%s794_s0 + $0x18] sm:$0xff] }
   0x7   :  { %522 = vmatpush.bf16.msra.mxu2 %v516_v1  ;;  %523 = vmatpush.bf16.msra.mxu3 %v516_v1  ;;  %v505_v17 = vld [vmem:[%s794_s0 + $0x38] sm:$0xff]  ;;  %v630_v20 = vld [vmem:[%s793_s2] ss:$0 sm:$0xff] }
   0x8   :  { %v509_v18 = vld [vmem:[%s794_s0 + $0x58] sm:$0xff] }
   0x9   :  { %v513_v19 = vld [vmem:[%s794_s0 + $0x78] sm:$0xff] }
   0xa   :  { %218 = vmatpush.bf16.msra.mxu0 %v515_v2  ;;  %524 = vmatpush.bf16.msra.mxu1 %v515_v2 }
   0xb   :  { %525 = vmatpush.bf16.msra.mxu2 %v515_v2  ;;  %526 = vmatpush.bf16.msra.mxu3 %v515_v2 }
   0xe   :  { %219 = vmatpush.bf16.msra.mxu0 %v514_v3  ;;  %527 = vmatpush.bf16.msra.mxu1 %v514_v3 }
   0xf   :  { %528 = vmatpush.bf16.msra.mxu2 %v514_v3  ;;  %529 = vmatpush.bf16.msra.mxu3 %v514_v3 }
  0x11   :  { %482 = vmatmul.msk.bf16.vlgmr.msra.gmra.mxu0 %vm163_vm0, %v498_v4  ;;  %486 = vmatmul.msk.bf16.vlgmr.msra.gmra.mxu1 %vm163_vm0, %v502_v5 }
  0x12   :  { %490 = vmatmul.msk.bf16.vlgmr.msra.gmra.mxu2 %vm163_vm0, %v506_v6  ;;  %494 = vmatmul.msk.bf16.vlgmr.msra.gmra.mxu3 %vm163_vm0, %v510_v7 }
  0x21   :  { %483 = vmatmul.msk.bf16.gmra.mxu0 %vm163_vm0, %v499_v8  ;;  %487 = vmatmul.msk.bf16.gmra.mxu1 %vm163_vm0, %v503_v9 }
  0x22   :  { %491 = vmatmul.msk.bf16.gmra.mxu2 %vm163_vm0, %v507_v10  ;;  %495 = vmatmul.msk.bf16.gmra.mxu3 %vm163_vm0, %v511_v11 }
  0x31   :  { %484 = vmatmul.msk.bf16.gmra.mxu0 %vm163_vm0, %v500_v12  ;;  %488 = vmatmul.msk.bf16.gmra.mxu1 %vm163_vm0, %v504_v13 }
  0x32   :  { %492 = vmatmul.msk.bf16.gmra.mxu2 %vm163_vm0, %v508_v14  ;;  %496 = vmatmul.msk.bf16.gmra.mxu3 %vm163_vm0, %v512_v15 }
  0x41   :  { %485 = vmatmul.msk.bf16.gmra.mxu0 %vm163_vm0, %v501_v16  ;;  %489 = vmatmul.msk.bf16.gmra.mxu1 %vm163_vm0, %v505_v17 }
  0x42   :  { %493 = vmatmul.msk.bf16.gmra.mxu2 %vm163_vm0, %v509_v18  ;;  %497 = vmatmul.msk.bf16.gmra.mxu3 %vm163_vm0, %v513_v19 }
  0x8e   :  { %v221_v21 = vpop.f32.mrf.mxu0  ;;  %v241_v22 = vpop.f32.mrf.mxu1 }
  0x8f   :  { %v222_v23 = vadd.f32 %v630_v20, %v221_v21  ;;  %v242_v24 = vadd.f32 %v630_v20, %v241_v22 }
  0x91   :  { %v301_v25 = vmax.f32 %v222_v23, 0.0  ;;  %v309_v26 = vmax.f32 %v242_v24, 0.0 }
  0x93   :  { %v333_v27 = vpack.c.bf16 %v301_v25, %v301_v25  ;;  %v341_v28 = vpack.c.bf16 %v309_v26, %v309_v26 }
  0x95   :  { %366 = vst.msk [vmem:[%s795_s3] sm:$0xf] %vm365_vm1, %v333_v27  ;;  %v261_v29 = vpop.f32.mrf.mxu2  ;;  %v281_v30 = vpop.f32.mrf.mxu3 }
  0x96   :  { %374 = vst.msk [vmem:[%s795_s3 + $0x20] sm:$0xf] %vm365_vm1, %v341_v28  ;;  %v262_v31 = vadd.f32 %v630_v20, %v261_v29  ;;  %v282_v32 = vadd.f32 %v630_v20, %v281_v30  ;;  %v223_v33 = vpop.f32.mrf.mxu0  ;;  %v243_v34 = vpop.f32.mrf.mxu1 }
  0x97   :  { %v224_v35 = vadd.f32 %v630_v20, %v223_v33  ;;  %v244_v36 = vadd.f32 %v630_v20, %v243_v34 }
  0x98   :  { %v317_v37 = vmax.f32 %v262_v31, 0.0  ;;  %v325_v38 = vmax.f32 %v282_v32, 0.0 }
  0x99   :  { %v302_v39 = vmax.f32 %v224_v35, 0.0  ;;  %v310_v40 = vmax.f32 %v244_v36, 0.0 }
  0x9a   :  { %v349_v41 = vpack.c.bf16 %v317_v37, %v317_v37  ;;  %v357_v42 = vpack.c.bf16 %v325_v38, %v325_v38 }
  0x9b   :  { %v334_v43 = vpack.c.bf16 %v302_v39, %v302_v39  ;;  %v342_v44 = vpack.c.bf16 %v310_v40, %v310_v40 }
  0x9c   :  { %382 = vst.msk [vmem:[%s795_s3 + $0x40] sm:$0xf] %vm365_vm1, %v349_v41 }
  0x9d   :  { %390 = vst.msk [vmem:[%s795_s3 + $0x60] sm:$0xf] %vm365_vm1, %v357_v42  ;;  %v263_v45 = vpop.f32.mrf.mxu2  ;;  %v283_v46 = vpop.f32.mrf.mxu3 }
  0x9e   :  { %367 = vst.msk [vmem:[%s795_s3 + $0x4] sm:$0xf] %vm365_vm1, %v334_v43  ;;  %v264_v47 = vadd.f32 %v630_v20, %v263_v45  ;;  %v284_v48 = vadd.f32 %v630_v20, %v283_v46  ;;  %v226_v49 = vpop.f32.mrf.mxu0  ;;  %v246_v50 = vpop.f32.mrf.mxu1 }
  0x9f   :  { %375 = vst.msk [vmem:[%s795_s3 + $0x24] sm:$0xf] %vm365_vm1, %v342_v44  ;;  %v227_v51 = vadd.f32 %v630_v20, %v226_v49  ;;  %v247_v52 = vadd.f32 %v630_v20, %v246_v50 }
  0xa0   :  { %v318_v53 = vmax.f32 %v264_v47, 0.0  ;;  %v326_v54 = vmax.f32 %v284_v48, 0.0 }
  0xa1   :  { %v303_v55 = vmax.f32 %v227_v51, 0.0  ;;  %v311_v56 = vmax.f32 %v247_v52, 0.0 }
  0xa2   :  { %v350_v57 = vpack.c.bf16 %v318_v53, %v318_v53  ;;  %v358_v58 = vpack.c.bf16 %v326_v54, %v326_v54 }
  0xa3   :  { %v335_v59 = vpack.c.bf16 %v303_v55, %v303_v55  ;;  %v343_v60 = vpack.c.bf16 %v311_v56, %v311_v56 }
  0xa4   :  { %383 = vst.msk [vmem:[%s795_s3 + $0x44] sm:$0xf] %vm365_vm1, %v350_v57 }
  0xa5   :  { %391 = vst.msk [vmem:[%s795_s3 + $0x64] sm:$0xf] %vm365_vm1, %v358_v58  ;;  %v266_v61 = vpop.f32.mrf.mxu2  ;;  %v286_v62 = vpop.f32.mrf.mxu3 }
  0xa6   :  { %368 = vst.msk [vmem:[%s795_s3 + $0x8] sm:$0xf] %vm365_vm1, %v335_v59  ;;  %v267_v63 = vadd.f32 %v630_v20, %v266_v61  ;;  %v287_v0 = vadd.f32 %v630_v20, %v286_v62  ;;  %v228_v1 = vpop.f32.mrf.mxu0  ;;  %v248_v2 = vpop.f32.mrf.mxu1 }
  0xa7   :  { %376 = vst.msk [vmem:[%s795_s3 + $0x28] sm:$0xf] %vm365_vm1, %v343_v60  ;;  %v229_v3 = vadd.f32 %v630_v20, %v228_v1  ;;  %v249_v4 = vadd.f32 %v630_v20, %v248_v2 }
  0xa8   :  { %v319_v5 = vmax.f32 %v267_v63, 0.0  ;;  %v327_v6 = vmax.f32 %v287_v0, 0.0 }
  0xa9   :  { %v304_v7 = vmax.f32 %v229_v3, 0.0  ;;  %v312_v8 = vmax.f32 %v249_v4, 0.0 }
  0xaa   :  { %v351_v9 = vpack.c.bf16 %v319_v5, %v319_v5  ;;  %v359_v10 = vpack.c.bf16 %v327_v6, %v327_v6 }
  0xab   :  { %v336_v11 = vpack.c.bf16 %v304_v7, %v304_v7  ;;  %v344_v12 = vpack.c.bf16 %v312_v8, %v312_v8 }
  0xac   :  { %384 = vst.msk [vmem:[%s795_s3 + $0x48] sm:$0xf] %vm365_vm1, %v351_v9 }
  0xad   :  { %392 = vst.msk [vmem:[%s795_s3 + $0x68] sm:$0xf] %vm365_vm1, %v359_v10  ;;  %v268_v13 = vpop.f32.mrf.mxu2  ;;  %v288_v14 = vpop.f32.mrf.mxu3 }
  0xae   :  { %369 = vst.msk [vmem:[%s795_s3 + $0xc] sm:$0xf] %vm365_vm1, %v336_v11  ;;  %v269_v15 = vadd.f32 %v630_v20, %v268_v13  ;;  %v289_v16 = vadd.f32 %v630_v20, %v288_v14  ;;  %v231_v17 = vpop.f32.mrf.mxu0  ;;  %v251_v18 = vpop.f32.mrf.mxu1 }
  0xaf   :  { %377 = vst.msk [vmem:[%s795_s3 + $0x2c] sm:$0xf] %vm365_vm1, %v344_v12  ;;  %v232_v19 = vadd.f32 %v630_v20, %v231_v17  ;;  %v252_v21 = vadd.f32 %v630_v20, %v251_v18 }
  0xb0   :  { %v320_v22 = vmax.f32 %v269_v15, 0.0  ;;  %v328_v23 = vmax.f32 %v289_v16, 0.0 }
  0xb1   :  { %v305_v24 = vmax.f32 %v232_v19, 0.0  ;;  %v313_v25 = vmax.f32 %v252_v21, 0.0 }
  0xb2   :  { %v352_v26 = vpack.c.bf16 %v320_v22, %v320_v22  ;;  %v360_v27 = vpack.c.bf16 %v328_v23, %v328_v23 }
  0xb3   :  { %v337_v28 = vpack.c.bf16 %v305_v24, %v305_v24  ;;  %v345_v29 = vpack.c.bf16 %v313_v25, %v313_v25 }
  0xb4   :  { %385 = vst.msk [vmem:[%s795_s3 + $0x4c] sm:$0xf] %vm365_vm1, %v352_v26 }
  0xb5   :  { %393 = vst.msk [vmem:[%s795_s3 + $0x6c] sm:$0xf] %vm365_vm1, %v360_v27  ;;  %v271_v30 = vpop.f32.mrf.mxu2  ;;  %v291_v31 = vpop.f32.mrf.mxu3 }
  0xb6   :  { %370 = vst.msk [vmem:[%s795_s3 + $0x10] sm:$0xf] %vm365_vm1, %v337_v28  ;;  %v272_v32 = vadd.f32 %v630_v20, %v271_v30  ;;  %v292_v33 = vadd.f32 %v630_v20, %v291_v31  ;;  %v233_v34 = vpop.f32.mrf.mxu0  ;;  %v253_v35 = vpop.f32.mrf.mxu1 }
  0xb7   :  { %378 = vst.msk [vmem:[%s795_s3 + $0x30] sm:$0xf] %vm365_vm1, %v345_v29  ;;  %v234_v36 = vadd.f32 %v630_v20, %v233_v34  ;;  %v254_v37 = vadd.f32 %v630_v20, %v253_v35 }
  0xb8   :  { %v321_v38 = vmax.f32 %v272_v32, 0.0  ;;  %v329_v39 = vmax.f32 %v292_v33, 0.0 }
  0xb9   :  { %v306_v40 = vmax.f32 %v234_v36, 0.0  ;;  %v314_v41 = vmax.f32 %v254_v37, 0.0 }
  0xba   :  { %v353_v42 = vpack.c.bf16 %v321_v38, %v321_v38  ;;  %v361_v43 = vpack.c.bf16 %v329_v39, %v329_v39 }
  0xbb   :  { %v338_v44 = vpack.c.bf16 %v306_v40, %v306_v40  ;;  %v346_v45 = vpack.c.bf16 %v314_v41, %v314_v41 }
  0xbc   :  { %386 = vst.msk [vmem:[%s795_s3 + $0x50] sm:$0xf] %vm365_vm1, %v353_v42 }
  0xbd   :  { %394 = vst.msk [vmem:[%s795_s3 + $0x70] sm:$0xf] %vm365_vm1, %v361_v43  ;;  %v273_v46 = vpop.f32.mrf.mxu2  ;;  %v293_v47 = vpop.f32.mrf.mxu3 }
  0xbe   :  { %371 = vst.msk [vmem:[%s795_s3 + $0x14] sm:$0xf] %vm365_vm1, %v338_v44  ;;  %v274_v48 = vadd.f32 %v630_v20, %v273_v46  ;;  %v294_v49 = vadd.f32 %v630_v20, %v293_v47  ;;  %v236_v50 = vpop.f32.mrf.mxu0  ;;  %v256_v51 = vpop.f32.mrf.mxu1 }
  0xbf   :  { %379 = vst.msk [vmem:[%s795_s3 + $0x34] sm:$0xf] %vm365_vm1, %v346_v45  ;;  %v237_v52 = vadd.f32 %v630_v20, %v236_v50  ;;  %v257_v53 = vadd.f32 %v630_v20, %v256_v51 }
  0xc0   :  { %v322_v54 = vmax.f32 %v274_v48, 0.0  ;;  %v330_v55 = vmax.f32 %v294_v49, 0.0 }
  0xc1   :  { %v307_v56 = vmax.f32 %v237_v52, 0.0  ;;  %v315_v57 = vmax.f32 %v257_v53, 0.0 }
  0xc2   :  { %v354_v58 = vpack.c.bf16 %v322_v54, %v322_v54  ;;  %v362_v59 = vpack.c.bf16 %v330_v55, %v330_v55 }
  0xc3   :  { %v339_v60 = vpack.c.bf16 %v307_v56, %v307_v56  ;;  %v347_v61 = vpack.c.bf16 %v315_v57, %v315_v57 }
  0xc4   :  { %387 = vst.msk [vmem:[%s795_s3 + $0x54] sm:$0xf] %vm365_vm1, %v354_v58 }
  0xc5   :  { %395 = vst.msk [vmem:[%s795_s3 + $0x74] sm:$0xf] %vm365_vm1, %v362_v59  ;;  %v276_v62 = vpop.f32.mrf.mxu2  ;;  %v296_v63 = vpop.f32.mrf.mxu3 }
  0xc6   :  { %372 = vst.msk [vmem:[%s795_s3 + $0x18] sm:$0xf] %vm365_vm1, %v339_v60  ;;  %v277_v0 = vadd.f32 %v630_v20, %v276_v62  ;;  %v297_v1 = vadd.f32 %v630_v20, %v296_v63  ;;  %v238_v2 = vpop.f32.mrf.mxu0  ;;  %v258_v3 = vpop.f32.mrf.mxu1 }
  0xc7   :  { %380 = vst.msk [vmem:[%s795_s3 + $0x38] sm:$0xf] %vm365_vm1, %v347_v61  ;;  %v239_v4 = vadd.f32 %v630_v20, %v238_v2  ;;  %v259_v5 = vadd.f32 %v630_v20, %v258_v3 }
  0xc8   :  { %v323_v6 = vmax.f32 %v277_v0, 0.0  ;;  %v331_v7 = vmax.f32 %v297_v1, 0.0 }
  0xc9   :  { %v308_v8 = vmax.f32 %v239_v4, 0.0  ;;  %v316_v9 = vmax.f32 %v259_v5, 0.0 }
  0xca   :  { %v355_v10 = vpack.c.bf16 %v323_v6, %v323_v6  ;;  %v363_v11 = vpack.c.bf16 %v331_v7, %v331_v7 }
  0xcb   :  { %v340_v12 = vpack.c.bf16 %v308_v8, %v308_v8  ;;  %v348_v13 = vpack.c.bf16 %v316_v9, %v316_v9 }
  0xcc   :  { %388 = vst.msk [vmem:[%s795_s3 + $0x58] sm:$0xf] %vm365_vm1, %v355_v10 }
  0xcd   :  { %396 = vst.msk [vmem:[%s795_s3 + $0x78] sm:$0xf] %vm365_vm1, %v363_v11  ;;  %v278_v14 = vpop.f32.mrf.mxu2  ;;  %v298_v15 = vpop.f32.mrf.mxu3 }
  0xce   :  { %373 = vst.msk [vmem:[%s795_s3 + $0x1c] sm:$0xf] %vm365_vm1, %v340_v12  ;;  %v279_v16 = vadd.f32 %v630_v20, %v278_v14  ;;  %v299_v17 = vadd.f32 %v630_v20, %v298_v15 }
  0xcf   :  { %381 = vst.msk [vmem:[%s795_s3 + $0x3c] sm:$0xf] %vm365_vm1, %v348_v13 }
  0xd0   :  { %v324_v18 = vmax.f32 %v279_v16, 0.0  ;;  %v332_v19 = vmax.f32 %v299_v17, 0.0 }
  0xd2   :  { %v356_v21 = vpack.c.bf16 %v324_v18, %v324_v18  ;;  %v364_v22 = vpack.c.bf16 %v332_v19, %v332_v19 }
  0xd4   :  { %389 = vst.msk [vmem:[%s795_s3 + $0x5c] sm:$0xf] %vm365_vm1, %v356_v21 }
  0xd5   :  { %397 = vst.msk [vmem:[%s795_s3 + $0x7c] sm:$0xf] %vm365_vm1, %v364_v22 }

// kernel: _lambda_.26
= control target key start
LH: loop header
LB: loop body
LE: loop exit
PB: predicated region body
PF: predicated region fallthrough
CT: control target
= control target key end

     0   :  { %vm216_vm0 = vcmask 1040384   ;;  %vm217_vm1 = vcmask 1041408   ;;  %v546_v1 = vmov 65535   ;;  %vm167_vm2 = vcmask 547840   ;;  %s811_s1 = inlined_call_operand.vmem [shape: bf16[67,64], index: 1, kind: input, shape index: {}]   ;;  %s812_s2 = inlined_call_operand.vmem [shape: f32[1,64], index: 2, kind: input, shape index: {}]   ;;  %s813_s0 = inlined_call_operand.vmem [shape: bf16[256,67], index: 0, kind: input, shape index: {}]   ;;  %s814_s3 = inlined_call_operand.vmem [shape: bf16[256,64], index: 3, kind: output, shape index: {}]  }
   0x1   :  { %v55_v0 = vld [vmem:[%s811_s1 + $0x20] sm:$0x3]  ;;  %v218_v2 = vsel %vm216_vm0, 4294967295, %v546_v1  ;;  %v528_v7 = vld [vmem:[%s811_s1 + $0x18] sm:$0xff]  ;;  %v527_v8 = vld [vmem:[%s811_s1 + $0x10] sm:$0xff]  ;;  %vm376_vm3 = vcmask 519168  }
   0x2   :  { %v157_v3 = vunpack.c.l.b16 %v55_v0  ;;  %v219_v4 = vsel %vm217_vm1, %v218_v2, 0  ;;  %v526_v9 = vld [vmem:[%s811_s1 + $0x8] sm:$0xff]  ;;  %v525_v10 = vld [vmem:[%s811_s1] sm:$0xff]  ;;  %v511_v19 = vld [vmem:[%s813_s0 + $0x10] sm:$0xff] }
   0x3   :  { %v509_v11 = vld [vmem:[%s813_s0] sm:$0xff]  ;;  %v510_v15 = vld [vmem:[%s813_s0 + $0x8] sm:$0xff]  ;;  %v515_v20 = vld [vmem:[%s813_s0 + $0x30] sm:$0xff] }
   0x4   :  { %v162_v5 = vpack.c.b16 %v157_v3, %v157_v3  ;;  %v513_v12 = vld [vmem:[%s813_s0 + $0x20] sm:$0xff]  ;;  %v514_v16 = vld [vmem:[%s813_s0 + $0x28] sm:$0xff]  ;;  %v519_v21 = vld [vmem:[%s813_s0 + $0x50] sm:$0xff] }
   0x5   :  { %v517_v13 = vld [vmem:[%s813_s0 + $0x40] sm:$0xff]  ;;  %v518_v17 = vld [vmem:[%s813_s0 + $0x48] sm:$0xff]  ;;  %v523_v22 = vld [vmem:[%s813_s0 + $0x70] sm:$0xff] }
   0x6   :  { %v221_v6 = vand.u32 %v219_v4, %v162_v5  ;;  %v521_v14 = vld [vmem:[%s813_s0 + $0x60] sm:$0xff]  ;;  %v522_v18 = vld [vmem:[%s813_s0 + $0x68] sm:$0xff]  ;;  %v512_v23 = vld [vmem:[%s813_s0 + $0x18] sm:$0xff] }
   0x7   :  { %v516_v24 = vld [vmem:[%s813_s0 + $0x38] sm:$0xff]  ;;  %v649_v27 = vld [vmem:[%s812_s2] ss:$0 sm:$0xff] }
   0x8   :  { %226 = vmatpush.bf16.msra.mxu0 %v221_v6  ;;  %529 = vmatpush.bf16.msra.mxu1 %v221_v6  ;;  %v520_v25 = vld [vmem:[%s813_s0 + $0x58] sm:$0xff] }
   0x9   :  { %530 = vmatpush.bf16.msra.mxu2 %v221_v6  ;;  %531 = vmatpush.bf16.msra.mxu3 %v221_v6  ;;  %v524_v26 = vld [vmem:[%s813_s0 + $0x78] sm:$0xff] }
   0xc   :  { %227 = vmatpush.bf16.msra.mxu0 %v528_v7  ;;  %532 = vmatpush.bf16.msra.mxu1 %v528_v7 }
   0xd   :  { %533 = vmatpush.bf16.msra.mxu2 %v528_v7  ;;  %534 = vmatpush.bf16.msra.mxu3 %v528_v7 }
  0x10   :  { %228 = vmatpush.bf16.msra.mxu0 %v527_v8  ;;  %535 = vmatpush.bf16.msra.mxu1 %v527_v8 }
  0x11   :  { %536 = vmatpush.bf16.msra.mxu2 %v527_v8  ;;  %537 = vmatpush.bf16.msra.mxu3 %v527_v8 }
  0x14   :  { %229 = vmatpush.bf16.msra.mxu0 %v526_v9  ;;  %538 = vmatpush.bf16.msra.mxu1 %v526_v9 }
  0x15   :  { %539 = vmatpush.bf16.msra.mxu2 %v526_v9  ;;  %540 = vmatpush.bf16.msra.mxu3 %v526_v9 }
  0x18   :  { %230 = vmatpush.bf16.msra.mxu0 %v525_v10  ;;  %541 = vmatpush.bf16.msra.mxu1 %v525_v10 }
  0x19   :  { %542 = vmatpush.bf16.msra.mxu2 %v525_v10  ;;  %543 = vmatpush.bf16.msra.mxu3 %v525_v10 }
  0x1b   :  { %493 = vmatmul.msk.bf16.vlgmr.msra.gmra.mxu0 %vm167_vm2, %v509_v11  ;;  %497 = vmatmul.msk.bf16.vlgmr.msra.gmra.mxu1 %vm167_vm2, %v513_v12 }
  0x1c   :  { %501 = vmatmul.msk.bf16.vlgmr.msra.gmra.mxu2 %vm167_vm2, %v517_v13  ;;  %505 = vmatmul.msk.bf16.vlgmr.msra.gmra.mxu3 %vm167_vm2, %v521_v14 }
  0x2b   :  { %494 = vmatmul.msk.bf16.gmra.mxu0 %vm167_vm2, %v510_v15  ;;  %498 = vmatmul.msk.bf16.gmra.mxu1 %vm167_vm2, %v514_v16 }
  0x2c   :  { %502 = vmatmul.msk.bf16.gmra.mxu2 %vm167_vm2, %v518_v17  ;;  %506 = vmatmul.msk.bf16.gmra.mxu3 %vm167_vm2, %v522_v18 }
  0x3b   :  { %495 = vmatmul.msk.bf16.gmra.mxu0 %vm167_vm2, %v511_v19  ;;  %499 = vmatmul.msk.bf16.gmra.mxu1 %vm167_vm2, %v515_v20 }
  0x3c   :  { %503 = vmatmul.msk.bf16.gmra.mxu2 %vm167_vm2, %v519_v21  ;;  %507 = vmatmul.msk.bf16.gmra.mxu3 %vm167_vm2, %v523_v22 }
  0x4b   :  { %496 = vmatmul.msk.bf16.gmra.mxu0 %vm167_vm2, %v512_v23  ;;  %500 = vmatmul.msk.bf16.gmra.mxu1 %vm167_vm2, %v516_v24 }
  0x4c   :  { %504 = vmatmul.msk.bf16.gmra.mxu2 %vm167_vm2, %v520_v25  ;;  %508 = vmatmul.msk.bf16.gmra.mxu3 %vm167_vm2, %v524_v26 }
  0x98   :  { %v232_v28 = vpop.f32.mrf.mxu0  ;;  %v252_v29 = vpop.f32.mrf.mxu1 }
  0x99   :  { %v233_v30 = vadd.f32 %v649_v27, %v232_v28  ;;  %v253_v31 = vadd.f32 %v649_v27, %v252_v29 }
  0x9b   :  { %v312_v32 = vmax.f32 %v233_v30, 0.0  ;;  %v320_v33 = vmax.f32 %v253_v31, 0.0 }
  0x9d   :  { %v344_v34 = vpack.c.bf16 %v312_v32, %v312_v32  ;;  %v352_v35 = vpack.c.bf16 %v320_v33, %v320_v33 }
  0x9f   :  { %377 = vst.msk [vmem:[%s814_s3] sm:$0xf] %vm376_vm3, %v344_v34  ;;  %v272_v36 = vpop.f32.mrf.mxu2  ;;  %v292_v37 = vpop.f32.mrf.mxu3 }
  0xa0   :  { %385 = vst.msk [vmem:[%s814_s3 + $0x20] sm:$0xf] %vm376_vm3, %v352_v35  ;;  %v273_v38 = vadd.f32 %v649_v27, %v272_v36  ;;  %v293_v39 = vadd.f32 %v649_v27, %v292_v37  ;;  %v234_v40 = vpop.f32.mrf.mxu0  ;;  %v254_v41 = vpop.f32.mrf.mxu1 }
  0xa1   :  { %v235_v42 = vadd.f32 %v649_v27, %v234_v40  ;;  %v255_v43 = vadd.f32 %v649_v27, %v254_v41 }
  0xa2   :  { %v328_v44 = vmax.f32 %v273_v38, 0.0  ;;  %v336_v45 = vmax.f32 %v293_v39, 0.0 }
  0xa3   :  { %v313_v46 = vmax.f32 %v235_v42, 0.0  ;;  %v321_v47 = vmax.f32 %v255_v43, 0.0 }
  0xa4   :  { %v360_v48 = vpack.c.bf16 %v328_v44, %v328_v44  ;;  %v368_v49 = vpack.c.bf16 %v336_v45, %v336_v45 }
  0xa5   :  { %v345_v50 = vpack.c.bf16 %v313_v46, %v313_v46  ;;  %v353_v51 = vpack.c.bf16 %v321_v47, %v321_v47 }
  0xa6   :  { %393 = vst.msk [vmem:[%s814_s3 + $0x40] sm:$0xf] %vm376_vm3, %v360_v48 }
  0xa7   :  { %401 = vst.msk [vmem:[%s814_s3 + $0x60] sm:$0xf] %vm376_vm3, %v368_v49  ;;  %v274_v52 = vpop.f32.mrf.mxu2  ;;  %v294_v53 = vpop.f32.mrf.mxu3 }
  0xa8   :  { %378 = vst.msk [vmem:[%s814_s3 + $0x4] sm:$0xf] %vm376_vm3, %v345_v50  ;;  %v275_v54 = vadd.f32 %v649_v27, %v274_v52  ;;  %v295_v55 = vadd.f32 %v649_v27, %v294_v53  ;;  %v237_v56 = vpop.f32.mrf.mxu0  ;;  %v257_v57 = vpop.f32.mrf.mxu1 }
  0xa9   :  { %386 = vst.msk [vmem:[%s814_s3 + $0x24] sm:$0xf] %vm376_vm3, %v353_v51  ;;  %v238_v58 = vadd.f32 %v649_v27, %v237_v56  ;;  %v258_v59 = vadd.f32 %v649_v27, %v257_v57 }
  0xaa   :  { %v329_v60 = vmax.f32 %v275_v54, 0.0  ;;  %v337_v61 = vmax.f32 %v295_v55, 0.0 }
  0xab   :  { %v314_v62 = vmax.f32 %v238_v58, 0.0  ;;  %v322_v63 = vmax.f32 %v258_v59, 0.0 }
  0xac   :  { %v361_v0 = vpack.c.bf16 %v329_v60, %v329_v60  ;;  %v369_v1 = vpack.c.bf16 %v337_v61, %v337_v61 }
  0xad   :  { %v346_v2 = vpack.c.bf16 %v314_v62, %v314_v62  ;;  %v354_v3 = vpack.c.bf16 %v322_v63, %v322_v63 }
  0xae   :  { %394 = vst.msk [vmem:[%s814_s3 + $0x44] sm:$0xf] %vm376_vm3, %v361_v0 }
  0xaf   :  { %402 = vst.msk [vmem:[%s814_s3 + $0x64] sm:$0xf] %vm376_vm3, %v369_v1  ;;  %v277_v4 = vpop.f32.mrf.mxu2  ;;  %v297_v5 = vpop.f32.mrf.mxu3 }
  0xb0   :  { %379 = vst.msk [vmem:[%s814_s3 + $0x8] sm:$0xf] %vm376_vm3, %v346_v2  ;;  %v278_v6 = vadd.f32 %v649_v27, %v277_v4  ;;  %v298_v7 = vadd.f32 %v649_v27, %v297_v5  ;;  %v239_v8 = vpop.f32.mrf.mxu0  ;;  %v259_v9 = vpop.f32.mrf.mxu1 }
  0xb1   :  { %387 = vst.msk [vmem:[%s814_s3 + $0x28] sm:$0xf] %vm376_vm3, %v354_v3  ;;  %v240_v10 = vadd.f32 %v649_v27, %v239_v8  ;;  %v260_v11 = vadd.f32 %v649_v27, %v259_v9 }
  0xb2   :  { %v330_v12 = vmax.f32 %v278_v6, 0.0  ;;  %v338_v13 = vmax.f32 %v298_v7, 0.0 }
  0xb3   :  { %v315_v14 = vmax.f32 %v240_v10, 0.0  ;;  %v323_v15 = vmax.f32 %v260_v11, 0.0 }
  0xb4   :  { %v362_v16 = vpack.c.bf16 %v330_v12, %v330_v12  ;;  %v370_v17 = vpack.c.bf16 %v338_v13, %v338_v13 }
  0xb5   :  { %v347_v18 = vpack.c.bf16 %v315_v14, %v315_v14  ;;  %v355_v19 = vpack.c.bf16 %v323_v15, %v323_v15 }
  0xb6   :  { %395 = vst.msk [vmem:[%s814_s3 + $0x48] sm:$0xf] %vm376_vm3, %v362_v16 }
  0xb7   :  { %403 = vst.msk [vmem:[%s814_s3 + $0x68] sm:$0xf] %vm376_vm3, %v370_v17  ;;  %v279_v20 = vpop.f32.mrf.mxu2  ;;  %v299_v21 = vpop.f32.mrf.mxu3 }
  0xb8   :  { %380 = vst.msk [vmem:[%s814_s3 + $0xc] sm:$0xf] %vm376_vm3, %v347_v18  ;;  %v280_v22 = vadd.f32 %v649_v27, %v279_v20  ;;  %v300_v23 = vadd.f32 %v649_v27, %v299_v21  ;;  %v242_v24 = vpop.f32.mrf.mxu0  ;;  %v262_v25 = vpop.f32.mrf.mxu1 }
  0xb9   :  { %388 = vst.msk [vmem:[%s814_s3 + $0x2c] sm:$0xf] %vm376_vm3, %v355_v19  ;;  %v243_v26 = vadd.f32 %v649_v27, %v242_v24  ;;  %v263_v28 = vadd.f32 %v649_v27, %v262_v25 }
  0xba   :  { %v331_v29 = vmax.f32 %v280_v22, 0.0  ;;  %v339_v30 = vmax.f32 %v300_v23, 0.0 }
  0xbb   :  { %v316_v31 = vmax.f32 %v243_v26, 0.0  ;;  %v324_v32 = vmax.f32 %v263_v28, 0.0 }
  0xbc   :  { %v363_v33 = vpack.c.bf16 %v331_v29, %v331_v29  ;;  %v371_v34 = vpack.c.bf16 %v339_v30, %v339_v30 }
  0xbd   :  { %v348_v35 = vpack.c.bf16 %v316_v31, %v316_v31  ;;  %v356_v36 = vpack.c.bf16 %v324_v32, %v324_v32 }
  0xbe   :  { %396 = vst.msk [vmem:[%s814_s3 + $0x4c] sm:$0xf] %vm376_vm3, %v363_v33 }
  0xbf   :  { %404 = vst.msk [vmem:[%s814_s3 + $0x6c] sm:$0xf] %vm376_vm3, %v371_v34  ;;  %v282_v37 = vpop.f32.mrf.mxu2  ;;  %v302_v38 = vpop.f32.mrf.mxu3 }
  0xc0   :  { %381 = vst.msk [vmem:[%s814_s3 + $0x10] sm:$0xf] %vm376_vm3, %v348_v35  ;;  %v283_v39 = vadd.f32 %v649_v27, %v282_v37  ;;  %v303_v40 = vadd.f32 %v649_v27, %v302_v38  ;;  %v244_v41 = vpop.f32.mrf.mxu0  ;;  %v264_v42 = vpop.f32.mrf.mxu1 }
  0xc1   :  { %389 = vst.msk [vmem:[%s814_s3 + $0x30] sm:$0xf] %vm376_vm3, %v356_v36  ;;  %v245_v43 = vadd.f32 %v649_v27, %v244_v41  ;;  %v265_v44 = vadd.f32 %v649_v27, %v264_v42 }
  0xc2   :  { %v332_v45 = vmax.f32 %v283_v39, 0.0  ;;  %v340_v46 = vmax.f32 %v303_v40, 0.0 }
  0xc3   :  { %v317_v47 = vmax.f32 %v245_v43, 0.0  ;;  %v325_v48 = vmax.f32 %v265_v44, 0.0 }
  0xc4   :  { %v364_v49 = vpack.c.bf16 %v332_v45, %v332_v45  ;;  %v372_v50 = vpack.c.bf16 %v340_v46, %v340_v46 }
  0xc5   :  { %v349_v51 = vpack.c.bf16 %v317_v47, %v317_v47  ;;  %v357_v52 = vpack.c.bf16 %v325_v48, %v325_v48 }
  0xc6   :  { %397 = vst.msk [vmem:[%s814_s3 + $0x50] sm:$0xf] %vm376_vm3, %v364_v49 }
  0xc7   :  { %405 = vst.msk [vmem:[%s814_s3 + $0x70] sm:$0xf] %vm376_vm3, %v372_v50  ;;  %v284_v53 = vpop.f32.mrf.mxu2  ;;  %v304_v54 = vpop.f32.mrf.mxu3 }
  0xc8   :  { %382 = vst.msk [vmem:[%s814_s3 + $0x14] sm:$0xf] %vm376_vm3, %v349_v51  ;;  %v285_v55 = vadd.f32 %v649_v27, %v284_v53  ;;  %v305_v56 = vadd.f32 %v649_v27, %v304_v54  ;;  %v247_v57 = vpop.f32.mrf.mxu0  ;;  %v267_v58 = vpop.f32.mrf.mxu1 }
  0xc9   :  { %390 = vst.msk [vmem:[%s814_s3 + $0x34] sm:$0xf] %vm376_vm3, %v357_v52  ;;  %v248_v59 = vadd.f32 %v649_v27, %v247_v57  ;;  %v268_v60 = vadd.f32 %v649_v27, %v267_v58 }
  0xca   :  { %v333_v61 = vmax.f32 %v285_v55, 0.0  ;;  %v341_v62 = vmax.f32 %v305_v56, 0.0 }
  0xcb   :  { %v318_v63 = vmax.f32 %v248_v59, 0.0  ;;  %v326_v0 = vmax.f32 %v268_v60, 0.0 }
  0xcc   :  { %v365_v1 = vpack.c.bf16 %v333_v61, %v333_v61  ;;  %v373_v2 = vpack.c.bf16 %v341_v62, %v341_v62 }
  0xcd   :  { %v350_v3 = vpack.c.bf16 %v318_v63, %v318_v63  ;;  %v358_v4 = vpack.c.bf16 %v326_v0, %v326_v0 }
  0xce   :  { %398 = vst.msk [vmem:[%s814_s3 + $0x54] sm:$0xf] %vm376_vm3, %v365_v1 }
  0xcf   :  { %406 = vst.msk [vmem:[%s814_s3 + $0x74] sm:$0xf] %vm376_vm3, %v373_v2  ;;  %v287_v5 = vpop.f32.mrf.mxu2  ;;  %v307_v6 = vpop.f32.mrf.mxu3 }
  0xd0   :  { %383 = vst.msk [vmem:[%s814_s3 + $0x18] sm:$0xf] %vm376_vm3, %v350_v3  ;;  %v288_v7 = vadd.f32 %v649_v27, %v287_v5  ;;  %v308_v8 = vadd.f32 %v649_v27, %v307_v6  ;;  %v249_v9 = vpop.f32.mrf.mxu0  ;;  %v269_v10 = vpop.f32.mrf.mxu1 }
  0xd1   :  { %391 = vst.msk [vmem:[%s814_s3 + $0x38] sm:$0xf] %vm376_vm3, %v358_v4  ;;  %v250_v11 = vadd.f32 %v649_v27, %v249_v9  ;;  %v270_v12 = vadd.f32 %v649_v27, %v269_v10 }
  0xd2   :  { %v334_v13 = vmax.f32 %v288_v7, 0.0  ;;  %v342_v14 = vmax.f32 %v308_v8, 0.0 }
  0xd3   :  { %v319_v15 = vmax.f32 %v250_v11, 0.0  ;;  %v327_v16 = vmax.f32 %v270_v12, 0.0 }
  0xd4   :  { %v366_v17 = vpack.c.bf16 %v334_v13, %v334_v13  ;;  %v374_v18 = vpack.c.bf16 %v342_v14, %v342_v14 }
  0xd5   :  { %v351_v19 = vpack.c.bf16 %v319_v15, %v319_v15  ;;  %v359_v20 = vpack.c.bf16 %v327_v16, %v327_v16 }
  0xd6   :  { %399 = vst.msk [vmem:[%s814_s3 + $0x58] sm:$0xf] %vm376_vm3, %v366_v17 }
  0xd7   :  { %407 = vst.msk [vmem:[%s814_s3 + $0x78] sm:$0xf] %vm376_vm3, %v374_v18  ;;  %v289_v21 = vpop.f32.mrf.mxu2  ;;  %v309_v22 = vpop.f32.mrf.mxu3 }
  0xd8   :  { %384 = vst.msk [vmem:[%s814_s3 + $0x1c] sm:$0xf] %vm376_vm3, %v351_v19  ;;  %v290_v23 = vadd.f32 %v649_v27, %v289_v21  ;;  %v310_v24 = vadd.f32 %v649_v27, %v309_v22 }
  0xd9   :  { %392 = vst.msk [vmem:[%s814_s3 + $0x3c] sm:$0xf] %vm376_vm3, %v359_v20 }
  0xda   :  { %v335_v25 = vmax.f32 %v290_v23, 0.0  ;;  %v343_v26 = vmax.f32 %v310_v24, 0.0 }
  0xdc   :  { %v367_v28 = vpack.c.bf16 %v335_v25, %v335_v25  ;;  %v375_v29 = vpack.c.bf16 %v343_v26, %v343_v26 }
  0xde   :  { %400 = vst.msk [vmem:[%s814_s3 + $0x5c] sm:$0xf] %vm376_vm3, %v367_v28 }
  0xdf   :  { %408 = vst.msk [vmem:[%s814_s3 + $0x7c] sm:$0xf] %vm376_vm3, %v375_v29 }

// kernel: _lambda_.28
= control target key start
LH: loop header
LB: loop body
LE: loop exit
PB: predicated region body
PF: predicated region fallthrough
CT: control target
= control target key end

     0   :  { %vm139_vm0 = vcmask 130048   ;;  %vm309_vm1 = vcmask 519168   ;;  %s703_s1 = inlined_call_operand.vmem [shape: bf16[16,64], index: 1, kind: input, shape index: {}]   ;;  %s704_s0 = inlined_call_operand.vmem [shape: bf16[256,16], index: 0, kind: input, shape index: {}]   ;;  %s705_s2 = inlined_call_operand.vmem [shape: f32[1,64], index: 2, kind: input, shape index: {}]   ;;  %s706_s3 = inlined_call_operand.vmem [shape: bf16[256,64], index: 3, kind: output, shape index: {}]  }
   0x1   :  { %v446_v0 = vld [vmem:[%s703_s1] sm:$0xff]  ;;  %v431_v5 = vld [vmem:[%s704_s0 + $0x8] sm:$0xff]  ;;  %v432_v9 = vld [vmem:[%s704_s0 + $0x10] sm:$0xff] }
   0x2   :  { %v430_v1 = vld [vmem:[%s704_s0] sm:$0xff]  ;;  %195 = vmatpush.bf16.msra.mxu0 %v446_v0  ;;  %447 = vmatpush.bf16.msra.mxu1 %v446_v0  ;;  %v435_v6 = vld [vmem:[%s704_s0 + $0x28] sm:$0xff]  ;;  %v436_v10 = vld [vmem:[%s704_s0 + $0x30] sm:$0xff] }
   0x3   :  { %v434_v2 = vld [vmem:[%s704_s0 + $0x20] sm:$0xff]  ;;  %448 = vmatpush.bf16.msra.mxu2 %v446_v0  ;;  %449 = vmatpush.bf16.msra.mxu3 %v446_v0  ;;  %v439_v7 = vld [vmem:[%s704_s0 + $0x48] sm:$0xff]  ;;  %v440_v11 = vld [vmem:[%s704_s0 + $0x50] sm:$0xff] }
   0x4   :  { %v438_v3 = vld [vmem:[%s704_s0 + $0x40] sm:$0xff]  ;;  %v443_v8 = vld [vmem:[%s704_s0 + $0x68] sm:$0xff]  ;;  %v444_v12 = vld [vmem:[%s704_s0 + $0x70] sm:$0xff] }
   0x5   :  { %v442_v4 = vld [vmem:[%s704_s0 + $0x60] sm:$0xff]  ;;  %414 = vmatmul.msk.bf16.vlgmr.msra.gmra.mxu0 %vm139_vm0, %v430_v1  ;;  %418 = vmatmul.msk.bf16.vlgmr.msra.gmra.mxu1 %vm139_vm0, %v434_v2  ;;  %v433_v13 = vld [vmem:[%s704_s0 + $0x18] sm:$0xff] }
   0x6   :  { %422 = vmatmul.msk.bf16.vlgmr.msra.gmra.mxu2 %vm139_vm0, %v438_v3  ;;  %426 = vmatmul.msk.bf16.vlgmr.msra.gmra.mxu3 %vm139_vm0, %v442_v4  ;;  %v437_v14 = vld [vmem:[%s704_s0 + $0x38] sm:$0xff]  ;;  %v541_v17 = vld [vmem:[%s705_s2] ss:$0 sm:$0xff] }
   0x7   :  { %v441_v15 = vld [vmem:[%s704_s0 + $0x58] sm:$0xff] }
   0x8   :  { %v445_v16 = vld [vmem:[%s704_s0 + $0x78] sm:$0xff] }
  0x15   :  { %415 = vmatmul.msk.bf16.gmra.mxu0 %vm139_vm0, %v431_v5  ;;  %419 = vmatmul.msk.bf16.gmra.mxu1 %vm139_vm0, %v435_v6 }
  0x16   :  { %423 = vmatmul.msk.bf16.gmra.mxu2 %vm139_vm0, %v439_v7  ;;  %427 = vmatmul.msk.bf16.gmra.mxu3 %vm139_vm0, %v443_v8 }
  0x25   :  { %416 = vmatmul.msk.bf16.gmra.mxu0 %vm139_vm0, %v432_v9  ;;  %420 = vmatmul.msk.bf16.gmra.mxu1 %vm139_vm0, %v436_v10 }
  0x26   :  { %424 = vmatmul.msk.bf16.gmra.mxu2 %vm139_vm0, %v440_v11  ;;  %428 = vmatmul.msk.bf16.gmra.mxu3 %vm139_vm0, %v444_v12 }
  0x35   :  { %417 = vmatmul.msk.bf16.gmra.mxu0 %vm139_vm0, %v433_v13  ;;  %421 = vmatmul.msk.bf16.gmra.mxu1 %vm139_vm0, %v437_v14 }
  0x36   :  { %425 = vmatmul.msk.bf16.gmra.mxu2 %vm139_vm0, %v441_v15  ;;  %429 = vmatmul.msk.bf16.gmra.mxu3 %vm139_vm0, %v445_v16 }
  0x82   :  { %v197_v18 = vpop.f32.mrf.mxu0  ;;  %v217_v19 = vpop.f32.mrf.mxu1 }
  0x83   :  { %v198_v20 = vadd.f32 %v541_v17, %v197_v18  ;;  %v218_v21 = vadd.f32 %v541_v17, %v217_v19 }
  0x85   :  { %v277_v22 = vpack.c.bf16 %v198_v20, %v198_v20  ;;  %v285_v23 = vpack.c.bf16 %v218_v21, %v218_v21 }
  0x87   :  { %310 = vst.msk [vmem:[%s706_s3] sm:$0xf] %vm309_vm1, %v277_v22 }
  0x88   :  { %318 = vst.msk [vmem:[%s706_s3 + $0x20] sm:$0xf] %vm309_vm1, %v285_v23 }
  0x89   :  { %v237_v24 = vpop.f32.mrf.mxu2  ;;  %v257_v25 = vpop.f32.mrf.mxu3 }
  0x8a   :  { %v238_v26 = vadd.f32 %v541_v17, %v237_v24  ;;  %v258_v27 = vadd.f32 %v541_v17, %v257_v25  ;;  %v199_v28 = vpop.f32.mrf.mxu0  ;;  %v219_v29 = vpop.f32.mrf.mxu1 }
  0x8b   :  { %v200_v30 = vadd.f32 %v541_v17, %v199_v28  ;;  %v220_v31 = vadd.f32 %v541_v17, %v219_v29 }
  0x8c   :  { %v293_v32 = vpack.c.bf16 %v238_v26, %v238_v26  ;;  %v301_v33 = vpack.c.bf16 %v258_v27, %v258_v27 }
  0x8d   :  { %v278_v34 = vpack.c.bf16 %v200_v30, %v200_v30  ;;  %v286_v35 = vpack.c.bf16 %v220_v31, %v220_v31 }
  0x8e   :  { %326 = vst.msk [vmem:[%s706_s3 + $0x40] sm:$0xf] %vm309_vm1, %v293_v32 }
  0x8f   :  { %334 = vst.msk [vmem:[%s706_s3 + $0x60] sm:$0xf] %vm309_vm1, %v301_v33 }
  0x90   :  { %311 = vst.msk [vmem:[%s706_s3 + $0x4] sm:$0xf] %vm309_vm1, %v278_v34 }
  0x91   :  { %319 = vst.msk [vmem:[%s706_s3 + $0x24] sm:$0xf] %vm309_vm1, %v286_v35  ;;  %v239_v36 = vpop.f32.mrf.mxu2  ;;  %v259_v37 = vpop.f32.mrf.mxu3 }
  0x92   :  { %v240_v38 = vadd.f32 %v541_v17, %v239_v36  ;;  %v260_v39 = vadd.f32 %v541_v17, %v259_v37  ;;  %v202_v40 = vpop.f32.mrf.mxu0  ;;  %v222_v41 = vpop.f32.mrf.mxu1 }
  0x93   :  { %v203_v42 = vadd.f32 %v541_v17, %v202_v40  ;;  %v223_v43 = vadd.f32 %v541_v17, %v222_v41 }
  0x94   :  { %v294_v44 = vpack.c.bf16 %v240_v38, %v240_v38  ;;  %v302_v45 = vpack.c.bf16 %v260_v39, %v260_v39 }
  0x95   :  { %v279_v46 = vpack.c.bf16 %v203_v42, %v203_v42  ;;  %v287_v47 = vpack.c.bf16 %v223_v43, %v223_v43 }
  0x96   :  { %327 = vst.msk [vmem:[%s706_s3 + $0x44] sm:$0xf] %vm309_vm1, %v294_v44 }
  0x97   :  { %335 = vst.msk [vmem:[%s706_s3 + $0x64] sm:$0xf] %vm309_vm1, %v302_v45 }
  0x98   :  { %312 = vst.msk [vmem:[%s706_s3 + $0x8] sm:$0xf] %vm309_vm1, %v279_v46 }
  0x99   :  { %320 = vst.msk [vmem:[%s706_s3 + $0x28] sm:$0xf] %vm309_vm1, %v287_v47  ;;  %v242_v48 = vpop.f32.mrf.mxu2  ;;  %v262_v49 = vpop.f32.mrf.mxu3 }
  0x9a   :  { %v243_v50 = vadd.f32 %v541_v17, %v242_v48  ;;  %v263_v51 = vadd.f32 %v541_v17, %v262_v49  ;;  %v204_v52 = vpop.f32.mrf.mxu0  ;;  %v224_v53 = vpop.f32.mrf.mxu1 }
  0x9b   :  { %v205_v54 = vadd.f32 %v541_v17, %v204_v52  ;;  %v225_v55 = vadd.f32 %v541_v17, %v224_v53 }
  0x9c   :  { %v295_v56 = vpack.c.bf16 %v243_v50, %v243_v50  ;;  %v303_v57 = vpack.c.bf16 %v263_v51, %v263_v51 }
  0x9d   :  { %v280_v58 = vpack.c.bf16 %v205_v54, %v205_v54  ;;  %v288_v59 = vpack.c.bf16 %v225_v55, %v225_v55 }
  0x9e   :  { %328 = vst.msk [vmem:[%s706_s3 + $0x48] sm:$0xf] %vm309_vm1, %v295_v56 }
  0x9f   :  { %336 = vst.msk [vmem:[%s706_s3 + $0x68] sm:$0xf] %vm309_vm1, %v303_v57 }
  0xa0   :  { %313 = vst.msk [vmem:[%s706_s3 + $0xc] sm:$0xf] %vm309_vm1, %v280_v58 }
  0xa1   :  { %321 = vst.msk [vmem:[%s706_s3 + $0x2c] sm:$0xf] %vm309_vm1, %v288_v59  ;;  %v244_v60 = vpop.f32.mrf.mxu2  ;;  %v264_v61 = vpop.f32.mrf.mxu3 }
  0xa2   :  { %v245_v62 = vadd.f32 %v541_v17, %v244_v60  ;;  %v265_v63 = vadd.f32 %v541_v17, %v264_v61  ;;  %v207_v0 = vpop.f32.mrf.mxu0  ;;  %v227_v1 = vpop.f32.mrf.mxu1 }
  0xa3   :  { %v208_v2 = vadd.f32 %v541_v17, %v207_v0  ;;  %v228_v3 = vadd.f32 %v541_v17, %v227_v1 }
  0xa4   :  { %v296_v4 = vpack.c.bf16 %v245_v62, %v245_v62  ;;  %v304_v5 = vpack.c.bf16 %v265_v63, %v265_v63 }
  0xa5   :  { %v281_v6 = vpack.c.bf16 %v208_v2, %v208_v2  ;;  %v289_v7 = vpack.c.bf16 %v228_v3, %v228_v3 }
  0xa6   :  { %329 = vst.msk [vmem:[%s706_s3 + $0x4c] sm:$0xf] %vm309_vm1, %v296_v4 }
  0xa7   :  { %337 = vst.msk [vmem:[%s706_s3 + $0x6c] sm:$0xf] %vm309_vm1, %v304_v5 }
  0xa8   :  { %314 = vst.msk [vmem:[%s706_s3 + $0x10] sm:$0xf] %vm309_vm1, %v281_v6 }
  0xa9   :  { %322 = vst.msk [vmem:[%s706_s3 + $0x30] sm:$0xf] %vm309_vm1, %v289_v7  ;;  %v247_v8 = vpop.f32.mrf.mxu2  ;;  %v267_v9 = vpop.f32.mrf.mxu3 }
  0xaa   :  { %v248_v10 = vadd.f32 %v541_v17, %v247_v8  ;;  %v268_v11 = vadd.f32 %v541_v17, %v267_v9  ;;  %v209_v12 = vpop.f32.mrf.mxu0  ;;  %v229_v13 = vpop.f32.mrf.mxu1 }
  0xab   :  { %v210_v14 = vadd.f32 %v541_v17, %v209_v12  ;;  %v230_v15 = vadd.f32 %v541_v17, %v229_v13 }
  0xac   :  { %v297_v16 = vpack.c.bf16 %v248_v10, %v248_v10  ;;  %v305_v18 = vpack.c.bf16 %v268_v11, %v268_v11 }
  0xad   :  { %v282_v19 = vpack.c.bf16 %v210_v14, %v210_v14  ;;  %v290_v20 = vpack.c.bf16 %v230_v15, %v230_v15 }
  0xae   :  { %330 = vst.msk [vmem:[%s706_s3 + $0x50] sm:$0xf] %vm309_vm1, %v297_v16 }
  0xaf   :  { %338 = vst.msk [vmem:[%s706_s3 + $0x70] sm:$0xf] %vm309_vm1, %v305_v18 }
  0xb0   :  { %315 = vst.msk [vmem:[%s706_s3 + $0x14] sm:$0xf] %vm309_vm1, %v282_v19 }
  0xb1   :  { %323 = vst.msk [vmem:[%s706_s3 + $0x34] sm:$0xf] %vm309_vm1, %v290_v20  ;;  %v249_v21 = vpop.f32.mrf.mxu2  ;;  %v269_v22 = vpop.f32.mrf.mxu3 }
  0xb2   :  { %v250_v23 = vadd.f32 %v541_v17, %v249_v21  ;;  %v270_v24 = vadd.f32 %v541_v17, %v269_v22  ;;  %v212_v25 = vpop.f32.mrf.mxu0  ;;  %v232_v26 = vpop.f32.mrf.mxu1 }
  0xb3   :  { %v213_v27 = vadd.f32 %v541_v17, %v212_v25  ;;  %v233_v28 = vadd.f32 %v541_v17, %v232_v26 }
  0xb4   :  { %v298_v29 = vpack.c.bf16 %v250_v23, %v250_v23  ;;  %v306_v30 = vpack.c.bf16 %v270_v24, %v270_v24 }
  0xb5   :  { %v283_v31 = vpack.c.bf16 %v213_v27, %v213_v27  ;;  %v291_v32 = vpack.c.bf16 %v233_v28, %v233_v28 }
  0xb6   :  { %331 = vst.msk [vmem:[%s706_s3 + $0x54] sm:$0xf] %vm309_vm1, %v298_v29 }
  0xb7   :  { %339 = vst.msk [vmem:[%s706_s3 + $0x74] sm:$0xf] %vm309_vm1, %v306_v30 }
  0xb8   :  { %316 = vst.msk [vmem:[%s706_s3 + $0x18] sm:$0xf] %vm309_vm1, %v283_v31 }
  0xb9   :  { %324 = vst.msk [vmem:[%s706_s3 + $0x38] sm:$0xf] %vm309_vm1, %v291_v32  ;;  %v252_v33 = vpop.f32.mrf.mxu2  ;;  %v272_v34 = vpop.f32.mrf.mxu3 }
  0xba   :  { %v253_v35 = vadd.f32 %v541_v17, %v252_v33  ;;  %v273_v36 = vadd.f32 %v541_v17, %v272_v34  ;;  %v214_v37 = vpop.f32.mrf.mxu0  ;;  %v234_v38 = vpop.f32.mrf.mxu1 }
  0xbb   :  { %v215_v39 = vadd.f32 %v541_v17, %v214_v37  ;;  %v235_v40 = vadd.f32 %v541_v17, %v234_v38 }
  0xbc   :  { %v299_v41 = vpack.c.bf16 %v253_v35, %v253_v35  ;;  %v307_v42 = vpack.c.bf16 %v273_v36, %v273_v36 }
  0xbd   :  { %v284_v43 = vpack.c.bf16 %v215_v39, %v215_v39  ;;  %v292_v44 = vpack.c.bf16 %v235_v40, %v235_v40 }
  0xbe   :  { %332 = vst.msk [vmem:[%s706_s3 + $0x58] sm:$0xf] %vm309_vm1, %v299_v41 }
  0xbf   :  { %340 = vst.msk [vmem:[%s706_s3 + $0x78] sm:$0xf] %vm309_vm1, %v307_v42 }
  0xc0   :  { %317 = vst.msk [vmem:[%s706_s3 + $0x1c] sm:$0xf] %vm309_vm1, %v284_v43 }
  0xc1   :  { %325 = vst.msk [vmem:[%s706_s3 + $0x3c] sm:$0xf] %vm309_vm1, %v292_v44  ;;  %v254_v45 = vpop.f32.mrf.mxu2  ;;  %v274_v46 = vpop.f32.mrf.mxu3 }
  0xc2   :  { %v255_v47 = vadd.f32 %v541_v17, %v254_v45  ;;  %v275_v48 = vadd.f32 %v541_v17, %v274_v46 }
  0xc4   :  { %v300_v49 = vpack.c.bf16 %v255_v47, %v255_v47  ;;  %v308_v50 = vpack.c.bf16 %v275_v48, %v275_v48 }
  0xc6   :  { %333 = vst.msk [vmem:[%s706_s3 + $0x5c] sm:$0xf] %vm309_vm1, %v300_v49 }
  0xc7   :  { %341 = vst.msk [vmem:[%s706_s3 + $0x7c] sm:$0xf] %vm309_vm1, %v308_v50 }

// kernel: _lambda_.29
= control target key start
LH: loop header
LB: loop body
LE: loop exit
PB: predicated region body
PF: predicated region fallthrough
CT: control target
= control target key end

     0   :  { %vm76_vm0 = vcmask 1040384   ;;  %vm77_vm1 = vcmask 1041408   ;;  %v154_v1 = vmov 65535   ;;  %vm69_vm2 = vcmask 547840   ;;  %s211_s1 = inlined_call_operand.vmem [shape: bf16[67,32], index: 1, kind: input, shape index: {}]   ;;  %s212_s2 = inlined_call_operand.vmem [shape: f32[1,32], index: 2, kind: input, shape index: {}]   ;;  %s213_s0 = inlined_call_operand.vmem [shape: bf16[32,67], index: 0, kind: input, shape index: {}]   ;;  %s214_s3 = inlined_call_operand.vmem [shape: bf16[32,32], index: 3, kind: output, shape index: {}]  }
   0x1   :  { %v27_v0 = vld [vmem:[%s211_s1 + $0x20] sm:$0x3]  ;;  %v78_v2 = vsel %vm76_vm0, 4294967295, %v154_v1  ;;  %v146_v7 = vld [vmem:[%s211_s1 + $0x18] sm:$0xff]  ;;  %v145_v8 = vld [vmem:[%s211_s1 + $0x10] sm:$0xff]  ;;  %vm106_vm3 = vcmask 257024  }
   0x2   :  { %v59_v3 = vunpack.c.l.b16 %v27_v0  ;;  %v79_v4 = vsel %vm77_vm1, %v78_v2, 0  ;;  %v144_v9 = vld [vmem:[%s211_s1 + $0x8] sm:$0xff]  ;;  %v143_v10 = vld [vmem:[%s211_s1] sm:$0xff] }
   0x3   :  { %v141_v11 = vld [vmem:[%s213_s0] sm:$0xff]  ;;  %v142_v12 = vld [vmem:[%s213_s0 + $0x8] sm:$0xff] }
   0x4   :  { %v64_v5 = vpack.c.b16 %v59_v3, %v59_v3  ;;  %v153_v13 = vld [vmem:[%s212_s2] ss:$0 sm:$0xff] }
   0x6   :  { %v81_v6 = vand.u32 %v79_v4, %v64_v5 }
   0x8   :  { %86 = vmatpush.bf16.msra.mxu0 %v81_v6  ;;  %147 = vmatpush.bf16.msra.mxu1 %v81_v6 }
   0xc   :  { %87 = vmatpush.bf16.msra.mxu0 %v146_v7  ;;  %148 = vmatpush.bf16.msra.mxu1 %v146_v7 }
  0x10   :  { %88 = vmatpush.bf16.msra.mxu0 %v145_v8  ;;  %149 = vmatpush.bf16.msra.mxu1 %v145_v8 }
  0x14   :  { %89 = vmatpush.bf16.msra.mxu0 %v144_v9  ;;  %150 = vmatpush.bf16.msra.mxu1 %v144_v9 }
  0x18   :  { %90 = vmatpush.bf16.msra.mxu0 %v143_v10  ;;  %151 = vmatpush.bf16.msra.mxu1 %v143_v10 }
  0x1b   :  { %139 = vmatmul.msk.bf16.vlgmr.msra.gmra.mxu0 %vm69_vm2, %v141_v11  ;;  %140 = vmatmul.msk.bf16.vlgmr.msra.gmra.mxu1 %vm69_vm2, %v142_v12 }
  0x98   :  { %v92_v14 = vpop.f32.mrf.mxu0  ;;  %v97_v15 = vpop.f32.mrf.mxu1 }
  0x99   :  { %v93_v16 = vadd.f32 %v153_v13, %v92_v14  ;;  %v98_v17 = vadd.f32 %v153_v13, %v97_v15 }
  0x9b   :  { %v102_v18 = vpack.c.bf16 %v93_v16, %v93_v16  ;;  %v104_v19 = vpack.c.bf16 %v98_v17, %v98_v17 }
  0x9d   :  { %107 = vst.msk [vmem:[%s214_s3] sm:$0xf] %vm106_vm3, %v102_v18 }
  0x9e   :  { %109 = vst.msk [vmem:[%s214_s3 + $0x8] sm:$0xf] %vm106_vm3, %v104_v19 }
  0xa0   :  { %v94_v20 = vpop.f32.mrf.mxu0  ;;  %v99_v21 = vpop.f32.mrf.mxu1 }
  0xa1   :  { %v95_v22 = vadd.f32 %v153_v13, %v94_v20  ;;  %v100_v23 = vadd.f32 %v153_v13, %v99_v21 }
  0xa3   :  { %v103_v24 = vpack.c.bf16 %v95_v22, %v95_v22  ;;  %v105_v25 = vpack.c.bf16 %v100_v23, %v100_v23 }
  0xa5   :  { %108 = vst.msk [vmem:[%s214_s3 + $0x4] sm:$0xf] %vm106_vm3, %v103_v24 }
  0xa6   :  { %110 = vst.msk [vmem:[%s214_s3 + $0xc] sm:$0xf] %vm106_vm3, %v105_v25 }

// kernel: _lambda_.30
= control target key start
LH: loop header
LB: loop body
LE: loop exit
PB: predicated region body
PF: predicated region fallthrough
CT: control target
= control target key end

     0   :  { %vm121_vm0 = vcmask 519168   ;;  %s254_s1 = inlined_call_operand.vmem [shape: bf16[128,64], index: 1, kind: input, shape index: {}]   ;;  %s255_s2 = inlined_call_operand.vmem [shape: f32[1,64], index: 2, kind: input, shape index: {}]   ;;  %s256_s0 = inlined_call_operand.vmem [shape: bf16[32,128], index: 0, kind: input, shape index: {}]   ;;  %s257_s3 = inlined_call_operand.vmem [shape: bf16[32,64], index: 3, kind: output, shape index: {}]  }
   0x1   :  { %v179_v0 = vld [vmem:[%s254_s1 + $0x38] sm:$0xff]  ;;  %v178_v1 = vld [vmem:[%s254_s1 + $0x30] sm:$0xff]  ;;  %v177_v2 = vld [vmem:[%s254_s1 + $0x28] sm:$0xff] }
   0x2   :  { %98 = vmatpush.bf16.msra.mxu0 %v179_v0  ;;  %180 = vmatpush.bf16.msra.mxu1 %v179_v0  ;;  %v176_v3 = vld [vmem:[%s254_s1 + $0x20] sm:$0xff]  ;;  %v175_v4 = vld [vmem:[%s254_s1 + $0x18] sm:$0xff]  ;;  %v174_v5 = vld [vmem:[%s254_s1 + $0x10] sm:$0xff] }
   0x3   :  { %v173_v6 = vld [vmem:[%s254_s1 + $0x8] sm:$0xff]  ;;  %v172_v7 = vld [vmem:[%s254_s1] sm:$0xff] }
   0x4   :  { %v170_v8 = vld [vmem:[%s256_s0] sm:$0xff]  ;;  %v171_v9 = vld [vmem:[%s256_s0 + $0x8] sm:$0xff] }
   0x5   :  { %v188_v10 = vld [vmem:[%s255_s2] ss:$0 sm:$0xff] }
   0x6   :  { %99 = vmatpush.bf16.msra.mxu0 %v178_v1  ;;  %181 = vmatpush.bf16.msra.mxu1 %v178_v1 }
   0xa   :  { %100 = vmatpush.bf16.msra.mxu0 %v177_v2  ;;  %182 = vmatpush.bf16.msra.mxu1 %v177_v2 }
   0xe   :  { %101 = vmatpush.bf16.msra.mxu0 %v176_v3  ;;  %183 = vmatpush.bf16.msra.mxu1 %v176_v3 }
  0x12   :  { %102 = vmatpush.bf16.msra.mxu0 %v175_v4  ;;  %184 = vmatpush.bf16.msra.mxu1 %v175_v4 }
  0x16   :  { %103 = vmatpush.bf16.msra.mxu0 %v174_v5  ;;  %185 = vmatpush.bf16.msra.mxu1 %v174_v5 }
  0x1a   :  { %104 = vmatpush.bf16.msra.mxu0 %v173_v6  ;;  %186 = vmatpush.bf16.msra.mxu1 %v173_v6 }
  0x1e   :  { %105 = vmatpush.bf16.msra.mxu0 %v172_v7  ;;  %187 = vmatpush.bf16.msra.mxu1 %v172_v7 }
  0x21   :  { %106 = vmatmul.bf16.vlgmr.msra.gmra.mxu0 %v170_v8  ;;  %111 = vmatmul.bf16.vlgmr.msra.gmra.mxu1 %v171_v9 }
  0x9e   :  { %v107_v11 = vpop.f32.mrf.mxu0  ;;  %v112_v12 = vpop.f32.mrf.mxu1 }
  0x9f   :  { %v108_v13 = vadd.f32 %v188_v10, %v107_v11  ;;  %v113_v14 = vadd.f32 %v188_v10, %v112_v12 }
  0xa1   :  { %v117_v15 = vpack.c.bf16 %v108_v13, %v108_v13  ;;  %v119_v16 = vpack.c.bf16 %v113_v14, %v113_v14 }
  0xa3   :  { %122 = vst.msk [vmem:[%s257_s3] sm:$0xf] %vm121_vm0, %v117_v15 }
  0xa4   :  { %124 = vst.msk [vmem:[%s257_s3 + $0x8] sm:$0xf] %vm121_vm0, %v119_v16 }
  0xa6   :  { %v109_v17 = vpop.f32.mrf.mxu0  ;;  %v114_v18 = vpop.f32.mrf.mxu1 }
  0xa7   :  { %v110_v19 = vadd.f32 %v188_v10, %v109_v17  ;;  %v115_v20 = vadd.f32 %v188_v10, %v114_v18 }
  0xa9   :  { %v118_v21 = vpack.c.bf16 %v110_v19, %v110_v19  ;;  %v120_v22 = vpack.c.bf16 %v115_v20, %v115_v20 }
  0xab   :  { %123 = vst.msk [vmem:[%s257_s3 + $0x4] sm:$0xf] %vm121_vm0, %v118_v21 }
  0xac   :  { %125 = vst.msk [vmem:[%s257_s3 + $0xc] sm:$0xf] %vm121_vm0, %v120_v22 }

// kernel: _lambda_.31
= control target key start
LH: loop header
LB: loop body
LE: loop exit
PB: predicated region body
PF: predicated region fallthrough
CT: control target
= control target key end

     0   :  { %vm65_vm0 = vcmask 523264   ;;  %vm99_vm1 = vcmask 125952   ;;  %s198_s1 = inlined_call_operand.vmem [shape: bf16[64,16], index: 1, kind: input, shape index: {}]   ;;  %s199_s2 = inlined_call_operand.vmem [shape: f32[1,16], index: 2, kind: input, shape index: {}]   ;;  %s200_s0 = inlined_call_operand.vmem [shape: bf16[32,64], index: 0, kind: input, shape index: {}]   ;;  %s201_s3 = inlined_call_operand.vmem [shape: bf16[32,16], index: 3, kind: output, shape index: {}]  }
   0x1   :  { %v139_v0 = vld [vmem:[%s198_s1 + $0x18] sm:$0xff]  ;;  %v138_v1 = vld [vmem:[%s198_s1 + $0x10] sm:$0xff]  ;;  %v137_v2 = vld [vmem:[%s198_s1 + $0x8] sm:$0xff] }
   0x2   :  { %76 = vmatpush.bf16.msra.mxu0 %v139_v0  ;;  %140 = vmatpush.bf16.msra.mxu1 %v139_v0  ;;  %v136_v3 = vld [vmem:[%s198_s1] sm:$0xff]  ;;  %v135_v5 = vld [vmem:[%s200_s0 + $0x8] sm:$0xff] }
   0x3   :  { %v134_v4 = vld [vmem:[%s200_s0] sm:$0xff] }
   0x4   :  { %v144_v6 = vld [vmem:[%s199_s2] ss:$0 sm:$0xff] }
   0x6   :  { %77 = vmatpush.bf16.msra.mxu0 %v138_v1  ;;  %141 = vmatpush.bf16.msra.mxu1 %v138_v1 }
   0xa   :  { %78 = vmatpush.bf16.msra.mxu0 %v137_v2  ;;  %142 = vmatpush.bf16.msra.mxu1 %v137_v2 }
   0xe   :  { %79 = vmatpush.bf16.msra.mxu0 %v136_v3  ;;  %143 = vmatpush.bf16.msra.mxu1 %v136_v3 }
  0x11   :  { %132 = vmatmul.msk.bf16.vlgmr.msra.gmra.mxu0 %vm65_vm0, %v134_v4  ;;  %133 = vmatmul.msk.bf16.vlgmr.msra.gmra.mxu1 %vm65_vm0, %v135_v5 }
  0x8e   :  { %v81_v7 = vpop.f32.mrf.mxu0  ;;  %v86_v8 = vpop.f32.mrf.mxu1 }
  0x8f   :  { %v82_v9 = vadd.f32 %v144_v6, %v81_v7  ;;  %v87_v10 = vadd.f32 %v144_v6, %v86_v8 }
  0x91   :  { %v91_v11 = vmax.f32 %v82_v9, 0.0  ;;  %v93_v12 = vmax.f32 %v87_v10, 0.0 }
  0x93   :  { %v95_v13 = vpack.c.bf16 %v91_v11, %v91_v11  ;;  %v97_v14 = vpack.c.bf16 %v93_v12, %v93_v12 }
  0x95   :  { %100 = vst.msk [vmem:[%s201_s3] sm:$0xf] %vm99_vm1, %v95_v13 }
  0x96   :  { %102 = vst.msk [vmem:[%s201_s3 + $0x8] sm:$0xf] %vm99_vm1, %v97_v14  ;;  %v83_v15 = vpop.f32.mrf.mxu0  ;;  %v88_v16 = vpop.f32.mrf.mxu1 }
  0x97   :  { %v84_v17 = vadd.f32 %v144_v6, %v83_v15  ;;  %v89_v18 = vadd.f32 %v144_v6, %v88_v16 }
  0x99   :  { %v92_v19 = vmax.f32 %v84_v17, 0.0  ;;  %v94_v20 = vmax.f32 %v89_v18, 0.0 }
  0x9b   :  { %v96_v21 = vpack.c.bf16 %v92_v19, %v92_v19  ;;  %v98_v22 = vpack.c.bf16 %v94_v20, %v94_v20 }
  0x9d   :  { %101 = vst.msk [vmem:[%s201_s3 + $0x4] sm:$0xf] %vm99_vm1, %v96_v21 }
  0x9e   :  { %103 = vst.msk [vmem:[%s201_s3 + $0xc] sm:$0xf] %vm99_vm1, %v98_v22 }

// kernel: _lambda_.32
= control target key start
LH: loop header
LB: loop body
LE: loop exit
PB: predicated region body
PF: predicated region fallthrough
CT: control target
= control target key end

     0   :  { %vm41_vm0 = vcmask 130048   ;;  %vm71_vm1 = vcmask 519168   ;;  %s143_s1 = inlined_call_operand.vmem [shape: bf16[16,64], index: 1, kind: input, shape index: {}]   ;;  %s144_s0 = inlined_call_operand.vmem [shape: bf16[32,16], index: 0, kind: input, shape index: {}]   ;;  %s145_s2 = inlined_call_operand.vmem [shape: f32[1,64], index: 2, kind: input, shape index: {}]   ;;  %s146_s3 = inlined_call_operand.vmem [shape: bf16[32,64], index: 3, kind: output, shape index: {}]  }
   0x1   :  { %v96_v0 = vld [vmem:[%s143_s1] sm:$0xff]  ;;  %v95_v2 = vld [vmem:[%s144_s0 + $0x8] sm:$0xff] }
   0x2   :  { %v94_v1 = vld [vmem:[%s144_s0] sm:$0xff]  ;;  %55 = vmatpush.bf16.msra.mxu0 %v96_v0  ;;  %97 = vmatpush.bf16.msra.mxu1 %v96_v0 }
   0x3   :  { %v98_v3 = vld [vmem:[%s145_s2] ss:$0 sm:$0xff] }
   0x5   :  { %92 = vmatmul.msk.bf16.vlgmr.msra.gmra.mxu0 %vm41_vm0, %v94_v1  ;;  %93 = vmatmul.msk.bf16.vlgmr.msra.gmra.mxu1 %vm41_vm0, %v95_v2 }
  0x82   :  { %v57_v4 = vpop.f32.mrf.mxu0  ;;  %v62_v5 = vpop.f32.mrf.mxu1 }
  0x83   :  { %v58_v6 = vadd.f32 %v98_v3, %v57_v4  ;;  %v63_v7 = vadd.f32 %v98_v3, %v62_v5 }
  0x85   :  { %v67_v8 = vpack.c.bf16 %v58_v6, %v58_v6  ;;  %v69_v9 = vpack.c.bf16 %v63_v7, %v63_v7 }
  0x87   :  { %72 = vst.msk [vmem:[%s146_s3] sm:$0xf] %vm71_vm1, %v67_v8 }
  0x88   :  { %74 = vst.msk [vmem:[%s146_s3 + $0x8] sm:$0xf] %vm71_vm1, %v69_v9 }
  0x8a   :  { %v59_v10 = vpop.f32.mrf.mxu0  ;;  %v64_v11 = vpop.f32.mrf.mxu1 }
  0x8b   :  { %v60_v12 = vadd.f32 %v98_v3, %v59_v10  ;;  %v65_v13 = vadd.f32 %v98_v3, %v64_v11 }
  0x8d   :  { %v68_v14 = vpack.c.bf16 %v60_v12, %v60_v12  ;;  %v70_v15 = vpack.c.bf16 %v65_v13, %v65_v13 }
  0x8f   :  { %73 = vst.msk [vmem:[%s146_s3 + $0x4] sm:$0xf] %vm71_vm1, %v68_v14 }
  0x90   :  { %75 = vst.msk [vmem:[%s146_s3 + $0xc] sm:$0xf] %vm71_vm1, %v70_v15 }

// kernel: _lambda_.33
= control target key start
LH: loop header
LB: loop body
LE: loop exit
PB: predicated region body
PF: predicated region fallthrough
CT: control target
= control target key end

     0   :  { %s646_s12 = smov 0   ;;  %s648_s13 = smov 0   ;;  %s717_s0 = inlined_call_operand.vmem [shape: bf16[2,64], index: 0, kind: input, shape index: {}]   ;;  %s718_s1 = inlined_call_operand.vmem [shape: bf16[64,512], index: 1, kind: input, shape index: {}]   ;;  %s719_s2 = inlined_call_operand.vmem [shape: f32[1,512], index: 2, kind: input, shape index: {}]   ;;  %s720_s3 = inlined_call_operand.vmem [shape: bf16[2,512], index: 3, kind: output, shape index: {}]  }
   0x1   :  { %s650_s14 = smov 0   ;;  %s652_s15 = smov 0  }
   0x2   :  { %s654_s16 = smov 0  }
   0x3 LB: > { %s22_s17 = sadd.s32 1, %s620_s15  ;;  %p65_p1 = scmp.ne.s32.totalorder %s612_s13, %s608_s12  ;;  %s624_s16 = sphi %s654_s16, %s13_s16   ;;  %s620_s15 = sphi %s652_s15, %s724_s15   ;;  %s616_s14 = sphi %s650_s14, %s723_s14   ;;  %s612_s13 = sphi %s648_s13, %s722_s13   ;;  %s608_s12 = sphi %s646_s12, %s721_s12  }
   0x4   : > { %p23_p0 = scmp.ge.s32.totalorder %s22_s17, 2  ;;  %p66_p2 = scmp.eq.s32.totalorder %s624_s16, 0 }
   0x5   : > { %s58_s19 = sadd.s32 1, %s612_s13  ;;  %p493_p5 = scmp.ge.s32.totalorder %s624_s16, 2 }
   0x6   : > { %s726_s17 = smov (%p23_p0, %s22_s17), 0  ;;  %p67_p3 = por %p66_p2, %p65_p1 }
   0x7   : > { %s55_s18 = ssub.s32 %s620_s15, %s726_s17  ;;  %151 = sbr.rel (%p493_p5) target bundleno = 24 (0x18), region = 20 }
   0x8   : > { %p56_p4 = scmp.eq.s32.totalorder %s55_s18, 0 }
   0xa   : > { %s681_s20 = scalar_select %p56_p4, %s612_s13, %s58_s19  }
   0xc   : > { %154 = sbr.rel (!%p67_p3) target bundleno = 24 (0x18), region = 24  ;;  %s156_s21 = sand.u32 (%p67_p3), 1, %s612_s13  }
   0xd   : > { %s537_s22 = sshll.u32 (%p67_p3), %s620_s15, 3  ;;  %s494_s23 = sshll.u32 (%p67_p3), %s156_s21, 6 }
   0xe   : > { %s161_s26 = scalar_lea.vmem (%p67_p3), %s718_s1, %s537_s22  ;;  %s158_s27 = scalar_lea.vmem (%p67_p3), [#allocation2], %s494_s23 }
   0xf   : > { %v204_v0 = vld [vmem:[%s161_s26] sm:$0xff] (%p67_p3)  ;;  %v206_v1 = vld [vmem:[%s161_s26 + $0x10] sm:$0xff] (%p67_p3) }
  0x10   : > { %v208_v2 = vld [vmem:[%s161_s26 + $0x20] sm:$0xff] (%p67_p3)  ;;  %205 = vst [vmem:[%s158_s27] sm:$0xff] (%p67_p3), %v204_v0  ;;  %v210_v3 = vld [vmem:[%s161_s26 + $0x30] sm:$0xff] (%p67_p3) }
  0x11   : > { %207 = vst [vmem:[%s158_s27 + $0x8] sm:$0xff] %v206_v1  ;;  %v212_v4 = vld [vmem:[%s161_s26 + $0x40] sm:$0xff]  ;;  %v214_v5 = vld [vmem:[%s161_s26 + $0x50] sm:$0xff] }
  0x12   : > { %209 = vst [vmem:[%s158_s27 + $0x10] sm:$0xff] %v208_v2  ;;  %v216_v6 = vld [vmem:[%s161_s26 + $0x60] sm:$0xff]  ;;  %v218_v7 = vld [vmem:[%s161_s26 + $0x70] sm:$0xff] }
  0x13   : > { %211 = vst [vmem:[%s158_s27 + $0x18] sm:$0xff] %v210_v3 }
  0x14   : > { %213 = vst [vmem:[%s158_s27 + $0x20] sm:$0xff] %v212_v4 }
  0x15   : > { %215 = vst [vmem:[%s158_s27 + $0x28] sm:$0xff] %v214_v5 }
  0x16   : > { %217 = vst [vmem:[%s158_s27 + $0x30] sm:$0xff] %v216_v6 }
  0x17   : > { %219 = vst [vmem:[%s158_s27 + $0x38] sm:$0xff] %v218_v7 }
  0x18 PF: > { %p497_p6 = scmp.ge.s32.totalorder %s624_s16, 1  ;;  %p232_p7 = scmp.lt.s32.totalorder %s624_s16, 3 }
  0x1a   : > { %p233_p8 = pnand %p497_p6, %p232_p7 }
  0x1b   : > { %s239_s28 = sand.u32 (!%p233_p8), 1, %s608_s12   ;;  %s499_s6 = sshll.u32 (!%p233_p8), %s616_s14, 1 }
  0x1c   : > { %236 = sbr.rel (%p233_p8) target bundleno = 188 (0xbc), region = 66  ;;  %s498_s29 = sshll.u32 (!%p233_p8), %s239_s28, 6 }
  0x1d   : > { %s241_s30 = scalar_lea.vmem (!%p233_p8), [#allocation2], %s498_s29  ;;  %p277_p9 = scmp.lt.s32.totalorder (!%p233_p8), %s499_s6, 3 }
  0x21   : > { %v527_v8 = vld [vmem:[%s241_s30 + $0x30] sm:$0xf]  ;;  %v545_v9 = vld [vmem:[%s241_s30 + $0x34] sm:$0xf0]  ;;  %v544_v10 = vld [vmem:[%s241_s30 + $0x34] sm:$0xf] }
  0x22   : > { %v528_v11 = vor.u32 %v545_v9, %v527_v8  ;;  %v529_v12 = vld [vmem:[%s241_s30 + $0x38] sm:$0xf0]  ;;  %v519_v13 = vld [vmem:[%s241_s30 + $0x20] sm:$0xf]  ;;  %v543_v14 = vld [vmem:[%s241_s30 + $0x24] sm:$0xf0] }
  0x23   : > { %v532_v15 = vor.u32 %v544_v10, %v529_v12  ;;  %v542_v16 = vld [vmem:[%s241_s30 + $0x24] sm:$0xf]  ;;  %v521_v17 = vld [vmem:[%s241_s30 + $0x28] sm:$0xf0]  ;;  %v520_v18 = vor.u32 %v543_v14, %v519_v13  ;;  %v511_v20 = vld [vmem:[%s241_s30 + $0x10] sm:$0xf] }
  0x24   : > { %354 = vmatpush.bf16.msra.mxu0 %v528_v11  ;;  %v524_v19 = vor.u32 %v542_v16, %v521_v17  ;;  %v541_v21 = vld [vmem:[%s241_s30 + $0x14] sm:$0xf0]  ;;  %v540_v22 = vld [vmem:[%s241_s30 + $0x14] sm:$0xf]  ;;  %v513_v23 = vld [vmem:[%s241_s30 + $0x18] sm:$0xf0] }
  0x25   : > { %367 = vmatpush.bf16.msra.mxu1 %v532_v15  ;;  %v512_v24 = vor.u32 %v541_v21, %v511_v20  ;;  %v516_v25 = vor.u32 %v540_v22, %v513_v23  ;;  %v503_v26 = vld [vmem:[%s241_s30] sm:$0xf]  ;;  %v539_v27 = vld [vmem:[%s241_s30 + $0x4] sm:$0xf0]  ;;  %v538_v28 = vld [vmem:[%s241_s30 + $0x4] sm:$0xf] }
  0x26   : > { %v505_v29 = vld [vmem:[%s241_s30 + $0x8] sm:$0xf0]  ;;  %v504_v30 = vor.u32 %v539_v27, %v503_v26  ;;  %v291_v32 = vld [vmem:[%s717_s0] sm:$0x1]  ;;  %vm346_vm0 = vcmask 523264   ;;  %s728_s6 = smov (!%p277_p9, %s499_s6), 3 }
  0x27   : > { %v508_v31 = vor.u32 %v538_v28, %v505_v29  ;;  %s279_s9 = scalar_lea.vmem %s719_s2, %s728_s6  ;;  %vm381_vm1 = vcmask 1040384   ;;  %s288_s12 = scalar_lea.vmem %s720_s3, %s728_s6 }
  0x28   : > { %355 = vmatpush.bf16.msra.mxu0 %v520_v18  ;;  %v300_v33 = vld [vmem:[%s279_s9] sm:$0x3] }
  0x29   : > { %368 = vmatpush.bf16.msra.mxu1 %v524_v19  ;;  %v302_v34 = vperm.slane %v300_v33, 0  ;;  %v303_v35 = vperm.slane %v300_v33, 1 }
  0x2c   : > { %356 = vmatpush.bf16.msra.mxu0 %v512_v24 }
  0x2d   : > { %369 = vmatpush.bf16.msra.mxu1 %v516_v25 }
  0x30   : > { %357 = vmatpush.bf16.msra.mxu0 %v504_v30 }
  0x31   : > { %370 = vmatpush.bf16.msra.mxu1 %v508_v31 }
  0x33   : > { %533 = vmatmul.msk.bf16.vlgmr.msra.gmra.mxu0 %vm346_vm0, %v291_v32 }
  0x34   : > { %534 = vmatmul.msk.bf16.vlgmr.msra.gmra.mxu1 %vm346_vm0, %v291_v32 }
  0xb0   : > { %v359_v36 = vpop.f32.mrf.mxu0 }
  0xb1   : > { %v360_v37 = vadd.f32 %v359_v36, %v302_v34  ;;  %v372_v38 = vpop.f32.mrf.mxu1 }
  0xb2   : > { %v373_v39 = vadd.f32 %v372_v38, %v303_v35 }
  0xb3   : > { %v376_v40 = vmax.f32 %v360_v37, 0.0 }
  0xb4   : > { %v377_v41 = vmax.f32 %v373_v39, 0.0 }
  0xb6   : > { %v378_v42 = vpack.c.bf16 %v377_v41, %v376_v40 }
  0xb8   : > { %v380_v43 = vrot.slane %v378_v42, 3  ;;  %v361_v44 = vpop.f32.mrf.mxu0 }
  0xb9   : > { %v374_v45 = vpop.f32.mrf.mxu1 }
  0xba   : > { %v384_v46 = vsel %vm381_vm1, %v378_v42, %v380_v43 }
  0xbb   : > { %386 = vst [vmem:[%s288_s12] sm:$0x3] %v384_v46 }
  0xbc PF: > { %s13_s16 = sadd.s32 1, %s624_s16   ;;  %s721_s12 = smov %s612_s13 }
  0xbd   : > { %p10_p10 = scmp.ge.s32.totalorder %s13_s16, 4   ;;  %s722_s13 = smov %s681_s20 }
  0xbe   : > { %s723_s14 = smov %s620_s15  ;;  %s724_s15 = smov %s726_s17 }
  0xbf   :  { %12 = sbr.rel (!%p10_p10) target bundleno = 3 (0x3), region = 111 }

// kernel: _lambda_.34
= control target key start
LH: loop header
LB: loop body
LE: loop exit
PB: predicated region body
PF: predicated region fallthrough
CT: control target
= control target key end

     0   :  { %vm524_vm0 = vcmask 1040384   ;;  %s1283_s1 = inlined_call_operand.vmem [shape: bf16[512,256], index: 1, kind: input, shape index: {}]   ;;  %s1284_s0 = inlined_call_operand.vmem [shape: bf16[2,512], index: 0, kind: input, shape index: {}]   ;;  %s1285_s2 = inlined_call_operand.vmem [shape: f32[1,256], index: 2, kind: input, shape index: {}]   ;;  %s1286_s3 = inlined_call_operand.vmem [shape: bf16[2,256], index: 3, kind: output, shape index: {}]  }
   0x1   :  { %v592_v0 = vld [vmem:[%s1283_s1 + $0x70] sm:$0xf]  ;;  %v805_v1 = vld [vmem:[%s1283_s1 + $0x74] sm:$0xf0]  ;;  %v584_v11 = vld [vmem:[%s1283_s1 + $0x60] sm:$0xf] }
   0x2   :  { %v656_v2 = vld [vmem:[%s1283_s1 + $0xf0] sm:$0xf]  ;;  %v593_v3 = vor.u32 %v805_v1, %v592_v0  ;;  %v821_v4 = vld [vmem:[%s1283_s1 + $0xf4] sm:$0xf0]  ;;  %v803_v13 = vld [vmem:[%s1283_s1 + $0x64] sm:$0xf0] }
   0x3   :  { %v720_v5 = vld [vmem:[%s1283_s1 + $0x170] sm:$0xf]  ;;  %v837_v6 = vld [vmem:[%s1283_s1 + $0x174] sm:$0xf0]  ;;  %v657_v7 = vor.u32 %v821_v4, %v656_v2  ;;  %v648_v14 = vld [vmem:[%s1283_s1 + $0xe0] sm:$0xf]  ;;  %v585_v16 = vor.u32 %v803_v13, %v584_v11 }
   0x4   :  { %v721_v8 = vor.u32 %v837_v6, %v720_v5  ;;  %v784_v9 = vld [vmem:[%s1283_s1 + $0x1f0] sm:$0xf]  ;;  %v853_v10 = vld [vmem:[%s1283_s1 + $0x1f4] sm:$0xf0]  ;;  %415 = vmatpush.bf16.msra.mxu0 %v593_v3  ;;  %v819_v15 = vld [vmem:[%s1283_s1 + $0xe4] sm:$0xf0] }
   0x5   :  { %v785_v12 = vor.u32 %v853_v10, %v784_v9  ;;  %428 = vmatpush.bf16.msra.mxu1 %v657_v7  ;;  %v649_v17 = vor.u32 %v819_v15, %v648_v14  ;;  %v712_v18 = vld [vmem:[%s1283_s1 + $0x160] sm:$0xf]  ;;  %v835_v19 = vld [vmem:[%s1283_s1 + $0x164] sm:$0xf0]  ;;  %v576_v23 = vld [vmem:[%s1283_s1 + $0x50] sm:$0xf] }
   0x6   :  { %441 = vmatpush.bf16.msra.mxu2 %v721_v8  ;;  %v776_v20 = vld [vmem:[%s1283_s1 + $0x1e0] sm:$0xf]  ;;  %v713_v21 = vor.u32 %v835_v19, %v712_v18  ;;  %v851_v22 = vld [vmem:[%s1283_s1 + $0x1e4] sm:$0xf0]  ;;  %v801_v24 = vld [vmem:[%s1283_s1 + $0x54] sm:$0xf0] }
   0x7   :  { %454 = vmatpush.bf16.msra.mxu3 %v785_v12  ;;  %v777_v25 = vor.u32 %v851_v22, %v776_v20  ;;  %v640_v26 = vld [vmem:[%s1283_s1 + $0xd0] sm:$0xf]  ;;  %v817_v27 = vld [vmem:[%s1283_s1 + $0xd4] sm:$0xf0]  ;;  %v577_v29 = vor.u32 %v801_v24, %v576_v23  ;;  %v568_v35 = vld [vmem:[%s1283_s1 + $0x40] sm:$0xf] }
   0x8   :  { %v704_v28 = vld [vmem:[%s1283_s1 + $0x150] sm:$0xf]  ;;  %416 = vmatpush.bf16.msra.mxu0 %v585_v16  ;;  %v833_v30 = vld [vmem:[%s1283_s1 + $0x154] sm:$0xf0]  ;;  %v641_v33 = vor.u32 %v817_v27, %v640_v26  ;;  %v799_v36 = vld [vmem:[%s1283_s1 + $0x44] sm:$0xf0] }
   0x9   :  { %v768_v31 = vld [vmem:[%s1283_s1 + $0x1d0] sm:$0xf]  ;;  %v849_v32 = vld [vmem:[%s1283_s1 + $0x1d4] sm:$0xf0]  ;;  %429 = vmatpush.bf16.msra.mxu1 %v649_v17  ;;  %v705_v34 = vor.u32 %v833_v30, %v704_v28  ;;  %v632_v37 = vld [vmem:[%s1283_s1 + $0xc0] sm:$0xf]  ;;  %v569_v44 = vor.u32 %v799_v36, %v568_v35 }
   0xa   :  { %442 = vmatpush.bf16.msra.mxu2 %v713_v21  ;;  %v769_v38 = vor.u32 %v849_v32, %v768_v31  ;;  %v815_v39 = vld [vmem:[%s1283_s1 + $0xc4] sm:$0xf0]  ;;  %v696_v40 = vld [vmem:[%s1283_s1 + $0x140] sm:$0xf]  ;;  %v560_v47 = vld [vmem:[%s1283_s1 + $0x30] sm:$0xf] }
   0xb   :  { %455 = vmatpush.bf16.msra.mxu3 %v777_v25  ;;  %v831_v41 = vld [vmem:[%s1283_s1 + $0x144] sm:$0xf0]  ;;  %v760_v42 = vld [vmem:[%s1283_s1 + $0x1c0] sm:$0xf]  ;;  %v633_v45 = vor.u32 %v815_v39, %v632_v37  ;;  %v797_v48 = vld [vmem:[%s1283_s1 + $0x34] sm:$0xf0] }
   0xc   :  { %v847_v43 = vld [vmem:[%s1283_s1 + $0x1c4] sm:$0xf0]  ;;  %417 = vmatpush.bf16.msra.mxu0 %v577_v29  ;;  %v697_v46 = vor.u32 %v831_v41, %v696_v40  ;;  %v624_v49 = vld [vmem:[%s1283_s1 + $0xb0] sm:$0xf]  ;;  %v813_v51 = vld [vmem:[%s1283_s1 + $0xb4] sm:$0xf0]  ;;  %v561_v56 = vor.u32 %v797_v48, %v560_v47 }
   0xd   :  { %430 = vmatpush.bf16.msra.mxu1 %v641_v33  ;;  %v761_v50 = vor.u32 %v847_v43, %v760_v42  ;;  %v688_v52 = vld [vmem:[%s1283_s1 + $0x130] sm:$0xf]  ;;  %v829_v53 = vld [vmem:[%s1283_s1 + $0x134] sm:$0xf0]  ;;  %v625_v57 = vor.u32 %v813_v51, %v624_v49  ;;  %v552_v59 = vld [vmem:[%s1283_s1 + $0x20] sm:$0xf] }
   0xe   :  { %443 = vmatpush.bf16.msra.mxu2 %v705_v34  ;;  %v752_v54 = vld [vmem:[%s1283_s1 + $0x1b0] sm:$0xf]  ;;  %v845_v55 = vld [vmem:[%s1283_s1 + $0x1b4] sm:$0xf0]  ;;  %v689_v58 = vor.u32 %v829_v53, %v688_v52  ;;  %v795_v60 = vld [vmem:[%s1283_s1 + $0x24] sm:$0xf0] }
   0xf   :  { %456 = vmatpush.bf16.msra.mxu3 %v769_v38  ;;  %v616_v61 = vld [vmem:[%s1283_s1 + $0xa0] sm:$0xf]  ;;  %v753_v62 = vor.u32 %v845_v55, %v752_v54  ;;  %v811_v63 = vld [vmem:[%s1283_s1 + $0xa4] sm:$0xf0]  ;;  %v553_v4 = vor.u32 %v795_v60, %v552_v59  ;;  %v544_v7 = vld [vmem:[%s1283_s1 + $0x10] sm:$0xf] }
  0x10   :  { %418 = vmatpush.bf16.msra.mxu0 %v569_v44  ;;  %v680_v0 = vld [vmem:[%s1283_s1 + $0x120] sm:$0xf]  ;;  %v827_v1 = vld [vmem:[%s1283_s1 + $0x124] sm:$0xf0]  ;;  %v617_v5 = vor.u32 %v811_v63, %v616_v61  ;;  %v793_v8 = vld [vmem:[%s1283_s1 + $0x14] sm:$0xf0] }
  0x11   :  { %431 = vmatpush.bf16.msra.mxu1 %v633_v45  ;;  %v744_v2 = vld [vmem:[%s1283_s1 + $0x1a0] sm:$0xf]  ;;  %v843_v3 = vld [vmem:[%s1283_s1 + $0x1a4] sm:$0xf0]  ;;  %v681_v6 = vor.u32 %v827_v1, %v680_v0  ;;  %v608_v9 = vld [vmem:[%s1283_s1 + $0x90] sm:$0xf]  ;;  %v545_v17 = vor.u32 %v793_v8, %v544_v7 }
  0x12   :  { %444 = vmatpush.bf16.msra.mxu2 %v697_v46  ;;  %v745_v10 = vor.u32 %v843_v3, %v744_v2  ;;  %v809_v11 = vld [vmem:[%s1283_s1 + $0x94] sm:$0xf0]  ;;  %v672_v12 = vld [vmem:[%s1283_s1 + $0x110] sm:$0xf]  ;;  %v536_v16 = vld [vmem:[%s1283_s1] sm:$0xf] }
  0x13   :  { %457 = vmatpush.bf16.msra.mxu3 %v761_v50  ;;  %v825_v13 = vld [vmem:[%s1283_s1 + $0x114] sm:$0xf0]  ;;  %v736_v14 = vld [vmem:[%s1283_s1 + $0x190] sm:$0xf]  ;;  %v791_v18 = vld [vmem:[%s1283_s1 + $0x4] sm:$0xf0]  ;;  %v609_v21 = vor.u32 %v809_v11, %v608_v9 }
  0x14   :  { %419 = vmatpush.bf16.msra.mxu0 %v561_v56  ;;  %v841_v15 = vld [vmem:[%s1283_s1 + $0x194] sm:$0xf0]  ;;  %v600_v19 = vld [vmem:[%s1283_s1 + $0x80] sm:$0xf]  ;;  %v807_v20 = vld [vmem:[%s1283_s1 + $0x84] sm:$0xf0]  ;;  %v673_v22 = vor.u32 %v825_v13, %v672_v12  ;;  %v537_v33 = vor.u32 %v791_v18, %v536_v16 }
  0x15   :  { %432 = vmatpush.bf16.msra.mxu1 %v625_v57  ;;  %v664_v23 = vld [vmem:[%s1283_s1 + $0x100] sm:$0xf]  ;;  %v823_v24 = vld [vmem:[%s1283_s1 + $0x104] sm:$0xf0]  ;;  %v737_v26 = vor.u32 %v841_v15, %v736_v14  ;;  %v804_v28 = vld [vmem:[%s1283_s1 + $0x74] sm:$0xf]  ;;  %v601_v36 = vor.u32 %v807_v20, %v600_v19 }
  0x16   :  { %445 = vmatpush.bf16.msra.mxu2 %v689_v58  ;;  %v728_v25 = vld [vmem:[%s1283_s1 + $0x180] sm:$0xf]  ;;  %v839_v27 = vld [vmem:[%s1283_s1 + $0x184] sm:$0xf0]  ;;  %v594_v29 = vld [vmem:[%s1283_s1 + $0x78] sm:$0xf0]  ;;  %v665_v37 = vor.u32 %v823_v24, %v664_v23 }
  0x17   :  { %458 = vmatpush.bf16.msra.mxu3 %v753_v62  ;;  %v820_v30 = vld [vmem:[%s1283_s1 + $0xf4] sm:$0xf]  ;;  %v658_v31 = vld [vmem:[%s1283_s1 + $0xf8] sm:$0xf0]  ;;  %v14_v32 = vld [vmem:[%s1284_s0] sm:$0xf]  ;;  %v729_v40 = vor.u32 %v839_v27, %v728_v25  ;;  %v597_v41 = vor.u32 %v804_v28, %v594_v29 }
  0x18   :  { %420 = vmatpush.bf16.msra.mxu0 %v553_v4  ;;  %v836_v34 = vld [vmem:[%s1283_s1 + $0x174] sm:$0xf]  ;;  %v722_v35 = vld [vmem:[%s1283_s1 + $0x178] sm:$0xf0]  ;;  %86 = vst [vmem:[#allocation1] ss:$9 sm:$0xff] %v14_v32  ;;  %v661_v42 = vor.u32 %v820_v30, %v658_v31 }
  0x19   :  { %433 = vmatpush.bf16.msra.mxu1 %v617_v5  ;;  %v852_v38 = vld [vmem:[%s1283_s1 + $0x1f4] sm:$0xf]  ;;  %v786_v39 = vld [vmem:[%s1283_s1 + $0x1f8] sm:$0xf0]  ;;  %v725_v43 = vor.u32 %v836_v34, %v722_v35  ;;  %v802_v44 = vld [vmem:[%s1283_s1 + $0x64] sm:$0xf] }
  0x1a   :  { %446 = vmatpush.bf16.msra.mxu2 %v681_v6  ;;  %v586_v45 = vld [vmem:[%s1283_s1 + $0x68] sm:$0xf0]  ;;  %v818_v46 = vld [vmem:[%s1283_s1 + $0xe4] sm:$0xf]  ;;  %v789_v47 = vor.u32 %v852_v38, %v786_v39  ;;  %v800_v53 = vld [vmem:[%s1283_s1 + $0x54] sm:$0xf] }
  0x1b   :  { %459 = vmatpush.bf16.msra.mxu3 %v745_v10  ;;  %v650_v48 = vld [vmem:[%s1283_s1 + $0xe8] sm:$0xf0]  ;;  %v834_v49 = vld [vmem:[%s1283_s1 + $0x164] sm:$0xf]  ;;  %v589_v54 = vor.u32 %v802_v44, %v586_v45  ;;  %v578_v55 = vld [vmem:[%s1283_s1 + $0x58] sm:$0xf0] }
  0x1c   :  { %421 = vmatpush.bf16.msra.mxu0 %v545_v17  ;;  %v714_v50 = vld [vmem:[%s1283_s1 + $0x168] sm:$0xf0]  ;;  %v850_v51 = vld [vmem:[%s1283_s1 + $0x1e4] sm:$0xf]  ;;  %v816_v56 = vld [vmem:[%s1283_s1 + $0xd4] sm:$0xf]  ;;  %v653_v58 = vor.u32 %v818_v46, %v650_v48  ;;  %v581_v5 = vor.u32 %v800_v53, %v578_v55 }
  0x1d   :  { %434 = vmatpush.bf16.msra.mxu1 %v609_v21  ;;  %v778_v52 = vld [vmem:[%s1283_s1 + $0x1e8] sm:$0xf0]  ;;  %v642_v57 = vld [vmem:[%s1283_s1 + $0xd8] sm:$0xf0]  ;;  %v717_v59 = vor.u32 %v834_v49, %v714_v50  ;;  %v832_v0 = vld [vmem:[%s1283_s1 + $0x154] sm:$0xf] }
  0x1e   :  { %447 = vmatpush.bf16.msra.mxu2 %v673_v22  ;;  %v781_v63 = vor.u32 %v850_v51, %v778_v52  ;;  %v706_v1 = vld [vmem:[%s1283_s1 + $0x158] sm:$0xf0]  ;;  %v848_v3 = vld [vmem:[%s1283_s1 + $0x1d4] sm:$0xf]  ;;  %v645_v6 = vor.u32 %v816_v56, %v642_v57  ;;  %v798_v8 = vld [vmem:[%s1283_s1 + $0x44] sm:$0xf] }
  0x1f   :  { %460 = vmatpush.bf16.msra.mxu3 %v737_v26  ;;  %v1129_v60 = vld [vmem:[#allocation1 + $0x12] sm:$0xff]  ;;  %v1131_v61 = vld [vmem:[#allocation1] sm:$0xff]  ;;  %v1142_v2 = vld [vmem:[#allocation1 + $0x9] sm:$0xff]  ;;  %v709_v7 = vor.u32 %v832_v0, %v706_v1 }
  0x20   :  { %422 = vmatpush.bf16.msra.mxu0 %v537_v33  ;;  %v1133_v62 = vld [vmem:[#allocation1 + $0x1b] sm:$0xff]  ;;  %v570_v9 = vld [vmem:[%s1283_s1 + $0x48] sm:$0xf0]  ;;  %v814_v10 = vld [vmem:[%s1283_s1 + $0xc4] sm:$0xf] }
  0x21   :  { %435 = vmatpush.bf16.msra.mxu1 %v601_v36  ;;  %v770_v4 = vld [vmem:[%s1283_s1 + $0x1d8] sm:$0xf0]  ;;  %v634_v12 = vld [vmem:[%s1283_s1 + $0xc8] sm:$0xf0]  ;;  %v830_v13 = vld [vmem:[%s1283_s1 + $0x144] sm:$0xf]  ;;  %v573_v17 = vor.u32 %v798_v8, %v570_v9 }
  0x22   :  { %448 = vmatpush.bf16.msra.mxu2 %v665_v37  ;;  %v773_v11 = vor.u32 %v848_v3, %v770_v4  ;;  %v698_v14 = vld [vmem:[%s1283_s1 + $0x148] sm:$0xf0]  ;;  %v846_v15 = vld [vmem:[%s1283_s1 + $0x1c4] sm:$0xf]  ;;  %v637_v18 = vor.u32 %v814_v10, %v634_v12  ;;  %v796_v20 = vld [vmem:[%s1283_s1 + $0x34] sm:$0xf] }
  0x23   :  { %461 = vmatpush.bf16.msra.mxu3 %v729_v40  ;;  %423 = vmatmul.bf16.vlgmr.msra.gmra.mxu0 %v1131_v61  ;;  %v762_v16 = vld [vmem:[%s1283_s1 + $0x1c8] sm:$0xf0]  ;;  %v701_v19 = vor.u32 %v830_v13, %v698_v14  ;;  %v562_v21 = vld [vmem:[%s1283_s1 + $0x38] sm:$0xf0]  ;;  %v812_v22 = vld [vmem:[%s1283_s1 + $0xb4] sm:$0xf] }
  0x24   :  { %467 = vmatpush.bf16.msrb.mxu0 %v597_v41  ;;  %436 = vmatmul.bf16.vlgmr.msra.gmra.mxu1 %v1142_v2  ;;  %v765_v23 = vor.u32 %v846_v15, %v762_v16  ;;  %v626_v24 = vld [vmem:[%s1283_s1 + $0xb8] sm:$0xf0]  ;;  %v828_v25 = vld [vmem:[%s1283_s1 + $0x134] sm:$0xf]  ;;  %v565_v29 = vor.u32 %v796_v20, %v562_v21  ;;  %v794_v32 = vld [vmem:[%s1283_s1 + $0x24] sm:$0xf] }
  0x25   :  { %480 = vmatpush.bf16.msrb.mxu1 %v661_v42  ;;  %449 = vmatmul.bf16.vlgmr.msra.gmra.mxu2 %v1129_v60  ;;  %v690_v26 = vld [vmem:[%s1283_s1 + $0x138] sm:$0xf0]  ;;  %v844_v27 = vld [vmem:[%s1283_s1 + $0x1b4] sm:$0xf]  ;;  %v629_v30 = vor.u32 %v812_v22, %v626_v24  ;;  %v554_v33 = vld [vmem:[%s1283_s1 + $0x28] sm:$0xf0] }
  0x26   :  { %493 = vmatpush.bf16.msrb.mxu2 %v725_v43  ;;  %462 = vmatmul.bf16.vlgmr.msra.gmra.mxu3 %v1133_v62  ;;  %v754_v28 = vld [vmem:[%s1283_s1 + $0x1b8] sm:$0xf0]  ;;  %v693_v31 = vor.u32 %v828_v25, %v690_v26  ;;  %v810_v34 = vld [vmem:[%s1283_s1 + $0xa4] sm:$0xf]  ;;  %v618_v36 = vld [vmem:[%s1283_s1 + $0xa8] sm:$0xf0]  ;;  %v557_v41 = vor.u32 %v794_v32, %v554_v33 }
  0x27   :  { %506 = vmatpush.bf16.msrb.mxu3 %v789_v47  ;;  %v757_v35 = vor.u32 %v844_v27, %v754_v28  ;;  %v826_v37 = vld [vmem:[%s1283_s1 + $0x124] sm:$0xf]  ;;  %v682_v38 = vld [vmem:[%s1283_s1 + $0x128] sm:$0xf0]  ;;  %v621_v42 = vor.u32 %v810_v34, %v618_v36  ;;  %v792_v44 = vld [vmem:[%s1283_s1 + $0x14] sm:$0xf] }
  0x28   :  { %468 = vmatpush.bf16.msrb.mxu0 %v589_v54  ;;  %v842_v39 = vld [vmem:[%s1283_s1 + $0x1a4] sm:$0xf]  ;;  %v746_v40 = vld [vmem:[%s1283_s1 + $0x1a8] sm:$0xf0]  ;;  %v685_v43 = vor.u32 %v826_v37, %v682_v38  ;;  %v546_v45 = vld [vmem:[%s1283_s1 + $0x18] sm:$0xf0] }
  0x29   :  { %481 = vmatpush.bf16.msrb.mxu1 %v653_v58  ;;  %v808_v46 = vld [vmem:[%s1283_s1 + $0x94] sm:$0xf]  ;;  %v749_v47 = vor.u32 %v842_v39, %v746_v40  ;;  %v610_v48 = vld [vmem:[%s1283_s1 + $0x98] sm:$0xf0]  ;;  %v549_v53 = vor.u32 %v792_v44, %v546_v45  ;;  %v790_v56 = vld [vmem:[%s1283_s1 + $0x4] sm:$0xf] }
  0x2a   :  { %494 = vmatpush.bf16.msrb.mxu2 %v717_v59  ;;  %v824_v49 = vld [vmem:[%s1283_s1 + $0x114] sm:$0xf]  ;;  %v674_v50 = vld [vmem:[%s1283_s1 + $0x118] sm:$0xf0]  ;;  %v613_v54 = vor.u32 %v808_v46, %v610_v48  ;;  %v538_v57 = vld [vmem:[%s1283_s1 + $0x8] sm:$0xf0] }
  0x2b   :  { %507 = vmatpush.bf16.msrb.mxu3 %v781_v63  ;;  %v840_v51 = vld [vmem:[%s1283_s1 + $0x194] sm:$0xf]  ;;  %v738_v52 = vld [vmem:[%s1283_s1 + $0x198] sm:$0xf0]  ;;  %v677_v55 = vor.u32 %v824_v49, %v674_v50  ;;  %v806_v58 = vld [vmem:[%s1283_s1 + $0x84] sm:$0xf] }
  0x2c   :  { %469 = vmatpush.bf16.msrb.mxu0 %v581_v5  ;;  %v741_v59 = vor.u32 %v840_v51, %v738_v52  ;;  %v602_v63 = vld [vmem:[%s1283_s1 + $0x88] sm:$0xf0]  ;;  %v822_v0 = vld [vmem:[%s1283_s1 + $0x104] sm:$0xf]  ;;  %v541_v5 = vor.u32 %v790_v56, %v538_v57 }
  0x2d   :  { %482 = vmatpush.bf16.msrb.mxu1 %v645_v6  ;;  %v666_v1 = vld [vmem:[%s1283_s1 + $0x108] sm:$0xf0]  ;;  %v838_v3 = vld [vmem:[%s1283_s1 + $0x184] sm:$0xf]  ;;  %v605_v6 = vor.u32 %v806_v58, %v602_v63 }
  0x2e   :  { %495 = vmatpush.bf16.msrb.mxu2 %v709_v7  ;;  %v730_v4 = vld [vmem:[%s1283_s1 + $0x188] sm:$0xf0]  ;;  %v669_v7 = vor.u32 %v822_v0, %v666_v1 }
  0x2f   :  { %508 = vmatpush.bf16.msrb.mxu3 %v773_v11  ;;  %v733_v8 = vor.u32 %v838_v3, %v730_v4 }
  0x30   :  { %470 = vmatpush.bf16.msrb.mxu0 %v573_v17  ;;  %v79_v17 = vld [vmem:[%s1285_s2] sm:$0x3] }
  0x31   :  { %483 = vmatpush.bf16.msrb.mxu1 %v637_v18  ;;  %v81_v18 = vperm.slane %v79_v17, 0 }
  0x32   :  { %496 = vmatpush.bf16.msrb.mxu2 %v701_v19  ;;  %v82_v19 = vperm.slane %v79_v17, 1 }
  0x33   :  { %509 = vmatpush.bf16.msrb.mxu3 %v765_v23 }
  0x34   :  { %471 = vmatpush.bf16.msrb.mxu0 %v565_v29 }
  0x35   :  { %484 = vmatpush.bf16.msrb.mxu1 %v629_v30 }
  0x36   :  { %497 = vmatpush.bf16.msrb.mxu2 %v693_v31 }
  0x37   :  { %510 = vmatpush.bf16.msrb.mxu3 %v757_v35 }
  0x38   :  { %472 = vmatpush.bf16.msrb.mxu0 %v557_v41 }
  0x39   :  { %485 = vmatpush.bf16.msrb.mxu1 %v621_v42 }
  0x3a   :  { %498 = vmatpush.bf16.msrb.mxu2 %v685_v43 }
  0x3b   :  { %511 = vmatpush.bf16.msrb.mxu3 %v749_v47 }
  0x3c   :  { %473 = vmatpush.bf16.msrb.mxu0 %v549_v53 }
  0x3d   :  { %486 = vmatpush.bf16.msrb.mxu1 %v613_v54 }
  0x3e   :  { %499 = vmatpush.bf16.msrb.mxu2 %v677_v55 }
  0x3f   :  { %512 = vmatpush.bf16.msrb.mxu3 %v741_v59 }
  0x40   :  { %474 = vmatpush.bf16.msrb.mxu0 %v541_v5 }
  0x41   :  { %487 = vmatpush.bf16.msrb.mxu1 %v605_v6 }
  0x42   :  { %500 = vmatpush.bf16.msrb.mxu2 %v669_v7 }
  0x43   :  { %513 = vmatpush.bf16.msrb.mxu3 %v733_v8  ;;  %475 = vmatmul.bf16.vlgmr.msrb.gmra.mxu0 %v1131_v61 }
  0x44   :  { %488 = vmatmul.bf16.vlgmr.msrb.gmra.mxu1 %v1142_v2 }
  0x45   :  { %501 = vmatmul.bf16.vlgmr.msrb.gmra.mxu2 %v1129_v60 }
  0x46   :  { %514 = vmatmul.bf16.vlgmr.msrb.gmra.mxu3 %v1133_v62 }
  0xa0   :  { %v424_v9 = vpop.f32.mrf.mxu0 }
  0xa1   :  { %v437_v10 = vpop.f32.mrf.mxu1  ;;  %v425_v61 = vadd.f32 %v424_v9, %v81_v18 }
  0xa3   :  { %v438_v2 = vadd.f32 %v437_v10, %v425_v61 }
  0xa8   :  { %v450_v11 = vpop.f32.mrf.mxu2  ;;  %v426_v13 = vpop.f32.mrf.mxu0 }
  0xa9   :  { %v463_v12 = vpop.f32.mrf.mxu3  ;;  %v439_v14 = vpop.f32.mrf.mxu1  ;;  %v451_v62 = vadd.f32 %v450_v11, %v438_v2 }
  0xab   :  { %v464_v24 = vadd.f32 %v463_v12, %v451_v62 }
  0xad   :  { %v519_v30 = vmax.f32 %v464_v24, 0.0 }
  0xb0   :  { %v452_v15 = vpop.f32.mrf.mxu2 }
  0xb1   :  { %v465_v16 = vpop.f32.mrf.mxu3 }
  0xc0   :  { %v476_v20 = vpop.f32.mrf.mxu0 }
  0xc1   :  { %v477_v60 = vadd.f32 %v476_v20, %v82_v19  ;;  %v489_v21 = vpop.f32.mrf.mxu1 }
  0xc3   :  { %v490_v22 = vadd.f32 %v489_v21, %v477_v60 }
  0xc8   :  { %v502_v23 = vpop.f32.mrf.mxu2  ;;  %v478_v27 = vpop.f32.mrf.mxu0 }
  0xc9   :  { %v503_v25 = vadd.f32 %v502_v23, %v490_v22  ;;  %v515_v26 = vpop.f32.mrf.mxu3  ;;  %v491_v28 = vpop.f32.mrf.mxu1 }
  0xcb   :  { %v516_v29 = vadd.f32 %v515_v26, %v503_v25 }
  0xcd   :  { %v520_v31 = vmax.f32 %v516_v29, 0.0 }
  0xcf   :  { %v521_v32 = vpack.c.bf16 %v520_v31, %v519_v30 }
  0xd0   :  { %v504_v33 = vpop.f32.mrf.mxu2 }
  0xd1   :  { %v523_v34 = vrot.slane %v521_v32, 3  ;;  %v517_v35 = vpop.f32.mrf.mxu3 }
  0xd3   :  { %v527_v36 = vsel %vm524_vm0, %v521_v32, %v523_v34 }
  0xd4   :  { %529 = vst [vmem:[%s1286_s3] sm:$0x3] %v527_v36 }

// kernel: _lambda_.35
= control target key start
LH: loop header
LB: loop body
LE: loop exit
PB: predicated region body
PF: predicated region fallthrough
CT: control target
= control target key end

     0   :  { %s384_s0 = inlined_call_operand.vmem [shape: bf16[2,256], index: 0, kind: input, shape index: {}]   ;;  %s385_s1 = inlined_call_operand.vmem [shape: bf16[256,10], index: 1, kind: input, shape index: {}]   ;;  %s386_s2 = inlined_call_operand.vmem [shape: f32[1,10], index: 2, kind: input, shape index: {}]   ;;  %s387_s3 = inlined_call_operand.hbm [shape: f32[2,10], index: 3, kind: output, shape index: {}]  }
   0x1   :  { %v269_v0 = vld [vmem:[%s385_s1 + $0x38] sm:$0xff]  ;;  %v268_v2 = vld [vmem:[%s385_s1 + $0x30] sm:$0xff]  ;;  %v15_v4 = vld [vmem:[%s384_s0] sm:$0x3] }
   0x2   :  { %v277_v1 = vld [vmem:[%s385_s1 + $0x78] sm:$0xff]  ;;  %154 = vmatpush.bf16.msra.mxu0 %v269_v0  ;;  %v276_v3 = vld [vmem:[%s385_s1 + $0x70] sm:$0xff]  ;;  %v267_v5 = vld [vmem:[%s385_s1 + $0x28] sm:$0xff]  ;;  %53 = vst [vmem:[#allocation1] ss:$9 sm:$0xff] %v15_v4 }
   0x3   :  { %167 = vmatpush.bf16.msra.mxu1 %v277_v1  ;;  %v275_v6 = vld [vmem:[%s385_s1 + $0x68] sm:$0xff] }
   0x6   :  { %155 = vmatpush.bf16.msra.mxu0 %v268_v2 }
   0x7   :  { %168 = vmatpush.bf16.msra.mxu1 %v276_v3 }
   0x8   :  { %8 = vsyncpa [#allocation3], 0  ;;  %v266_v7 = vld [vmem:[%s385_s1 + $0x20] sm:$0xff]  ;;  %v265_v9 = vld [vmem:[%s385_s1 + $0x18] sm:$0xff]  ;;  %s306_s20 = smov [#allocation2]   ;;  %s189_s24 = sshll.u32 %s387_s3, 4  ;;  %s190_s24 = int_to_ptr.hbm [resolvable:$true] %s189_s24 }
   0x9   :  { %v274_v8 = vld [vmem:[%s385_s1 + $0x60] sm:$0xff]  ;;  %v273_v10 = vld [vmem:[%s385_s1 + $0x58] sm:$0xff]  ;;  %v264_v11 = vld [vmem:[%s385_s1 + $0x10] sm:$0xff]  ;;  %s187_s21 = sshll.u32 %s306_s20, 4  ;;  %vm180_vm0 = vcmask 74752   ;;  %s188_s21 = int_to_ptr.vmem [resolvable:$true] %s187_s21 }
   0xa   :  { %156 = vmatpush.bf16.msra.mxu0 %v267_v5  ;;  %v272_v12 = vld [vmem:[%s385_s1 + $0x50] sm:$0xff]  ;;  %v263_v13 = vld [vmem:[%s385_s1 + $0x8] sm:$0xff]  ;;  %v262_v15 = vld [vmem:[%s385_s1] sm:$0xff] }
   0xb   :  { %169 = vmatpush.bf16.msra.mxu1 %v275_v6  ;;  %v271_v14 = vld [vmem:[%s385_s1 + $0x48] sm:$0xff]  ;;  %v270_v16 = vld [vmem:[%s385_s1 + $0x40] sm:$0xff] }
   0xc   :  { %v54_v17 = vld [vmem:[#allocation1] sm:$0xff]  ;;  %v55_v18 = vld [vmem:[#allocation1 + $0x9] sm:$0xff] }
   0xd   :  { %v279_v19 = vld [vmem:[%s386_s2] ss:$0 sm:$0xff] }
   0xe   :  { %157 = vmatpush.bf16.msra.mxu0 %v266_v7 }
   0xf   :  { %170 = vmatpush.bf16.msra.mxu1 %v274_v8 }
  0x12   :  { %158 = vmatpush.bf16.msra.mxu0 %v265_v9 }
  0x13   :  { %171 = vmatpush.bf16.msra.mxu1 %v273_v10 }
  0x16   :  { %159 = vmatpush.bf16.msra.mxu0 %v264_v11 }
  0x17   :  { %172 = vmatpush.bf16.msra.mxu1 %v272_v12 }
  0x1a   :  { %160 = vmatpush.bf16.msra.mxu0 %v263_v13 }
  0x1b   :  { %173 = vmatpush.bf16.msra.mxu1 %v271_v14 }
  0x1e   :  { %161 = vmatpush.bf16.msra.mxu0 %v262_v15 }
  0x1f   :  { %174 = vmatpush.bf16.msra.mxu1 %v270_v16 }
  0x21   :  { %162 = vmatmul.bf16.vlgmr.msra.gmra.mxu0 %v54_v17 }
  0x22   :  { %175 = vmatmul.bf16.vlgmr.msra.gmra.mxu1 %v55_v18 }
  0x9e   :  { %v163_v20 = vpop.f32.mrf.mxu0 }
  0x9f   :  { %v176_v21 = vpop.f32.mrf.mxu1  ;;  %v164_v22 = vadd.f32 %v279_v19, %v163_v20 }
  0xa1   :  { %v177_v23 = vadd.f32 %v176_v21, %v164_v22 }
  0xa3   :  { %181 = vst.msk [vmem:[#allocation2] sm:$0x3] %vm180_vm0, %v177_v23 }
  0xa4   :  { %192 = dma.vmem_to_hbm [thread:$0]  %s188_s21, 32, %s190_s24, [#allocation3]  }
  0xa6   :  { %v165_v24 = vpop.f32.mrf.mxu0 }
  0xa7   :  { %v178_v25 = vpop.f32.mrf.mxu1 }
  0xa8   :  { %304 = dma.done.wait [#allocation3], 32  }
  0xa9   :  { %305 = vsyncadd [#allocation3], 4294967264 }
  0xaa   :  { %197 = vsyncpa [#allocation3], 1 }

</bundles_post_ra>
